<compile_context>
chip_gen: v6e
topology: v6e:2x2x1
jax: 0.10.0
libtpu: 0.0.40
codegen_flags: <defaults>
</compile_context>

<pallas_src>
import jax
import jax.numpy as jnp
from jax.experimental import pallas as pl
from jax.experimental.pallas import tpu as pltpu


D_IN, D_H1, D_H2 = 1024, 512, 256
BN_EPS = 1e-5


def _final_layer_kernel(x_ref, w1_ref, b1_ref, w2_ref, b2_ref, w3_ref, b3_ref, o_ref):
    # x_ref: (TB, 1024) bf16 batch tile.  Weights are pre-folded (BN absorbed), stored
    # transposed as (C_in, C_out) in bf16; biases are f32 with shape (1, C_out).
    # Matmuls run on the MXU with f32 accumulation; bias-add / ReLU stay f32 on the VPU.
    h = jnp.dot(x_ref[...], w1_ref[...],
                preferred_element_type=jnp.float32) + b1_ref[...]
    h = jnp.maximum(h, 0.0)

    h = jnp.dot(h.astype(jnp.bfloat16), w2_ref[...],
                preferred_element_type=jnp.float32) + b2_ref[...]
    h = jnp.maximum(h, 0.0)

    o_ref[...] = jnp.dot(h.astype(jnp.bfloat16), w3_ref[...],
                         preferred_element_type=jnp.float32) + b3_ref[...]


def fold_params(raw):
    """Fold BatchNorm (eval mode) into the fc weights/biases; transpose to (C_in, C_out).

    Weights stored in bf16 (MXU inputs, half the DMA bytes); biases stay f32.
    The fc3 output dimension is zero-padded up to a multiple of 128 so the kernel's
    output block is lane-dense (unmasked stores).
    """
    (W1, b1, W2, b2, W3, b3, g1, be1, m1, v1, g2, be2, m2, v2) = raw
    s1 = g1 / jnp.sqrt(v1 + BN_EPS)                              # (512,)
    s2 = g2 / jnp.sqrt(v2 + BN_EPS)                              # (256,)
    w1 = (W1 * s1[:, None]).T.astype(jnp.bfloat16)               # (1024, 512)
    bb1 = ((b1 - m1) * s1 + be1).reshape(1, -1).astype(jnp.float32)
    w2 = (W2 * s2[:, None]).T.astype(jnp.bfloat16)               # (512, 256)
    bb2 = ((b2 - m2) * s2 + be2).reshape(1, -1).astype(jnp.float32)

    n = W3.shape[0]
    n_pad = max(128, ((n + 127) // 128) * 128)
    w3 = jnp.pad(W3.T, ((0, 0), (0, n_pad - n))).astype(jnp.bfloat16)   # (256, n_pad)
    bb3 = jnp.pad(b3, (0, n_pad - n)).reshape(1, -1).astype(jnp.float32)
    return w1, bb1, w2, bb2, w3, bb3


def final_layer_forward(x, folded, n_out, *, batch_tile=512):
    """x: (B, 1024) f32. Returns (B, n_out) f32."""
    B, D = x.shape
    assert D == D_IN
    w1, b1, w2, b2, w3, b3 = folded
    n_pad = w3.shape[1]
    assert n_pad % 128 == 0 and n_out <= n_pad

    # Batch tile selection:
    #   B <= 256          -> one whole-batch tile (block == full array dims).
    #   256 < B <= tile   -> 256-row tiles so the grid has >= 2 parallel steps (v7x: 2 TCs).
    #   B > tile          -> batch_tile-row tiles (grid >= 2 automatically).
    if B <= 256:
        TB = B
    elif B <= batch_tile:
        TB = 256
    else:
        TB = batch_tile
    pad = (-B) % TB

    # Cast x to bf16 on the host: the matmul already ran in bf16, so this is numerically
    # identical but halves the input DMA bytes and the double-buffer VMEM footprint.
    x = x.astype(jnp.bfloat16)
    if pad:
        x = jnp.pad(x, ((0, pad), (0, 0)))
    Bp = B + pad

    flops = 2 * Bp * (D_IN * D_H1 + D_H1 * D_H2 + D_H2 * n_pad)
    bytes_accessed = (x.size * 2 + Bp * n_pad * 4
                      + 2 * (w1.size + w2.size + w3.size)
                      + 4 * (b1.size + b2.size + b3.size))

    def call(single_buffer_weights):
        def const_spec(shape):
            nd = len(shape)
            idx = lambda i, _nd=nd: (0,) * _nd
            if single_buffer_weights:
                # Grid-invariant operands: no need to double-buffer them.
                return pl.BlockSpec(shape, idx, pipeline_mode=pl.Buffered(1))
            return pl.BlockSpec(shape, idx)

        return pl.pallas_call(
            _final_layer_kernel,
            out_shape=jax.ShapeDtypeStruct((Bp, n_pad), jnp.float32),
            grid_spec=pltpu.PrefetchScalarGridSpec(
                num_scalar_prefetch=0,
                grid=(Bp // TB,),
                in_specs=[
                    pl.BlockSpec((TB, D_IN), lambda i: (i, 0)),      # batch tile of x
                    const_spec(w1.shape), const_spec(b1.shape),
                    const_spec(w2.shape), const_spec(b2.shape),
                    const_spec(w3.shape), const_spec(b3.shape),
                ],
                out_specs=pl.BlockSpec((TB, n_pad), lambda i: (i, 0)),
            ),
            compiler_params=pltpu.CompilerParams(
                dimension_semantics=("parallel",)),
            cost_estimate=pl.CostEstimate(
                flops=flops, transcendentals=0, bytes_accessed=bytes_accessed),
        )(x, w1, b1, w2, b2, w3, b3)

    try:
        out = call(True)
    except Exception:
        # Fallback if this JAX build rejects single-buffered (Buffered(1)) block specs.
        out = call(False)

    return out[:B, :n_out]


def init_raw_params(key, n=2):
    """Deterministic synthetic params in PyTorch layout: fc weights (C_out, C_in),
    plus non-trivial BatchNorm affine params and running stats."""
    def uniform(k, shape, fan_in):
        scale = 1.0 / jnp.sqrt(jnp.float32(fan_in))
        return jax.random.uniform(k, shape, jnp.float32, -scale, scale)

    ks = jax.random.split(key, 14)
    W1 = uniform(ks[0], (D_H1, D_IN), D_IN)
    b1 = uniform(ks[1], (D_H1,), D_IN)
    W2 = uniform(ks[2], (D_H2, D_H1), D_H1)
    b2 = uniform(ks[3], (D_H2,), D_H1)
    W3 = uniform(ks[4], (n, D_H2), D_H2)
    b3 = uniform(ks[5], (n,), D_H2)
    g1 = 1.0 + 0.1 * jax.random.normal(ks[6], (D_H1,), jnp.float32)
    be1 = 0.1 * jax.random.normal(ks[7], (D_H1,), jnp.float32)
    m1 = 0.1 * jax.random.normal(ks[8], (D_H1,), jnp.float32)
    v1 = 1.0 + 0.1 * jax.random.uniform(ks[9], (D_H1,), jnp.float32)
    g2 = 1.0 + 0.1 * jax.random.normal(ks[10], (D_H2,), jnp.float32)
    be2 = 0.1 * jax.random.normal(ks[11], (D_H2,), jnp.float32)
    m2 = 0.1 * jax.random.normal(ks[12], (D_H2,), jnp.float32)
    v2 = 1.0 + 0.1 * jax.random.uniform(ks[13], (D_H2,), jnp.float32)
    return (W1, b1, W2, b2, W3, b3, g1, be1, m1, v1, g2, be2, m2, v2)


def final_layer_reference(x, raw):
    """Pure-JAX f32 reference mirroring the eval-mode PyTorch forward."""
    (W1, b1, W2, b2, W3, b3, g1, be1, m1, v1, g2, be2, m2, v2) = raw
    h = x @ W1.T + b1
    h = jax.nn.relu(g1 * (h - m1) / jnp.sqrt(v1 + BN_EPS) + be1)
    h = h @ W2.T + b2
    h = jax.nn.relu(g2 * (h - m2) / jnp.sqrt(v2 + BN_EPS) + be2)
    return h @ W3.T + b3


if __name__ == "__main__":
    N_CLASSES = 2

    key = jax.random.PRNGKey(0)
    kx, kp, kx2 = jax.random.split(key, 3)

    raw_params = init_raw_params(kp, N_CLASSES)
    folded_params = fold_params(raw_params)

    # Small single-tile batch.
    B = 8
    x = jax.random.normal(kx, (B, D_IN), dtype=jnp.float32)
    out = jax.block_until_ready(final_layer_forward(x, folded_params, N_CLASSES))
    ref = final_layer_reference(x, raw_params)
    assert out.shape == (B, N_CLASSES)
    # Loosened tolerance: kernel runs the matmuls with bf16 inputs (f32 accumulation).
    assert jnp.allclose(out, ref, atol=2e-2, rtol=2e-2), "mismatch vs reference (B=8)"

    # Multi-tile batch: exercises 256-row tiling, batch padding and output-lane padding.
    B2 = 300
    x2 = jax.random.normal(kx2, (B2, D_IN), dtype=jnp.float32)
    out2 = jax.block_until_ready(final_layer_forward(x2, folded_params, N_CLASSES))
    ref2 = final_layer_reference(x2, raw_params)
    assert out2.shape == (B2, N_CLASSES)
    assert jnp.allclose(out2, ref2, atol=2e-2, rtol=2e-2), "mismatch vs reference (B=300)"

    print("KERNEL_OK")
</pallas_src>

<mosaic_0001>
module attributes {stable_mosaic.version = 11 : i64} {
  func.func @_final_layer_kernel(%arg0: i32, %arg1: memref<8x1024xbf16, #tpu.memory_space<vmem>>, %arg2: memref<1024x512xbf16, #tpu.memory_space<vmem>>, %arg3: memref<1x512xf32, #tpu.memory_space<vmem>>, %arg4: memref<512x256xbf16, #tpu.memory_space<vmem>>, %arg5: memref<1x256xf32, #tpu.memory_space<vmem>>, %arg6: memref<256x128xbf16, #tpu.memory_space<vmem>>, %arg7: memref<1x128xf32, #tpu.memory_space<vmem>>, %arg8: memref<8x128xf32, #tpu.memory_space<vmem>>) attributes {dimension_semantics = [#tpu.dimension_semantics<parallel>], iteration_bounds = array<i64: 1>, scalar_prefetch = 0 : i64, scratch_operands = 0 : i64, tpu.core_type = #tpu.core_type<tc>, window_params = [{transform_indices = @transform_0, window_bounds = array<i64: 8, 1024>}, {pipeline_mode = #tpu.pipeline_mode<synchronous>, transform_indices = @transform_1, window_bounds = array<i64: 1024, 512>}, {pipeline_mode = #tpu.pipeline_mode<synchronous>, transform_indices = @transform_2, window_bounds = array<i64: 1, 512>}, {pipeline_mode = #tpu.pipeline_mode<synchronous>, transform_indices = @transform_3, window_bounds = array<i64: 512, 256>}, {pipeline_mode = #tpu.pipeline_mode<synchronous>, transform_indices = @transform_4, window_bounds = array<i64: 1, 256>}, {pipeline_mode = #tpu.pipeline_mode<synchronous>, transform_indices = @transform_5, window_bounds = array<i64: 256, 128>}, {pipeline_mode = #tpu.pipeline_mode<synchronous>, transform_indices = @transform_6, window_bounds = array<i64: 1, 128>}, {transform_indices = @transform_7, window_bounds = array<i64: 8, 128>}]} {
    %c0 = arith.constant 0 : index
    %c0_0 = arith.constant 0 : index
    %0 = vector.load %arg1[%c0, %c0_0] : memref<8x1024xbf16, #tpu.memory_space<vmem>>, vector<8x1024xbf16>
    %c0_1 = arith.constant 0 : index
    %c0_2 = arith.constant 0 : index
    %1 = vector.load %arg2[%c0_1, %c0_2] : memref<1024x512xbf16, #tpu.memory_space<vmem>>, vector<1024x512xbf16>
    %cst = arith.constant dense<0.000000e+00> : vector<8x512xf32>
    %2 = tpu.matmul %0, %1, %cst {dimension_numbers = #tpu.dot_dimension_numbers<[1], [0], [0], [1], [0, 0, 1, 1], [], []>} : vector<8x1024xbf16>, vector<1024x512xbf16>, vector<8x512xf32> -> vector<8x512xf32>
    %c0_3 = arith.constant 0 : index
    %c0_4 = arith.constant 0 : index
    %3 = vector.load %arg3[%c0_3, %c0_4] : memref<1x512xf32, #tpu.memory_space<vmem>>, vector<1x512xf32>
    %4 = vector.broadcast %3 : vector<1x512xf32> to vector<8x512xf32>
    %5 = arith.addf %2, %4 : vector<8x512xf32>
    %cst_5 = arith.constant 0.000000e+00 : f32
    %6 = vector.broadcast %cst_5 : f32 to vector<8x512xf32>
    %7 = arith.maximumf %5, %6 : vector<8x512xf32>
    %8 = arith.truncf %7 : vector<8x512xf32> to vector<8x512xbf16>
    %c0_6 = arith.constant 0 : index
    %c0_7 = arith.constant 0 : index
    %9 = vector.load %arg4[%c0_6, %c0_7] : memref<512x256xbf16, #tpu.memory_space<vmem>>, vector<512x256xbf16>
    %cst_8 = arith.constant dense<0.000000e+00> : vector<8x256xf32>
    %10 = tpu.matmul %8, %9, %cst_8 {dimension_numbers = #tpu.dot_dimension_numbers<[1], [0], [0], [1], [0, 0, 1, 1], [], []>} : vector<8x512xbf16>, vector<512x256xbf16>, vector<8x256xf32> -> vector<8x256xf32>
    %c0_9 = arith.constant 0 : index
    %c0_10 = arith.constant 0 : index
    %11 = vector.load %arg5[%c0_9, %c0_10] : memref<1x256xf32, #tpu.memory_space<vmem>>, vector<1x256xf32>
    %12 = vector.broadcast %11 : vector<1x256xf32> to vector<8x256xf32>
    %13 = arith.addf %10, %12 : vector<8x256xf32>
    %cst_11 = arith.constant 0.000000e+00 : f32
    %14 = vector.broadcast %cst_11 : f32 to vector<8x256xf32>
    %15 = arith.maximumf %13, %14 : vector<8x256xf32>
    %16 = arith.truncf %15 : vector<8x256xf32> to vector<8x256xbf16>
    %c0_12 = arith.constant 0 : index
    %c0_13 = arith.constant 0 : index
    %17 = vector.load %arg6[%c0_12, %c0_13] : memref<256x128xbf16, #tpu.memory_space<vmem>>, vector<256x128xbf16>
    %cst_14 = arith.constant dense<0.000000e+00> : vector<8x128xf32>
    %18 = tpu.matmul %16, %17, %cst_14 {dimension_numbers = #tpu.dot_dimension_numbers<[1], [0], [0], [1], [0, 0, 1, 1], [], []>} : vector<8x256xbf16>, vector<256x128xbf16>, vector<8x128xf32> -> vector<8x128xf32>
    %c0_15 = arith.constant 0 : index
    %c0_16 = arith.constant 0 : index
    %19 = vector.load %arg7[%c0_15, %c0_16] : memref<1x128xf32, #tpu.memory_space<vmem>>, vector<1x128xf32>
    %20 = vector.broadcast %19 : vector<1x128xf32> to vector<8x128xf32>
    %21 = arith.addf %18, %20 : vector<8x128xf32>
    %c0_17 = arith.constant 0 : index
    %c0_18 = arith.constant 0 : index
    %22 = vector.load %arg8[%c0_17, %c0_18] : memref<8x128xf32, #tpu.memory_space<vmem>>, vector<8x128xf32>
    tpu.vector_store %arg8[%c0_17, %c0_18], %21 {strides = array<i32>} : memref<8x128xf32, #tpu.memory_space<vmem>>, vector<8x128xf32>,
    return
  }
  func.func @transform_0(%arg0: i32) -> (i32, i32) {
    %c0_i32 = arith.constant 0 : i32
    %c0_i32_0 = arith.constant 0 : i32
    return %arg0, %c0_i32 : i32, i32
  }
  func.func @transform_1(%arg0: i32) -> (i32, i32) {
    %c0_i32 = arith.constant 0 : i32
    %c0_i32_0 = arith.constant 0 : i32
    %c0_i32_1 = arith.constant 0 : i32
    return %c0_i32, %c0_i32_0 : i32, i32
  }
  func.func @transform_2(%arg0: i32) -> (i32, i32) {
    %c0_i32 = arith.constant 0 : i32
    %c0_i32_0 = arith.constant 0 : i32
    %c0_i32_1 = arith.constant 0 : i32
    return %c0_i32, %c0_i32_0 : i32, i32
  }
  func.func @transform_3(%arg0: i32) -> (i32, i32) {
    %c0_i32 = arith.constant 0 : i32
    %c0_i32_0 = arith.constant 0 : i32
    %c0_i32_1 = arith.constant 0 : i32
    return %c0_i32, %c0_i32_0 : i32, i32
  }
  func.func @transform_4(%arg0: i32) -> (i32, i32) {
    %c0_i32 = arith.constant 0 : i32
    %c0_i32_0 = arith.constant 0 : i32
    %c0_i32_1 = arith.constant 0 : i32
    return %c0_i32, %c0_i32_0 : i32, i32
  }
  func.func @transform_5(%arg0: i32) -> (i32, i32) {
    %c0_i32 = arith.constant 0 : i32
    %c0_i32_0 = arith.constant 0 : i32
    %c0_i32_1 = arith.constant 0 : i32
    return %c0_i32, %c0_i32_0 : i32, i32
  }
  func.func @transform_6(%arg0: i32) -> (i32, i32) {
    %c0_i32 = arith.constant 0 : i32
    %c0_i32_0 = arith.constant 0 : i32
    %c0_i32_1 = arith.constant 0 : i32
    return %c0_i32, %c0_i32_0 : i32, i32
  }
  func.func @transform_7(%arg0: i32) -> (i32, i32) {
    %c0_i32 = arith.constant 0 : i32
    %c0_i32_0 = arith.constant 0 : i32
    return %arg0, %c0_i32 : i32, i32
  }
}

module attributes {stable_mosaic.version = 11 : i64} {
  func.func @_final_layer_kernel(%arg0: i32, %arg1: memref<8x1024xbf16, #tpu.memory_space<vmem>>, %arg2: memref<1024x512xbf16, #tpu.memory_space<vmem>>, %arg3: memref<1x512xf32, #tpu.memory_space<vmem>>, %arg4: memref<512x256xbf16, #tpu.memory_space<vmem>>, %arg5: memref<1x256xf32, #tpu.memory_space<vmem>>, %arg6: memref<256x128xbf16, #tpu.memory_space<vmem>>, %arg7: memref<1x128xf32, #tpu.memory_space<vmem>>, %arg8: memref<8x128xf32, #tpu.memory_space<vmem>>) attributes {dimension_semantics = [#tpu.dimension_semantics<parallel>], iteration_bounds = array<i64: 1>, scalar_prefetch = 0 : i64, scratch_operands = 0 : i64, tpu.core_type = #tpu.core_type<tc>, window_params = [{transform_indices = @transform_0, window_bounds = array<i64: 8, 1024>}, {pipeline_mode = #tpu.pipeline_mode<synchronous>, transform_indices = @transform_1, window_bounds = array<i64: 1024, 512>}, {pipeline_mode = #tpu.pipeline_mode<synchronous>, transform_indices = @transform_2, window_bounds = array<i64: 1, 512>}, {pipeline_mode = #tpu.pipeline_mode<synchronous>, transform_indices = @transform_3, window_bounds = array<i64: 512, 256>}, {pipeline_mode = #tpu.pipeline_mode<synchronous>, transform_indices = @transform_4, window_bounds = array<i64: 1, 256>}, {pipeline_mode = #tpu.pipeline_mode<synchronous>, transform_indices = @transform_5, window_bounds = array<i64: 256, 128>}, {pipeline_mode = #tpu.pipeline_mode<synchronous>, transform_indices = @transform_6, window_bounds = array<i64: 1, 128>}, {transform_indices = @transform_7, window_bounds = array<i64: 8, 128>}]} {
    %c0 = arith.constant 0 : index
    %c0_0 = arith.constant 0 : index
    %0 = vector.load %arg1[%c0, %c0_0] : memref<8x1024xbf16, #tpu.memory_space<vmem>>, vector<8x1024xbf16>
    %c0_1 = arith.constant 0 : index
    %c0_2 = arith.constant 0 : index
    %1 = vector.load %arg2[%c0_1, %c0_2] : memref<1024x512xbf16, #tpu.memory_space<vmem>>, vector<1024x512xbf16>
    %cst = arith.constant dense<0.000000e+00> : vector<8x512xf32>
    %2 = tpu.matmul %0, %1, %cst {dimension_numbers = #tpu.dot_dimension_numbers<[1], [0], [0], [1], [0, 0, 1, 1], [], []>} : vector<8x1024xbf16>, vector<1024x512xbf16>, vector<8x512xf32> -> vector<8x512xf32>
    %c0_3 = arith.constant 0 : index
    %c0_4 = arith.constant 0 : index
    %3 = vector.load %arg3[%c0_3, %c0_4] : memref<1x512xf32, #tpu.memory_space<vmem>>, vector<1x512xf32>
    %4 = vector.broadcast %3 : vector<1x512xf32> to vector<8x512xf32>
    %5 = arith.addf %2, %4 : vector<8x512xf32>
    %cst_5 = arith.constant 0.000000e+00 : f32
    %6 = vector.broadcast %cst_5 : f32 to vector<8x512xf32>
    %7 = arith.maximumf %5, %6 : vector<8x512xf32>
    %8 = arith.truncf %7 : vector<8x512xf32> to vector<8x512xbf16>
    %c0_6 = arith.constant 0 : index
    %c0_7 = arith.constant 0 : index
    %9 = vector.load %arg4[%c0_6, %c0_7] : memref<512x256xbf16, #tpu.memory_space<vmem>>, vector<512x256xbf16>
    %cst_8 = arith.constant dense<0.000000e+00> : vector<8x256xf32>
    %10 = tpu.matmul %8, %9, %cst_8 {dimension_numbers = #tpu.dot_dimension_numbers<[1], [0], [0], [1], [0, 0, 1, 1], [], []>} : vector<8x512xbf16>, vector<512x256xbf16>, vector<8x256xf32> -> vector<8x256xf32>
    %c0_9 = arith.constant 0 : index
    %c0_10 = arith.constant 0 : index
    %11 = vector.load %arg5[%c0_9, %c0_10] : memref<1x256xf32, #tpu.memory_space<vmem>>, vector<1x256xf32>
    %12 = vector.broadcast %11 : vector<1x256xf32> to vector<8x256xf32>
    %13 = arith.addf %10, %12 : vector<8x256xf32>
    %cst_11 = arith.constant 0.000000e+00 : f32
    %14 = vector.broadcast %cst_11 : f32 to vector<8x256xf32>
    %15 = arith.maximumf %13, %14 : vector<8x256xf32>
    %16 = arith.truncf %15 : vector<8x256xf32> to vector<8x256xbf16>
    %c0_12 = arith.constant 0 : index
    %c0_13 = arith.constant 0 : index
    %17 = vector.load %arg6[%c0_12, %c0_13] : memref<256x128xbf16, #tpu.memory_space<vmem>>, vector<256x128xbf16>
    %cst_14 = arith.constant dense<0.000000e+00> : vector<8x128xf32>
    %18 = tpu.matmul %16, %17, %cst_14 {dimension_numbers = #tpu.dot_dimension_numbers<[1], [0], [0], [1], [0, 0, 1, 1], [], []>} : vector<8x256xbf16>, vector<256x128xbf16>, vector<8x128xf32> -> vector<8x128xf32>
    %c0_15 = arith.constant 0 : index
    %c0_16 = arith.constant 0 : index
    %19 = vector.load %arg7[%c0_15, %c0_16] : memref<1x128xf32, #tpu.memory_space<vmem>>, vector<1x128xf32>
    %20 = vector.broadcast %19 : vector<1x128xf32> to vector<8x128xf32>
    %21 = arith.addf %18, %20 : vector<8x128xf32>
    %c0_17 = arith.constant 0 : index
    %c0_18 = arith.constant 0 : index
    %22 = vector.load %arg8[%c0_17, %c0_18] : memref<8x128xf32, #tpu.memory_space<vmem>>, vector<8x128xf32>
    tpu.vector_store %arg8[%c0_17, %c0_18], %21 {strides = array<i32>} : memref<8x128xf32, #tpu.memory_space<vmem>>, vector<8x128xf32>,
    return
  }
  func.func @transform_0(%arg0: i32) -> (i32, i32) {
    %c0_i32 = arith.constant 0 : i32
    %c0_i32_0 = arith.constant 0 : i32
    return %arg0, %c0_i32 : i32, i32
  }
  func.func @transform_1(%arg0: i32) -> (i32, i32) {
    %c0_i32 = arith.constant 0 : i32
    %c0_i32_0 = arith.constant 0 : i32
    %c0_i32_1 = arith.constant 0 : i32
    return %c0_i32, %c0_i32_0 : i32, i32
  }
  func.func @transform_2(%arg0: i32) -> (i32, i32) {
    %c0_i32 = arith.constant 0 : i32
    %c0_i32_0 = arith.constant 0 : i32
    %c0_i32_1 = arith.constant 0 : i32
    return %c0_i32, %c0_i32_0 : i32, i32
  }
  func.func @transform_3(%arg0: i32) -> (i32, i32) {
    %c0_i32 = arith.constant 0 : i32
    %c0_i32_0 = arith.constant 0 : i32
    %c0_i32_1 = arith.constant 0 : i32
    return %c0_i32, %c0_i32_0 : i32, i32
  }
  func.func @transform_4(%arg0: i32) -> (i32, i32) {
    %c0_i32 = arith.constant 0 : i32
    %c0_i32_0 = arith.constant 0 : i32
    %c0_i32_1 = arith.constant 0 : i32
    return %c0_i32, %c0_i32_0 : i32, i32
  }
  func.func @transform_5(%arg0: i32) -> (i32, i32) {
    %c0_i32 = arith.constant 0 : i32
    %c0_i32_0 = arith.constant 0 : i32
    %c0_i32_1 = arith.constant 0 : i32
    return %c0_i32, %c0_i32_0 : i32, i32
  }
  func.func @transform_6(%arg0: i32) -> (i32, i32) {
    %c0_i32 = arith.constant 0 : i32
    %c0_i32_0 = arith.constant 0 : i32
    %c0_i32_1 = arith.constant 0 : i32
    return %c0_i32, %c0_i32_0 : i32, i32
  }
  func.func @transform_7(%arg0: i32) -> (i32, i32) {
    %c0_i32 = arith.constant 0 : i32
    %c0_i32_0 = arith.constant 0 : i32
    return %arg0, %c0_i32 : i32, i32
  }
}

</mosaic_0001>

<bundles_post_ra>
// kernel: tpu_custom_call.1
= control target key start
LH: loop header
LB: loop body
LE: loop exit
PB: predicated region body
PF: predicated region fallthrough
CT: control target
= control target key end

     0   :  { %12 = vsyncpa [#allocation3], 0  ;;  %s3856_s0 = inlined_call_operand.hbm [shape: bf16[8,1024], index: 0, kind: input, shape index: {}]   ;;  %s3857_s1 = inlined_call_operand.hbm [shape: bf16[1024,512], index: 1, kind: input, shape index: {}]   ;;  %s3858_s2 = inlined_call_operand.hbm [shape: f32[1,512], index: 2, kind: input, shape index: {}]   ;;  %s3859_s3 = inlined_call_operand.hbm [shape: bf16[512,256], index: 3, kind: input, shape index: {}]   ;;  %s3860_s4 = inlined_call_operand.vmem [shape: f32[1,256], index: 4, kind: input, shape index: {}]   ;;  %s3861_s5 = inlined_call_operand.hbm [shape: bf16[256,128], index: 5, kind: input, shape index: {}]   ;;  %s3862_s6 = inlined_call_operand.vmem [shape: f32[1,128], index: 6, kind: input, shape index: {}]   ;;  %s3863_s7 = inlined_call_operand.hbm [shape: f32[8,128], index: 7, kind: output, shape index: {}]  }
   0x1   :  { %13 = vsyncpa [#allocation6], 0 }
   0x2   :  { %14 = vsyncpa [#allocation9], 0 }
   0x3   :  { %15 = vsyncpa [#allocation4], 0  ;;  %s3704_s24 = smov [#allocation5]  }
   0x4   :  { %s31_s25 = sshll.u32 %s3704_s24, 4  ;;  %s32_s25 = int_to_ptr.vmem [resolvable:$true] %s31_s25 }
   0x5   :  { %s3584_s26 = scalar_lea.vmem %s32_s25, 32768  ;;  %p3589_p1 = scmp.lt.s32.totalorder %s32_s25, %s32_s25 }
   0x6   :  { %p3585_p0 = scmp.ne.s32.totalorder %s32_s25, %s3584_s26  ;;  %p3590_p2 = scmp.lt.s32.totalorder %s3584_s26, %s3584_s26 }
   0x8   :  { %p3591_p3 = por %p3590_p2, %p3589_p1 }
   0xa   :  { %p3592_p4 = pnand %p3591_p3, %p3585_p0 }
   0xc   :  { %3595 = shalt.err (!%p3592_p4)
}
   0xd   :  { %s3705_s27 = smov 256   ;;  %s3706_s28 = smov 16  }
   0xe   :  { %37 = dma.hbm_to_vmem [thread:$0]  %s3857_s1, 32768, %s32_s25, [#allocation6], %s3705_s27, %s3705_s27, %s3706_s28  }
   0xf   :  { %s3707_s8 = smov [#allocation8]  }
  0x10   :  { %s53_s9 = sshll.u32 %s3707_s8, 4  ;;  %s54_s9 = int_to_ptr.vmem [resolvable:$true] %s53_s9 }
  0x11   :  { %s3604_s10 = scalar_lea.vmem %s54_s9, 8192  ;;  %p3609_p6 = scmp.lt.s32.totalorder %s54_s9, %s54_s9 }
  0x12   :  { %p3605_p5 = scmp.ne.s32.totalorder %s54_s9, %s3604_s10  ;;  %p3610_p7 = scmp.lt.s32.totalorder %s3604_s10, %s3604_s10 }
  0x14   :  { %p3611_p8 = por %p3610_p7, %p3609_p6 }
  0x16   :  { %p3612_p9 = pnand %p3611_p8, %p3605_p5 }
  0x18   :  { %3615 = shalt.err (!%p3612_p9)
}
  0x19   :  { %s3708_s11 = smov 128   ;;  %s3709_s12 = smov 8  }
  0x1a   :  { %59 = dma.hbm_to_vmem [thread:$0]  %s3859_s3, 8192, %s54_s9, [#allocation9], %s3708_s11, %s3708_s11, %s3709_s12  }
  0x1b   :  { %s3710_s15 = smov [#allocation2]   ;;  %s3711_s17 = smov [#allocation7]  }
  0x1c   :  { %s22_s16 = sshll.u32 %s3710_s15, 4  ;;  %s44_s1 = sshll.u32 %s3711_s17, 4  ;;  %s23_s16 = int_to_ptr.vmem [resolvable:$true] %s22_s16  ;;  %s45_s1 = int_to_ptr.vmem [resolvable:$true] %s44_s1 }
  0x1d   :  { %s3624_s18 = scalar_lea.vmem %s23_s16, 512  ;;  %p3629_p11 = scmp.lt.s32.totalorder %s23_s16, %s23_s16 }
  0x1e   :  { %p3625_p10 = scmp.ne.s32.totalorder %s23_s16, %s3624_s18  ;;  %p3630_p12 = scmp.lt.s32.totalorder %s3624_s18, %s3624_s18 }
  0x20   :  { %p3631_p13 = por %p3630_p12, %p3629_p11 }
  0x22   :  { %p3632_p0 = pnand %p3631_p13, %p3625_p10 }
  0x24   :  { %3635 = shalt.err (!%p3632_p0)
}
  0x25   :  { %25 = dma.hbm_to_vmem [thread:$0]  %s3856_s0, 512, %s23_s16, [#allocation3]  }
  0x26   :  { %s3644_s21 = scalar_lea.vmem %s45_s1, 64  ;;  %p3649_p2 = scmp.lt.s32.totalorder %s45_s1, %s45_s1 }
  0x27   :  { %p3645_p1 = scmp.ne.s32.totalorder %s45_s1, %s3644_s21  ;;  %p3650_p3 = scmp.lt.s32.totalorder %s3644_s21, %s3644_s21 }
  0x29   :  { %p3651_p4 = por %p3650_p3, %p3649_p2 }
  0x2b   :  { %p3652_p5 = pnand %p3651_p4, %p3645_p1 }
  0x2d   :  { %3655 = shalt.err (!%p3652_p5)
}
  0x2e   :  { %47 = dma.hbm_to_vmem [thread:$0]  %s3858_s2, 64, %s45_s1, [#allocation6]  }
  0x2f   :  { %s3712_s23 = smov [#allocation10]  }
  0x30   :  { %s67_s24 = sshll.u32 %s3712_s23, 4  ;;  %s68_s24 = int_to_ptr.vmem [resolvable:$true] %s67_s24 }
  0x31   :  { %s3664_s25 = scalar_lea.vmem %s68_s24, 2048  ;;  %p3669_p7 = scmp.lt.s32.totalorder %s68_s24, %s68_s24 }
  0x32   :  { %p3665_p6 = scmp.ne.s32.totalorder %s68_s24, %s3664_s25  ;;  %p3670_p8 = scmp.lt.s32.totalorder %s3664_s25, %s3664_s25 }
  0x34   :  { %p3671_p9 = por %p3670_p8, %p3669_p7 }
  0x36   :  { %p3672_p10 = pnand %p3671_p9, %p3665_p6 }
  0x38   :  { %3675 = shalt.err (!%p3672_p10)
}
  0x39   :  { %s3713_s0 = smov 64   ;;  %s3714_s26 = smov 4  }
  0x3a   :  { %73 = dma.hbm_to_vmem [thread:$0]  %s3861_s5, 2048, %s68_s24, [#allocation9], %s3713_s0, %s3713_s0, %s3714_s26  }
  0x3b   :  { %3696 = dma.done.wait [#allocation3], 512  }
  0x3c   :  { %3697 = vsyncadd [#allocation3], 4294966784 }
  0x3d   :  { %3698 = dma.done.wait [#allocation6], 32832  }
  0x3e   :  { %3699 = vsyncadd [#allocation6], 4294934464 }
  0x3f   :  { %3700 = dma.done.wait [#allocation9], 10240  }
  0x40   :  { %3701 = vsyncadd [#allocation9], 4294957056  ;;  %v3072_v0 = vld [vmem:[#allocation5 + $0xe4] ss:$16 sps:$4 sm:$0xff]   ;;  %v3076_v2 = vld [vmem:[#allocation5 + $0xe0] ss:$16 sps:$4 sm:$0xff]  }
  0x41   :  { %v3074_v1 = vld [vmem:[#allocation5 + $0x2e4] ss:$16 sps:$4 sm:$0xff]   ;;  %1682 = vmatprep.subr.bf16.mxu0 %v3072_v0  ;;  %v3077_v3 = vld [vmem:[#allocation5 + $0x2e0] ss:$16 sps:$4 sm:$0xff]   ;;  %v93_v48 = vld [vmem:[#allocation2 + $0x8] sm:$0xff]  ;;  %s3715_s30 = smov [#allocation11]  }
  0x42   :  { %1723 = vmatprep.subr.bf16.mxu1 %v3074_v1  ;;  %v3078_v4 = vld [vmem:[#allocation5 + $0xc4] ss:$16 sps:$4 sm:$0xff]   ;;  %1683 = vmatpush1.bf16.msra.mxu0 %v3076_v2  ;;  %v3082_v6 = vld [vmem:[#allocation5 + $0xc0] ss:$16 sps:$4 sm:$0xff]   ;;  %v3773_v51 = vcombine.high %v93_v48, %v93_v48  ;;  %s2682_s8 = sshll.u32 %s3715_s30, 4  ;;  %s2683_s8 = int_to_ptr.vmem [resolvable:$true] %s2682_s8 }
  0x43   :  { %1724 = vmatpush1.bf16.msra.mxu1 %v3077_v3  ;;  %v3080_v5 = vld [vmem:[#allocation5 + $0x2c4] ss:$16 sps:$4 sm:$0xff]   ;;  %1684 = vmatprep.subr.bf16.mxu0 %v3078_v4  ;;  %v3083_v7 = vld [vmem:[#allocation5 + $0x2c0] ss:$16 sps:$4 sm:$0xff]   ;;  %s3676_s9 = scalar_lea.vmem %s2683_s8, 128  ;;  %p3681_p12 = scmp.lt.s32.totalorder %s2683_s8, %s2683_s8 }
  0x44   :  { %1725 = vmatprep.subr.bf16.mxu1 %v3080_v5  ;;  %v3084_v8 = vld [vmem:[#allocation5 + $0xa4] ss:$16 sps:$4 sm:$0xff]   ;;  %v3088_v10 = vld [vmem:[#allocation5 + $0xa0] ss:$16 sps:$4 sm:$0xff]   ;;  %1755 = vmatprep.mubr.bf16.mxu1 %v3773_v51  ;;  %p3677_p11 = scmp.ne.s32.totalorder %s2683_s8, %s3676_s9  ;;  %p3682_p13 = scmp.lt.s32.totalorder %s3676_s9, %s3676_s9 }
  0x45   :  { %v3086_v9 = vld [vmem:[#allocation5 + $0x2a4] ss:$16 sps:$4 sm:$0xff]   ;;  %v3089_v11 = vld [vmem:[#allocation5 + $0x2a0] ss:$16 sps:$4 sm:$0xff]  }
  0x46   :  { %1685 = vmatpush1.bf16.msra.mxu0 %v3082_v6  ;;  %v3090_v12 = vld [vmem:[#allocation5 + $0x84] ss:$16 sps:$4 sm:$0xff]   ;;  %v3094_v14 = vld [vmem:[#allocation5 + $0x80] ss:$16 sps:$4 sm:$0xff]   ;;  %p3683_p0 = por %p3682_p13, %p3681_p12 }
  0x47   :  { %1726 = vmatpush1.bf16.msra.mxu1 %v3083_v7  ;;  %1686 = vmatprep.subr.bf16.mxu0 %v3084_v8  ;;  %v3092_v13 = vld [vmem:[#allocation5 + $0x284] ss:$16 sps:$4 sm:$0xff]   ;;  %v3095_v15 = vld [vmem:[#allocation5 + $0x280] ss:$16 sps:$4 sm:$0xff]   ;;  %v3779_v7 = vcombine.low %v93_v48, %v93_v48 }
  0x48   :  { %1727 = vmatprep.subr.bf16.mxu1 %v3086_v9  ;;  %v3096_v16 = vld [vmem:[#allocation5 + $0x64] ss:$16 sps:$4 sm:$0xff]   ;;  %v3100_v18 = vld [vmem:[#allocation5 + $0x60] ss:$16 sps:$4 sm:$0xff]   ;;  %p3684_p1 = pnand %p3683_p0, %p3677_p11 }
  0x49   :  { %v3098_v17 = vld [vmem:[#allocation5 + $0x264] ss:$16 sps:$4 sm:$0xff]   ;;  %v3101_v19 = vld [vmem:[#allocation5 + $0x260] ss:$16 sps:$4 sm:$0xff]  }
  0x4a   :  { %1687 = vmatpush1.bf16.msra.mxu0 %v3088_v10  ;;  %v3102_v20 = vld [vmem:[#allocation5 + $0x44] ss:$16 sps:$4 sm:$0xff]   ;;  %v3106_v22 = vld [vmem:[#allocation5 + $0x40] ss:$16 sps:$4 sm:$0xff]  }
  0x4b   :  { %1728 = vmatpush1.bf16.msra.mxu1 %v3089_v11  ;;  %1688 = vmatprep.subr.bf16.mxu0 %v3090_v12  ;;  %v3104_v21 = vld [vmem:[#allocation5 + $0x244] ss:$16 sps:$4 sm:$0xff]   ;;  %v3107_v23 = vld [vmem:[#allocation5 + $0x240] ss:$16 sps:$4 sm:$0xff]  }
  0x4c   :  { %1729 = vmatprep.subr.bf16.mxu1 %v3092_v13  ;;  %v3108_v24 = vld [vmem:[#allocation5 + $0x24] ss:$16 sps:$4 sm:$0xff]   ;;  %v3112_v26 = vld [vmem:[#allocation5 + $0x20] ss:$16 sps:$4 sm:$0xff]  }
  0x4d   :  { %v3110_v25 = vld [vmem:[#allocation5 + $0x224] ss:$16 sps:$4 sm:$0xff]   ;;  %v3113_v27 = vld [vmem:[#allocation5 + $0x220] ss:$16 sps:$4 sm:$0xff]  }
  0x4e   :  { %1689 = vmatpush1.bf16.msra.mxu0 %v3094_v14  ;;  %v3114_v28 = vld [vmem:[#allocation5 + $0x4] ss:$16 sps:$4 sm:$0xff]   ;;  %v3118_v30 = vld [vmem:[#allocation5] ss:$16 sps:$4 sm:$0xff]  }
  0x4f   :  { %1730 = vmatpush1.bf16.msra.mxu1 %v3095_v15  ;;  %1690 = vmatprep.subr.bf16.mxu0 %v3096_v16  ;;  %v3116_v29 = vld [vmem:[#allocation5 + $0x204] ss:$16 sps:$4 sm:$0xff]   ;;  %v3119_v31 = vld [vmem:[#allocation5 + $0x200] ss:$16 sps:$4 sm:$0xff]  }
  0x50   :  { %1731 = vmatprep.subr.bf16.mxu1 %v3098_v17  ;;  %v3120_v32 = vld [vmem:[#allocation5 + $0x1e4] ss:$16 sps:$4 sm:$0xff]   ;;  %v3124_v34 = vld [vmem:[#allocation5 + $0x1e0] ss:$16 sps:$4 sm:$0xff]  }
  0x51   :  { %v3122_v33 = vld [vmem:[#allocation5 + $0x3e4] ss:$16 sps:$4 sm:$0xff]   ;;  %v3125_v35 = vld [vmem:[#allocation5 + $0x3e0] ss:$16 sps:$4 sm:$0xff]  }
  0x52   :  { %1691 = vmatpush1.bf16.msra.mxu0 %v3100_v18  ;;  %v3126_v36 = vld [vmem:[#allocation5 + $0x1c4] ss:$16 sps:$4 sm:$0xff]   ;;  %v3130_v38 = vld [vmem:[#allocation5 + $0x1c0] ss:$16 sps:$4 sm:$0xff]  }
  0x53   :  { %1732 = vmatpush1.bf16.msra.mxu1 %v3101_v19  ;;  %1692 = vmatprep.subr.bf16.mxu0 %v3102_v20  ;;  %v3128_v37 = vld [vmem:[#allocation5 + $0x3c4] ss:$16 sps:$4 sm:$0xff]   ;;  %v3131_v39 = vld [vmem:[#allocation5 + $0x3c0] ss:$16 sps:$4 sm:$0xff]  }
  0x54   :  { %1733 = vmatprep.subr.bf16.mxu1 %v3104_v21  ;;  %v3132_v40 = vld [vmem:[#allocation5 + $0x1a4] ss:$16 sps:$4 sm:$0xff]   ;;  %v3136_v42 = vld [vmem:[#allocation5 + $0x1a0] ss:$16 sps:$4 sm:$0xff]  }
  0x55   :  { %v3134_v41 = vld [vmem:[#allocation5 + $0x3a4] ss:$16 sps:$4 sm:$0xff]   ;;  %v3137_v43 = vld [vmem:[#allocation5 + $0x3a0] ss:$16 sps:$4 sm:$0xff]  }
  0x56   :  { %1693 = vmatpush1.bf16.msra.mxu0 %v3106_v22  ;;  %v3138_v44 = vld [vmem:[#allocation5 + $0x184] ss:$16 sps:$4 sm:$0xff]   ;;  %v3142_v49 = vld [vmem:[#allocation5 + $0x180] ss:$16 sps:$4 sm:$0xff]  }
  0x57   :  { %1734 = vmatpush1.bf16.msra.mxu1 %v3107_v23  ;;  %1694 = vmatprep.subr.bf16.mxu0 %v3108_v24  ;;  %v3140_v45 = vld [vmem:[#allocation5 + $0x384] ss:$16 sps:$4 sm:$0xff]   ;;  %v3143_v50 = vld [vmem:[#allocation5 + $0x380] ss:$16 sps:$4 sm:$0xff]  }
  0x58   :  { %1735 = vmatprep.subr.bf16.mxu1 %v3110_v25  ;;  %v92_v46 = vld [vmem:[#allocation2] sm:$0xff] }
  0x59   :  { %v3771_v47 = vcombine.high %v92_v46, %v92_v46  ;;  %v3144_v52 = vld [vmem:[#allocation5 + $0x164] ss:$16 sps:$4 sm:$0xff]   ;;  %v3148_v54 = vld [vmem:[#allocation5 + $0x160] ss:$16 sps:$4 sm:$0xff]   ;;  %v3777_v6 = vcombine.low %v92_v46, %v92_v46 }
  0x5a   :  { %1695 = vmatpush1.bf16.msra.mxu0 %v3112_v26  ;;  %v3146_v53 = vld [vmem:[#allocation5 + $0x364] ss:$16 sps:$4 sm:$0xff]   ;;  %v3149_v55 = vld [vmem:[#allocation5 + $0x360] ss:$16 sps:$4 sm:$0xff]  }
  0x5b   :  { %1736 = vmatpush1.bf16.msra.mxu1 %v3113_v27  ;;  %1696 = vmatprep.subr.bf16.mxu0 %v3114_v28  ;;  %v3150_v56 = vld [vmem:[#allocation5 + $0x144] ss:$16 sps:$4 sm:$0xff]   ;;  %v3154_v58 = vld [vmem:[#allocation5 + $0x140] ss:$16 sps:$4 sm:$0xff]  }
  0x5c   :  { %1737 = vmatprep.subr.bf16.mxu1 %v3116_v29  ;;  %1714 = vmatprep.mubr.bf16.mxu0 %v3771_v47  ;;  %v3152_v57 = vld [vmem:[#allocation5 + $0x344] ss:$16 sps:$4 sm:$0xff]   ;;  %v3155_v59 = vld [vmem:[#allocation5 + $0x340] ss:$16 sps:$4 sm:$0xff]  }
  0x5d   :  { %v3156_v60 = vld [vmem:[#allocation5 + $0x124] ss:$16 sps:$4 sm:$0xff]   ;;  %v3160_v62 = vld [vmem:[#allocation5 + $0x120] ss:$16 sps:$4 sm:$0xff]  }
  0x5e   :  { %1697 = vmatpush1.bf16.msra.mxu0 %v3118_v30  ;;  %v3158_v61 = vld [vmem:[#allocation5 + $0x324] ss:$16 sps:$4 sm:$0xff]   ;;  %v3161_v63 = vld [vmem:[#allocation5 + $0x320] ss:$16 sps:$4 sm:$0xff]  }
  0x5f   :  { %1738 = vmatpush1.bf16.msra.mxu1 %v3119_v31  ;;  %1698 = vmatprep.subr.bf16.mxu0 %v3120_v32  ;;  %v3162_v0 = vld [vmem:[#allocation5 + $0x104] ss:$16 sps:$4 sm:$0xff]   ;;  %v3166_v2 = vld [vmem:[#allocation5 + $0x100] ss:$16 sps:$4 sm:$0xff]  }
  0x60   :  { %1739 = vmatprep.subr.bf16.mxu1 %v3122_v33  ;;  %v3164_v1 = vld [vmem:[#allocation5 + $0x304] ss:$16 sps:$4 sm:$0xff]   ;;  %v3167_v3 = vld [vmem:[#allocation5 + $0x300] ss:$16 sps:$4 sm:$0xff]   ;;  %v3785_v33 = vld [vmem:[#allocation2 + $0x18] sm:$0xff] }
  0x61   :  { %v3174_v4 = vld [vmem:[#allocation5 + $0x4e4] ss:$16 sps:$4 sm:$0xff]   ;;  %v3172_v8 = vld [vmem:[#allocation5 + $0x4e0] ss:$16 sps:$4 sm:$0xff]  }
  0x62   :  { %1699 = vmatpush2.bf16.msra.mxu0 %v3124_v34  ;;  %v3177_v5 = vld [vmem:[#allocation5 + $0x6e4] ss:$16 sps:$4 sm:$0xff]   ;;  %v3175_v9 = vld [vmem:[#allocation5 + $0x6e0] ss:$16 sps:$4 sm:$0xff]  }
  0x63   :  { %1740 = vmatpush2.bf16.msra.mxu1 %v3125_v35  ;;  %1700 = vmatprep.subr.bf16.mxu0 %v3126_v36  ;;  %v3180_v10 = vld [vmem:[#allocation5 + $0x4c4] ss:$16 sps:$4 sm:$0xff]   ;;  %v3178_v12 = vld [vmem:[#allocation5 + $0x4c0] ss:$16 sps:$4 sm:$0xff]  }
  0x64   :  { %1741 = vmatprep.subr.bf16.mxu1 %v3128_v37  ;;  %v3183_v11 = vld [vmem:[#allocation5 + $0x6c4] ss:$16 sps:$4 sm:$0xff]   ;;  %v3181_v13 = vld [vmem:[#allocation5 + $0x6c0] ss:$16 sps:$4 sm:$0xff]   ;;  %v3793_v37 = vcombine.high %v3785_v33, %v3785_v33 }
  0x65   :  { %v3186_v14 = vld [vmem:[#allocation5 + $0x4a4] ss:$16 sps:$4 sm:$0xff]   ;;  %v3184_v16 = vld [vmem:[#allocation5 + $0x4a0] ss:$16 sps:$4 sm:$0xff]  }
  0x66   :  { %1701 = vmatpush2.bf16.msra.mxu0 %v3130_v38  ;;  %v3189_v15 = vld [vmem:[#allocation5 + $0x6a4] ss:$16 sps:$4 sm:$0xff]   ;;  %v3187_v17 = vld [vmem:[#allocation5 + $0x6a0] ss:$16 sps:$4 sm:$0xff]  }
  0x67   :  { %1742 = vmatpush2.bf16.msra.mxu1 %v3131_v39  ;;  %1702 = vmatprep.subr.bf16.mxu0 %v3132_v40  ;;  %v3192_v18 = vld [vmem:[#allocation5 + $0x484] ss:$16 sps:$4 sm:$0xff]   ;;  %v3190_v20 = vld [vmem:[#allocation5 + $0x480] ss:$16 sps:$4 sm:$0xff]  }
  0x68   :  { %1743 = vmatprep.subr.bf16.mxu1 %v3134_v41  ;;  %v3195_v19 = vld [vmem:[#allocation5 + $0x684] ss:$16 sps:$4 sm:$0xff]   ;;  %v3193_v21 = vld [vmem:[#allocation5 + $0x680] ss:$16 sps:$4 sm:$0xff]  }
  0x69   :  { %v3198_v22 = vld [vmem:[#allocation5 + $0x464] ss:$16 sps:$4 sm:$0xff]   ;;  %v3196_v24 = vld [vmem:[#allocation5 + $0x460] ss:$16 sps:$4 sm:$0xff]  }
  0x6a   :  { %1703 = vmatpush2.bf16.msra.mxu0 %v3136_v42  ;;  %v3201_v23 = vld [vmem:[#allocation5 + $0x664] ss:$16 sps:$4 sm:$0xff]   ;;  %v3199_v25 = vld [vmem:[#allocation5 + $0x660] ss:$16 sps:$4 sm:$0xff]  }
  0x6b   :  { %1744 = vmatpush2.bf16.msra.mxu1 %v3137_v43  ;;  %1704 = vmatprep.subr.bf16.mxu0 %v3138_v44  ;;  %v3204_v26 = vld [vmem:[#allocation5 + $0x444] ss:$16 sps:$4 sm:$0xff]   ;;  %v3202_v28 = vld [vmem:[#allocation5 + $0x440] ss:$16 sps:$4 sm:$0xff]  }
  0x6c   :  { %1745 = vmatprep.subr.bf16.mxu1 %v3140_v45  ;;  %v3207_v27 = vld [vmem:[#allocation5 + $0x644] ss:$16 sps:$4 sm:$0xff]   ;;  %v3205_v29 = vld [vmem:[#allocation5 + $0x640] ss:$16 sps:$4 sm:$0xff]  }
  0x6d   :  { %v3210_v30 = vld [vmem:[#allocation5 + $0x424] ss:$16 sps:$4 sm:$0xff]   ;;  %v3208_v34 = vld [vmem:[#allocation5 + $0x420] ss:$16 sps:$4 sm:$0xff]  }
  0x6e   :  { %1705 = vmatpush2.bf16.msra.mxu0 %v3142_v49  ;;  %v3213_v31 = vld [vmem:[#allocation5 + $0x624] ss:$16 sps:$4 sm:$0xff]   ;;  %v3211_v35 = vld [vmem:[#allocation5 + $0x620] ss:$16 sps:$4 sm:$0xff]  }
  0x6f   :  { %1746 = vmatpush2.bf16.msra.mxu1 %v3143_v50  ;;  %1706 = vmatprep.subr.bf16.mxu0 %v3144_v52  ;;  %v3783_v32 = vld [vmem:[#allocation2 + $0x10] sm:$0xff] }
  0x70   :  { %1747 = vmatprep.subr.bf16.mxu1 %v3146_v53  ;;  %v3789_v36 = vcombine.high %v3783_v32, %v3783_v32  ;;  %v3216_v38 = vld [vmem:[#allocation5 + $0x404] ss:$16 sps:$4 sm:$0xff]   ;;  %v3214_v40 = vld [vmem:[#allocation5 + $0x400] ss:$16 sps:$4 sm:$0xff]  }
  0x71   :  { %v3219_v39 = vld [vmem:[#allocation5 + $0x604] ss:$16 sps:$4 sm:$0xff]   ;;  %v3217_v41 = vld [vmem:[#allocation5 + $0x600] ss:$16 sps:$4 sm:$0xff]  }
  0x72   :  { %1707 = vmatpush2.bf16.msra.mxu0 %v3148_v54  ;;  %v3222_v42 = vld [vmem:[#allocation5 + $0x5e4] ss:$16 sps:$4 sm:$0xff]   ;;  %v3220_v44 = vld [vmem:[#allocation5 + $0x5e0] ss:$16 sps:$4 sm:$0xff]  }
  0x73   :  { %1748 = vmatpush2.bf16.msra.mxu1 %v3149_v55  ;;  %1708 = vmatprep.subr.bf16.mxu0 %v3150_v56  ;;  %v3225_v43 = vld [vmem:[#allocation5 + $0x7e4] ss:$16 sps:$4 sm:$0xff]   ;;  %v3223_v45 = vld [vmem:[#allocation5 + $0x7e0] ss:$16 sps:$4 sm:$0xff]  }
  0x74   :  { %1749 = vmatprep.subr.bf16.mxu1 %v3152_v57  ;;  %v3228_v46 = vld [vmem:[#allocation5 + $0x5c4] ss:$16 sps:$4 sm:$0xff]   ;;  %v3226_v49 = vld [vmem:[#allocation5 + $0x5c0] ss:$16 sps:$4 sm:$0xff]  }
  0x75   :  { %v3231_v48 = vld [vmem:[#allocation5 + $0x7c4] ss:$16 sps:$4 sm:$0xff]   ;;  %v3229_v50 = vld [vmem:[#allocation5 + $0x7c0] ss:$16 sps:$4 sm:$0xff]  }
  0x76   :  { %1709 = vmatpush2.bf16.msra.mxu0 %v3154_v58  ;;  %v3234_v52 = vld [vmem:[#allocation5 + $0x5a4] ss:$16 sps:$4 sm:$0xff]   ;;  %v3232_v54 = vld [vmem:[#allocation5 + $0x5a0] ss:$16 sps:$4 sm:$0xff]  }
  0x77   :  { %1750 = vmatpush2.bf16.msra.mxu1 %v3155_v59  ;;  %1710 = vmatprep.subr.bf16.mxu0 %v3156_v60  ;;  %v3237_v53 = vld [vmem:[#allocation5 + $0x7a4] ss:$16 sps:$4 sm:$0xff]   ;;  %v3235_v55 = vld [vmem:[#allocation5 + $0x7a0] ss:$16 sps:$4 sm:$0xff]  }
  0x78   :  { %1751 = vmatprep.subr.bf16.mxu1 %v3158_v61  ;;  %v3240_v56 = vld [vmem:[#allocation5 + $0x584] ss:$16 sps:$4 sm:$0xff]   ;;  %v3238_v58 = vld [vmem:[#allocation5 + $0x580] ss:$16 sps:$4 sm:$0xff]  }
  0x79   :  { %v3243_v57 = vld [vmem:[#allocation5 + $0x784] ss:$16 sps:$4 sm:$0xff]   ;;  %v3241_v59 = vld [vmem:[#allocation5 + $0x780] ss:$16 sps:$4 sm:$0xff]  }
  0x7a   :  { %1711 = vmatpush2.bf16.msra.mxu0 %v3160_v62  ;;  %v3246_v60 = vld [vmem:[#allocation5 + $0x564] ss:$16 sps:$4 sm:$0xff]   ;;  %v3244_v62 = vld [vmem:[#allocation5 + $0x560] ss:$16 sps:$4 sm:$0xff]  }
  0x7b   :  { %1752 = vmatpush2.bf16.msra.mxu1 %v3161_v63  ;;  %1712 = vmatprep.subr.bf16.mxu0 %v3162_v0  ;;  %v3249_v61 = vld [vmem:[#allocation5 + $0x764] ss:$16 sps:$4 sm:$0xff]   ;;  %v3247_v63 = vld [vmem:[#allocation5 + $0x760] ss:$16 sps:$4 sm:$0xff]  }
  0x7c   :  { %1753 = vmatprep.subr.bf16.mxu1 %v3164_v1  ;;  %v3252_v0 = vld [vmem:[#allocation5 + $0x544] ss:$16 sps:$4 sm:$0xff]  }
  0x7d   :  { %v3255_v1 = vld [vmem:[#allocation5 + $0x744] ss:$16 sps:$4 sm:$0xff]  }
  0x7e   :  { %1713 = vmatpush2.bf16.msra.mxu0 %v3166_v2  ;;  %v3250_v2 = vld [vmem:[#allocation5 + $0x540] ss:$16 sps:$4 sm:$0xff]  }
  0x7f   :  { %1754 = vmatpush2.bf16.msra.mxu1 %v3167_v3  ;;  %1764 = vmatprep.subr.bf16.mxu0 %v3174_v4  ;;  %v3253_v3 = vld [vmem:[#allocation5 + $0x740] ss:$16 sps:$4 sm:$0xff]   ;;  %v3258_v4 = vld [vmem:[#allocation5 + $0x524] ss:$16 sps:$4 sm:$0xff]  }
  0x80   :  { %1805 = vmatprep.subr.bf16.mxu1 %v3177_v5  ;;  %v3261_v5 = vld [vmem:[#allocation5 + $0x724] ss:$16 sps:$4 sm:$0xff]  }
  0x81   :  { %1715 = vmatmul.mubr.bf16.vlgmr.msra.gmra.mxu0 %v3777_v6 }
  0x82   :  { %1756 = vmatmul.mubr.bf16.vlgmr.msra.gmra.mxu1 %v3779_v7  ;;  %1765 = vmatpush1.bf16.msra.mxu0 %v3172_v8  ;;  %v3256_v8 = vld [vmem:[#allocation5 + $0x520] ss:$16 sps:$4 sm:$0xff]  }
  0x83   :  { %1806 = vmatpush1.bf16.msra.mxu1 %v3175_v9  ;;  %1766 = vmatprep.subr.bf16.mxu0 %v3180_v10  ;;  %v3259_v9 = vld [vmem:[#allocation5 + $0x720] ss:$16 sps:$4 sm:$0xff]   ;;  %v3264_v10 = vld [vmem:[#allocation5 + $0x504] ss:$16 sps:$4 sm:$0xff]  }
  0x84   :  { %1807 = vmatprep.subr.bf16.mxu1 %v3183_v11  ;;  %1796 = vmatprep.mubr.bf16.mxu0 %v3789_v36  ;;  %v3267_v11 = vld [vmem:[#allocation5 + $0x704] ss:$16 sps:$4 sm:$0xff]  }
  0x85   :  { %1837 = vmatprep.mubr.bf16.mxu1 %v3793_v37 }
  0x86   :  { %1767 = vmatpush1.bf16.msra.mxu0 %v3178_v12  ;;  %v3262_v12 = vld [vmem:[#allocation5 + $0x500] ss:$16 sps:$4 sm:$0xff]  }
  0x87   :  { %1808 = vmatpush1.bf16.msra.mxu1 %v3181_v13  ;;  %1768 = vmatprep.subr.bf16.mxu0 %v3186_v14  ;;  %v3265_v13 = vld [vmem:[#allocation5 + $0x700] ss:$16 sps:$4 sm:$0xff]   ;;  %v3274_v14 = vld [vmem:[#allocation5 + $0xec] ss:$16 sps:$4 sm:$0xff]  }
  0x88   :  { %1809 = vmatprep.subr.bf16.mxu1 %v3189_v15  ;;  %v3277_v15 = vld [vmem:[#allocation5 + $0x2ec] ss:$16 sps:$4 sm:$0xff]  }
  0x8a   :  { %1769 = vmatpush1.bf16.msra.mxu0 %v3184_v16  ;;  %v3799_v16 = vcombine.low %v3783_v32, %v3783_v32  ;;  %v3298_v32 = vld [vmem:[#allocation5 + $0x6c] ss:$16 sps:$4 sm:$0xff]  }
  0x8b   :  { %1810 = vmatpush1.bf16.msra.mxu1 %v3187_v17  ;;  %1770 = vmatprep.subr.bf16.mxu0 %v3192_v18  ;;  %v3803_v17 = vcombine.low %v3785_v33, %v3785_v33  ;;  %v3272_v18 = vld [vmem:[#allocation5 + $0xe8] ss:$16 sps:$4 sm:$0xff]   ;;  %v3301_v33 = vld [vmem:[#allocation5 + $0x26c] ss:$16 sps:$4 sm:$0xff]  }
  0x8c   :  { %1811 = vmatprep.subr.bf16.mxu1 %v3195_v19  ;;  %v3275_v19 = vld [vmem:[#allocation5 + $0x2e8] ss:$16 sps:$4 sm:$0xff]  }
  0x8e   :  { %1771 = vmatpush1.bf16.msra.mxu0 %v3190_v20  ;;  %v3280_v20 = vld [vmem:[#allocation5 + $0xcc] ss:$16 sps:$4 sm:$0xff]  }
  0x8f   :  { %1812 = vmatpush1.bf16.msra.mxu1 %v3193_v21  ;;  %1772 = vmatprep.subr.bf16.mxu0 %v3198_v22  ;;  %v3283_v21 = vld [vmem:[#allocation5 + $0x2cc] ss:$16 sps:$4 sm:$0xff]   ;;  %v3278_v22 = vld [vmem:[#allocation5 + $0xc8] ss:$16 sps:$4 sm:$0xff]  }
  0x90   :  { %1813 = vmatprep.subr.bf16.mxu1 %v3201_v23  ;;  %v3281_v23 = vld [vmem:[#allocation5 + $0x2c8] ss:$16 sps:$4 sm:$0xff]  }
  0x92   :  { %1773 = vmatpush1.bf16.msra.mxu0 %v3196_v24  ;;  %v3286_v24 = vld [vmem:[#allocation5 + $0xac] ss:$16 sps:$4 sm:$0xff]  }
  0x93   :  { %1814 = vmatpush1.bf16.msra.mxu1 %v3199_v25  ;;  %1774 = vmatprep.subr.bf16.mxu0 %v3204_v26  ;;  %v3289_v25 = vld [vmem:[#allocation5 + $0x2ac] ss:$16 sps:$4 sm:$0xff]   ;;  %v3284_v26 = vld [vmem:[#allocation5 + $0xa8] ss:$16 sps:$4 sm:$0xff]  }
  0x94   :  { %1815 = vmatprep.subr.bf16.mxu1 %v3207_v27  ;;  %v3287_v27 = vld [vmem:[#allocation5 + $0x2a8] ss:$16 sps:$4 sm:$0xff]  }
  0x96   :  { %1775 = vmatpush1.bf16.msra.mxu0 %v3202_v28  ;;  %v3292_v28 = vld [vmem:[#allocation5 + $0x8c] ss:$16 sps:$4 sm:$0xff]  }
  0x97   :  { %1816 = vmatpush1.bf16.msra.mxu1 %v3205_v29  ;;  %1776 = vmatprep.subr.bf16.mxu0 %v3210_v30  ;;  %v3295_v29 = vld [vmem:[#allocation5 + $0x28c] ss:$16 sps:$4 sm:$0xff]   ;;  %v3290_v30 = vld [vmem:[#allocation5 + $0x88] ss:$16 sps:$4 sm:$0xff]  }
  0x98   :  { %1817 = vmatprep.subr.bf16.mxu1 %v3213_v31  ;;  %v3293_v31 = vld [vmem:[#allocation5 + $0x288] ss:$16 sps:$4 sm:$0xff]  }
  0x9a   :  { %1777 = vmatpush1.bf16.msra.mxu0 %v3208_v34  ;;  %v3296_v34 = vld [vmem:[#allocation5 + $0x68] ss:$16 sps:$4 sm:$0xff]  }
  0x9b   :  { %1818 = vmatpush1.bf16.msra.mxu1 %v3211_v35  ;;  %1778 = vmatprep.subr.bf16.mxu0 %v3216_v38  ;;  %v3307_v35 = vld [vmem:[#allocation5 + $0x24c] ss:$16 sps:$4 sm:$0xff]   ;;  %v3302_v38 = vld [vmem:[#allocation5 + $0x48] ss:$16 sps:$4 sm:$0xff]  }
  0x9c   :  { %1819 = vmatprep.subr.bf16.mxu1 %v3219_v39  ;;  %v3305_v39 = vld [vmem:[#allocation5 + $0x248] ss:$16 sps:$4 sm:$0xff]  }
  0x9e   :  { %1779 = vmatpush1.bf16.msra.mxu0 %v3214_v40  ;;  %v3310_v40 = vld [vmem:[#allocation5 + $0x2c] ss:$16 sps:$4 sm:$0xff]  }
  0x9f   :  { %1820 = vmatpush1.bf16.msra.mxu1 %v3217_v41  ;;  %1780 = vmatprep.subr.bf16.mxu0 %v3222_v42  ;;  %v3313_v41 = vld [vmem:[#allocation5 + $0x22c] ss:$16 sps:$4 sm:$0xff]   ;;  %v3308_v42 = vld [vmem:[#allocation5 + $0x28] ss:$16 sps:$4 sm:$0xff]  }
  0xa0   :  { %1821 = vmatprep.subr.bf16.mxu1 %v3225_v43  ;;  %v3311_v43 = vld [vmem:[#allocation5 + $0x228] ss:$16 sps:$4 sm:$0xff]  }
  0xa2   :  { %1781 = vmatpush2.bf16.msra.mxu0 %v3220_v44  ;;  %v3316_v44 = vld [vmem:[#allocation5 + $0xc] ss:$16 sps:$4 sm:$0xff]  }
  0xa3   :  { %1822 = vmatpush2.bf16.msra.mxu1 %v3223_v45  ;;  %1782 = vmatprep.subr.bf16.mxu0 %v3228_v46  ;;  %v3319_v45 = vld [vmem:[#allocation5 + $0x20c] ss:$16 sps:$4 sm:$0xff]   ;;  %v3314_v46 = vld [vmem:[#allocation5 + $0x8] ss:$16 sps:$4 sm:$0xff]  }
  0xa4   :  { %1823 = vmatprep.subr.bf16.mxu1 %v3231_v48  ;;  %v3317_v48 = vld [vmem:[#allocation5 + $0x208] ss:$16 sps:$4 sm:$0xff]  }
  0xa6   :  { %1783 = vmatpush2.bf16.msra.mxu0 %v3226_v49  ;;  %v3322_v49 = vld [vmem:[#allocation5 + $0x1ec] ss:$16 sps:$4 sm:$0xff]  }
  0xa7   :  { %1824 = vmatpush2.bf16.msra.mxu1 %v3229_v50  ;;  %1784 = vmatprep.subr.bf16.mxu0 %v3234_v52  ;;  %v3325_v50 = vld [vmem:[#allocation5 + $0x3ec] ss:$16 sps:$4 sm:$0xff]   ;;  %v3320_v52 = vld [vmem:[#allocation5 + $0x1e8] ss:$16 sps:$4 sm:$0xff]  }
  0xa8   :  { %1825 = vmatprep.subr.bf16.mxu1 %v3237_v53  ;;  %v3323_v53 = vld [vmem:[#allocation5 + $0x3e8] ss:$16 sps:$4 sm:$0xff]  }
  0xaa   :  { %1785 = vmatpush2.bf16.msra.mxu0 %v3232_v54  ;;  %v3328_v54 = vld [vmem:[#allocation5 + $0x1cc] ss:$16 sps:$4 sm:$0xff]  }
  0xab   :  { %1826 = vmatpush2.bf16.msra.mxu1 %v3235_v55  ;;  %1786 = vmatprep.subr.bf16.mxu0 %v3240_v56  ;;  %v3331_v55 = vld [vmem:[#allocation5 + $0x3cc] ss:$16 sps:$4 sm:$0xff]   ;;  %v3326_v56 = vld [vmem:[#allocation5 + $0x1c8] ss:$16 sps:$4 sm:$0xff]  }
  0xac   :  { %1827 = vmatprep.subr.bf16.mxu1 %v3243_v57  ;;  %v3329_v57 = vld [vmem:[#allocation5 + $0x3c8] ss:$16 sps:$4 sm:$0xff]  }
  0xae   :  { %1787 = vmatpush2.bf16.msra.mxu0 %v3238_v58  ;;  %v3334_v58 = vld [vmem:[#allocation5 + $0x1ac] ss:$16 sps:$4 sm:$0xff]  }
  0xaf   :  { %1828 = vmatpush2.bf16.msra.mxu1 %v3241_v59  ;;  %1788 = vmatprep.subr.bf16.mxu0 %v3246_v60  ;;  %v3337_v59 = vld [vmem:[#allocation5 + $0x3ac] ss:$16 sps:$4 sm:$0xff]   ;;  %v3332_v60 = vld [vmem:[#allocation5 + $0x1a8] ss:$16 sps:$4 sm:$0xff]  }
  0xb0   :  { %1829 = vmatprep.subr.bf16.mxu1 %v3249_v61  ;;  %v3335_v61 = vld [vmem:[#allocation5 + $0x3a8] ss:$16 sps:$4 sm:$0xff]  }
  0xb2   :  { %1789 = vmatpush2.bf16.msra.mxu0 %v3244_v62  ;;  %v3340_v62 = vld [vmem:[#allocation5 + $0x18c] ss:$16 sps:$4 sm:$0xff]  }
  0xb3   :  { %1830 = vmatpush2.bf16.msra.mxu1 %v3247_v63  ;;  %1790 = vmatprep.subr.bf16.mxu0 %v3252_v0  ;;  %v3343_v63 = vld [vmem:[#allocation5 + $0x38c] ss:$16 sps:$4 sm:$0xff]   ;;  %v3338_v0 = vld [vmem:[#allocation5 + $0x188] ss:$16 sps:$4 sm:$0xff]  }
  0xb4   :  { %1831 = vmatprep.subr.bf16.mxu1 %v3255_v1  ;;  %v3341_v1 = vld [vmem:[#allocation5 + $0x388] ss:$16 sps:$4 sm:$0xff]  }
  0xb6   :  { %1791 = vmatpush2.bf16.msra.mxu0 %v3250_v2  ;;  %v3346_v2 = vld [vmem:[#allocation5 + $0x16c] ss:$16 sps:$4 sm:$0xff]  }
  0xb7   :  { %1832 = vmatpush2.bf16.msra.mxu1 %v3253_v3  ;;  %1792 = vmatprep.subr.bf16.mxu0 %v3258_v4  ;;  %v3349_v3 = vld [vmem:[#allocation5 + $0x36c] ss:$16 sps:$4 sm:$0xff]   ;;  %v3344_v4 = vld [vmem:[#allocation5 + $0x168] ss:$16 sps:$4 sm:$0xff]  }
  0xb8   :  { %1833 = vmatprep.subr.bf16.mxu1 %v3261_v5  ;;  %v3347_v5 = vld [vmem:[#allocation5 + $0x368] ss:$16 sps:$4 sm:$0xff]  }
  0xba   :  { %1793 = vmatpush2.bf16.msra.mxu0 %v3256_v8  ;;  %v3352_v8 = vld [vmem:[#allocation5 + $0x14c] ss:$16 sps:$4 sm:$0xff]  }
  0xbb   :  { %1834 = vmatpush2.bf16.msra.mxu1 %v3259_v9  ;;  %1794 = vmatprep.subr.bf16.mxu0 %v3264_v10  ;;  %v3355_v9 = vld [vmem:[#allocation5 + $0x34c] ss:$16 sps:$4 sm:$0xff]   ;;  %v3350_v10 = vld [vmem:[#allocation5 + $0x148] ss:$16 sps:$4 sm:$0xff]  }
  0xbc   :  { %1835 = vmatprep.subr.bf16.mxu1 %v3267_v11  ;;  %v3353_v11 = vld [vmem:[#allocation5 + $0x348] ss:$16 sps:$4 sm:$0xff]  }
  0xbe   :  { %1795 = vmatpush2.bf16.msra.mxu0 %v3262_v12  ;;  %v3358_v12 = vld [vmem:[#allocation5 + $0x12c] ss:$16 sps:$4 sm:$0xff]  }
  0xbf   :  { %1836 = vmatpush2.bf16.msra.mxu1 %v3265_v13  ;;  %1846 = vmatprep.subr.bf16.mxu0 %v3274_v14  ;;  %v3361_v13 = vld [vmem:[#allocation5 + $0x32c] ss:$16 sps:$4 sm:$0xff]   ;;  %v3356_v14 = vld [vmem:[#allocation5 + $0x128] ss:$16 sps:$4 sm:$0xff]  }
  0xc0   :  { %1887 = vmatprep.subr.bf16.mxu1 %v3277_v15  ;;  %v3359_v15 = vld [vmem:[#allocation5 + $0x328] ss:$16 sps:$4 sm:$0xff]  }
  0xc1   :  { %1797 = vmatmul.mubr.bf16.vlgmr.msra.gmra.mxu0 %v3799_v16 }
  0xc2   :  { %1838 = vmatmul.mubr.bf16.vlgmr.msra.gmra.mxu1 %v3803_v17  ;;  %1847 = vmatpush1.bf16.msra.mxu0 %v3272_v18  ;;  %v3364_v18 = vld [vmem:[#allocation5 + $0x10c] ss:$16 sps:$4 sm:$0xff]  }
  0xc3   :  { %1888 = vmatpush1.bf16.msra.mxu1 %v3275_v19  ;;  %1848 = vmatprep.subr.bf16.mxu0 %v3280_v20  ;;  %v3367_v19 = vld [vmem:[#allocation5 + $0x30c] ss:$16 sps:$4 sm:$0xff]   ;;  %v3362_v20 = vld [vmem:[#allocation5 + $0x108] ss:$16 sps:$4 sm:$0xff]  }
  0xc4   :  { %1889 = vmatprep.subr.bf16.mxu1 %v3283_v21  ;;  %1878 = vmatprep.mubr.bf16.mxu0 %v3771_v47  ;;  %v3299_v47 = vld [vmem:[#allocation5 + $0x268] ss:$16 sps:$4 sm:$0xff]  }
  0xc5   :  { %1919 = vmatprep.mubr.bf16.mxu1 %v3773_v51  ;;  %v3304_v51 = vld [vmem:[#allocation5 + $0x4c] ss:$16 sps:$4 sm:$0xff]   ;;  %v3365_v21 = vld [vmem:[#allocation5 + $0x308] ss:$16 sps:$4 sm:$0xff]  }
  0xc6   :  { %1849 = vmatpush1.bf16.msra.mxu0 %v3278_v22  ;;  %v3370_v22 = vld [vmem:[#allocation5 + $0x4ec] ss:$16 sps:$4 sm:$0xff]  }
  0xc7   :  { %1890 = vmatpush1.bf16.msra.mxu1 %v3281_v23  ;;  %1850 = vmatprep.subr.bf16.mxu0 %v3286_v24  ;;  %v3373_v23 = vld [vmem:[#allocation5 + $0x6ec] ss:$16 sps:$4 sm:$0xff]   ;;  %v3368_v24 = vld [vmem:[#allocation5 + $0x4e8] ss:$16 sps:$4 sm:$0xff]  }
  0xc8   :  { %1891 = vmatprep.subr.bf16.mxu1 %v3289_v25  ;;  %v3371_v25 = vld [vmem:[#allocation5 + $0x6e8] ss:$16 sps:$4 sm:$0xff]  }
  0xca   :  { %1851 = vmatpush1.bf16.msra.mxu0 %v3284_v26  ;;  %v3376_v26 = vld [vmem:[#allocation5 + $0x4cc] ss:$16 sps:$4 sm:$0xff]  }
  0xcb   :  { %1892 = vmatpush1.bf16.msra.mxu1 %v3287_v27  ;;  %1852 = vmatprep.subr.bf16.mxu0 %v3292_v28  ;;  %v3379_v27 = vld [vmem:[#allocation5 + $0x6cc] ss:$16 sps:$4 sm:$0xff]   ;;  %v3374_v28 = vld [vmem:[#allocation5 + $0x4c8] ss:$16 sps:$4 sm:$0xff]  }
  0xcc   :  { %1893 = vmatprep.subr.bf16.mxu1 %v3295_v29  ;;  %v3377_v29 = vld [vmem:[#allocation5 + $0x6c8] ss:$16 sps:$4 sm:$0xff]  }
  0xce   :  { %1853 = vmatpush1.bf16.msra.mxu0 %v3290_v30  ;;  %v3382_v30 = vld [vmem:[#allocation5 + $0x4ac] ss:$16 sps:$4 sm:$0xff]  }
  0xcf   :  { %1894 = vmatpush1.bf16.msra.mxu1 %v3293_v31  ;;  %1854 = vmatprep.subr.bf16.mxu0 %v3298_v32  ;;  %v3385_v31 = vld [vmem:[#allocation5 + $0x6ac] ss:$16 sps:$4 sm:$0xff]   ;;  %v3380_v32 = vld [vmem:[#allocation5 + $0x4a8] ss:$16 sps:$4 sm:$0xff]  }
  0xd0   :  { %1895 = vmatprep.subr.bf16.mxu1 %v3301_v33  ;;  %v3383_v33 = vld [vmem:[#allocation5 + $0x6a8] ss:$16 sps:$4 sm:$0xff]  }
  0xd2   :  { %1855 = vmatpush1.bf16.msra.mxu0 %v3296_v34  ;;  %v3388_v34 = vld [vmem:[#allocation5 + $0x48c] ss:$16 sps:$4 sm:$0xff]  }
  0xd3   :  { %1896 = vmatpush1.bf16.msra.mxu1 %v3299_v47  ;;  %1856 = vmatprep.subr.bf16.mxu0 %v3304_v51  ;;  %v3386_v47 = vld [vmem:[#allocation5 + $0x488] ss:$16 sps:$4 sm:$0xff]   ;;  %v3394_v51 = vld [vmem:[#allocation5 + $0x46c] ss:$16 sps:$4 sm:$0xff]  }
  0xd4   :  { %1897 = vmatprep.subr.bf16.mxu1 %v3307_v35  ;;  %v3397_v35 = vld [vmem:[#allocation5 + $0x66c] ss:$16 sps:$4 sm:$0xff]  }
  0xd6   :  { %1857 = vmatpush1.bf16.msra.mxu0 %v3302_v38  ;;  %v3392_v38 = vld [vmem:[#allocation5 + $0x468] ss:$16 sps:$4 sm:$0xff]  }
  0xd7   :  { %1898 = vmatpush1.bf16.msra.mxu1 %v3305_v39  ;;  %1858 = vmatprep.subr.bf16.mxu0 %v3310_v40  ;;  %v3395_v39 = vld [vmem:[#allocation5 + $0x668] ss:$16 sps:$4 sm:$0xff]   ;;  %v3400_v40 = vld [vmem:[#allocation5 + $0x44c] ss:$16 sps:$4 sm:$0xff]  }
  0xd8   :  { %1899 = vmatprep.subr.bf16.mxu1 %v3313_v41  ;;  %v3401_v41 = vld [vmem:[#allocation5 + $0x648] ss:$16 sps:$4 sm:$0xff]  }
  0xda   :  { %1859 = vmatpush1.bf16.msra.mxu0 %v3308_v42  ;;  %v3406_v42 = vld [vmem:[#allocation5 + $0x42c] ss:$16 sps:$4 sm:$0xff]  }
  0xdb   :  { %1900 = vmatpush1.bf16.msra.mxu1 %v3311_v43  ;;  %1860 = vmatprep.subr.bf16.mxu0 %v3316_v44  ;;  %v3409_v43 = vld [vmem:[#allocation5 + $0x62c] ss:$16 sps:$4 sm:$0xff]   ;;  %v3404_v44 = vld [vmem:[#allocation5 + $0x428] ss:$16 sps:$4 sm:$0xff]  }
  0xdc   :  { %1901 = vmatprep.subr.bf16.mxu1 %v3319_v45  ;;  %v3407_v45 = vld [vmem:[#allocation5 + $0x628] ss:$16 sps:$4 sm:$0xff]  }
  0xde   :  { %1861 = vmatpush1.bf16.msra.mxu0 %v3314_v46  ;;  %v3412_v46 = vld [vmem:[#allocation5 + $0x40c] ss:$16 sps:$4 sm:$0xff]  }
  0xdf   :  { %1902 = vmatpush1.bf16.msra.mxu1 %v3317_v48  ;;  %1862 = vmatprep.subr.bf16.mxu0 %v3322_v49  ;;  %v3415_v48 = vld [vmem:[#allocation5 + $0x60c] ss:$16 sps:$4 sm:$0xff]   ;;  %v3410_v49 = vld [vmem:[#allocation5 + $0x408] ss:$16 sps:$4 sm:$0xff]  }
  0xe0   :  { %1903 = vmatprep.subr.bf16.mxu1 %v3325_v50  ;;  %v3413_v50 = vld [vmem:[#allocation5 + $0x608] ss:$16 sps:$4 sm:$0xff]  }
  0xe2   :  { %1863 = vmatpush2.bf16.msra.mxu0 %v3320_v52  ;;  %v3418_v52 = vld [vmem:[#allocation5 + $0x5ec] ss:$16 sps:$4 sm:$0xff]  }
  0xe3   :  { %1904 = vmatpush2.bf16.msra.mxu1 %v3323_v53  ;;  %1864 = vmatprep.subr.bf16.mxu0 %v3328_v54  ;;  %v3421_v53 = vld [vmem:[#allocation5 + $0x7ec] ss:$16 sps:$4 sm:$0xff]   ;;  %v3416_v54 = vld [vmem:[#allocation5 + $0x5e8] ss:$16 sps:$4 sm:$0xff]  }
  0xe4   :  { %1905 = vmatprep.subr.bf16.mxu1 %v3331_v55  ;;  %v3419_v55 = vld [vmem:[#allocation5 + $0x7e8] ss:$16 sps:$4 sm:$0xff]  }
  0xe6   :  { %1865 = vmatpush2.bf16.msra.mxu0 %v3326_v56  ;;  %v3424_v56 = vld [vmem:[#allocation5 + $0x5cc] ss:$16 sps:$4 sm:$0xff]  }
  0xe7   :  { %1906 = vmatpush2.bf16.msra.mxu1 %v3329_v57  ;;  %1866 = vmatprep.subr.bf16.mxu0 %v3334_v58  ;;  %v3427_v57 = vld [vmem:[#allocation5 + $0x7cc] ss:$16 sps:$4 sm:$0xff]   ;;  %v3422_v58 = vld [vmem:[#allocation5 + $0x5c8] ss:$16 sps:$4 sm:$0xff]  }
  0xe8   :  { %1907 = vmatprep.subr.bf16.mxu1 %v3337_v59  ;;  %v3425_v59 = vld [vmem:[#allocation5 + $0x7c8] ss:$16 sps:$4 sm:$0xff]  }
  0xea   :  { %1867 = vmatpush2.bf16.msra.mxu0 %v3332_v60  ;;  %v3430_v60 = vld [vmem:[#allocation5 + $0x5ac] ss:$16 sps:$4 sm:$0xff]  }
  0xeb   :  { %1908 = vmatpush2.bf16.msra.mxu1 %v3335_v61  ;;  %1868 = vmatprep.subr.bf16.mxu0 %v3340_v62  ;;  %v3433_v61 = vld [vmem:[#allocation5 + $0x7ac] ss:$16 sps:$4 sm:$0xff]   ;;  %v3428_v62 = vld [vmem:[#allocation5 + $0x5a8] ss:$16 sps:$4 sm:$0xff]  }
  0xec   :  { %1909 = vmatprep.subr.bf16.mxu1 %v3343_v63  ;;  %v3431_v63 = vld [vmem:[#allocation5 + $0x7a8] ss:$16 sps:$4 sm:$0xff]  }
  0xee   :  { %1869 = vmatpush2.bf16.msra.mxu0 %v3338_v0  ;;  %v3436_v0 = vld [vmem:[#allocation5 + $0x58c] ss:$16 sps:$4 sm:$0xff]  }
  0xef   :  { %1910 = vmatpush2.bf16.msra.mxu1 %v3341_v1  ;;  %1870 = vmatprep.subr.bf16.mxu0 %v3346_v2  ;;  %v3439_v1 = vld [vmem:[#allocation5 + $0x78c] ss:$16 sps:$4 sm:$0xff]   ;;  %v3434_v2 = vld [vmem:[#allocation5 + $0x588] ss:$16 sps:$4 sm:$0xff]  }
  0xf0   :  { %1911 = vmatprep.subr.bf16.mxu1 %v3349_v3  ;;  %v3437_v3 = vld [vmem:[#allocation5 + $0x788] ss:$16 sps:$4 sm:$0xff]  }
  0xf2   :  { %1871 = vmatpush2.bf16.msra.mxu0 %v3344_v4  ;;  %v3442_v4 = vld [vmem:[#allocation5 + $0x56c] ss:$16 sps:$4 sm:$0xff]  }
  0xf3   :  { %1912 = vmatpush2.bf16.msra.mxu1 %v3347_v5  ;;  %1872 = vmatprep.subr.bf16.mxu0 %v3352_v8  ;;  %v3445_v5 = vld [vmem:[#allocation5 + $0x76c] ss:$16 sps:$4 sm:$0xff]   ;;  %v3440_v8 = vld [vmem:[#allocation5 + $0x568] ss:$16 sps:$4 sm:$0xff]  }
  0xf4   :  { %1913 = vmatprep.subr.bf16.mxu1 %v3355_v9  ;;  %v3443_v9 = vld [vmem:[#allocation5 + $0x768] ss:$16 sps:$4 sm:$0xff]  }
  0xf6   :  { %1873 = vmatpush2.bf16.msra.mxu0 %v3350_v10  ;;  %v3448_v10 = vld [vmem:[#allocation5 + $0x54c] ss:$16 sps:$4 sm:$0xff]  }
  0xf7   :  { %1914 = vmatpush2.bf16.msra.mxu1 %v3353_v11  ;;  %1874 = vmatprep.subr.bf16.mxu0 %v3358_v12  ;;  %v3451_v11 = vld [vmem:[#allocation5 + $0x74c] ss:$16 sps:$4 sm:$0xff]   ;;  %v3446_v12 = vld [vmem:[#allocation5 + $0x548] ss:$16 sps:$4 sm:$0xff]  }
  0xf8   :  { %1915 = vmatprep.subr.bf16.mxu1 %v3361_v13  ;;  %v3449_v13 = vld [vmem:[#allocation5 + $0x748] ss:$16 sps:$4 sm:$0xff]  }
  0xfa   :  { %1875 = vmatpush2.bf16.msra.mxu0 %v3356_v14  ;;  %v3454_v14 = vld [vmem:[#allocation5 + $0x52c] ss:$16 sps:$4 sm:$0xff]  }
  0xfb   :  { %1916 = vmatpush2.bf16.msra.mxu1 %v3359_v15  ;;  %1876 = vmatprep.subr.bf16.mxu0 %v3364_v18  ;;  %v3457_v15 = vld [vmem:[#allocation5 + $0x72c] ss:$16 sps:$4 sm:$0xff]   ;;  %v3452_v18 = vld [vmem:[#allocation5 + $0x528] ss:$16 sps:$4 sm:$0xff]  }
  0xfc   :  { %1917 = vmatprep.subr.bf16.mxu1 %v3367_v19  ;;  %v3455_v19 = vld [vmem:[#allocation5 + $0x728] ss:$16 sps:$4 sm:$0xff]  }
  0xfe   :  { %1877 = vmatpush2.bf16.msra.mxu0 %v3362_v20  ;;  %v3460_v20 = vld [vmem:[#allocation5 + $0x50c] ss:$16 sps:$4 sm:$0xff]  }
  0xff   :  { %1918 = vmatpush2.bf16.msra.mxu1 %v3365_v21  ;;  %1928 = vmatprep.subr.bf16.mxu0 %v3370_v22  ;;  %v3463_v21 = vld [vmem:[#allocation5 + $0x70c] ss:$16 sps:$4 sm:$0xff]   ;;  %v3458_v22 = vld [vmem:[#allocation5 + $0x508] ss:$16 sps:$4 sm:$0xff]  }
 0x100   :  { %1969 = vmatprep.subr.bf16.mxu1 %v3373_v23  ;;  %v3461_v23 = vld [vmem:[#allocation5 + $0x708] ss:$16 sps:$4 sm:$0xff]  }
 0x101   :  { %1879 = vmatmul.mubr.bf16.vlgmr.msra.gmra.mxu0 %v3777_v6  ;;  %v3391_v6 = vld [vmem:[#allocation5 + $0x68c] ss:$16 sps:$4 sm:$0xff]  }
 0x102   :  { %1920 = vmatmul.mubr.bf16.vlgmr.msra.gmra.mxu1 %v3779_v7  ;;  %1929 = vmatpush1.bf16.msra.mxu0 %v3368_v24  ;;  %v3389_v7 = vld [vmem:[#allocation5 + $0x688] ss:$16 sps:$4 sm:$0xff]  }
 0x103   :  { %1970 = vmatpush1.bf16.msra.mxu1 %v3371_v25  ;;  %1930 = vmatprep.subr.bf16.mxu0 %v3376_v26  ;;  %v3466_v24 = vld [vmem:[#allocation8 + $0x74] ss:$8 sps:$4 sm:$0xff]   ;;  %v3464_v25 = vld [vmem:[#allocation8 + $0x70] ss:$8 sps:$4 sm:$0xff]   ;;  %v3469_v26 = vld [vmem:[#allocation8 + $0x64] ss:$8 sps:$4 sm:$0xff]  }
 0x104   :  { %1971 = vmatprep.subr.bf16.mxu1 %v3379_v27  ;;  %1960 = vmatprep.mubr.bf16.mxu0 %v3789_v36  ;;  %v3403_v36 = vld [vmem:[#allocation5 + $0x64c] ss:$16 sps:$4 sm:$0xff]  }
 0x105   :  { %2001 = vmatprep.mubr.bf16.mxu1 %v3793_v37  ;;  %v3398_v37 = vld [vmem:[#allocation5 + $0x448] ss:$16 sps:$4 sm:$0xff]  }
 0x106   :  { %1931 = vmatpush1.bf16.msra.mxu0 %v3374_v28 }
 0x107   :  { %1972 = vmatpush1.bf16.msra.mxu1 %v3377_v29  ;;  %1932 = vmatprep.subr.bf16.mxu0 %v3382_v30  ;;  %v3467_v29 = vld [vmem:[#allocation8 + $0x60] ss:$8 sps:$4 sm:$0xff]  }
 0x108   :  { %1973 = vmatprep.subr.bf16.mxu1 %v3385_v31 }
 0x10a   :  { %1933 = vmatpush1.bf16.msra.mxu0 %v3380_v32  ;;  %v3472_v32 = vld [vmem:[#allocation8 + $0x54] ss:$8 sps:$4 sm:$0xff]  }
 0x10b   :  { %1974 = vmatpush1.bf16.msra.mxu1 %v3383_v33  ;;  %1934 = vmatprep.subr.bf16.mxu0 %v3388_v34 }
 0x10c   :  { %1975 = vmatprep.subr.bf16.mxu1 %v3391_v6  ;;  %v3470_v6 = vld [vmem:[#allocation8 + $0x50] ss:$8 sps:$4 sm:$0xff]  }
 0x10e   :  { %1935 = vmatpush1.bf16.msra.mxu0 %v3386_v47 }
 0x10f   :  { %1976 = vmatpush1.bf16.msra.mxu1 %v3389_v7  ;;  %1936 = vmatprep.subr.bf16.mxu0 %v3394_v51  ;;  %v3475_v51 = vld [vmem:[#allocation8 + $0x44] ss:$8 sps:$4 sm:$0xff]  }
 0x110   :  { %1977 = vmatprep.subr.bf16.mxu1 %v3397_v35  ;;  %v3512_v35 = vld [vmem:[#allocation8 + $0x170] ss:$8 sps:$4 sm:$0xff]  }
 0x112   :  { %1937 = vmatpush1.bf16.msra.mxu0 %v3392_v38  ;;  %v3517_v38 = vld [vmem:[#allocation8 + $0x164] ss:$8 sps:$4 sm:$0xff]  }
 0x113   :  { %1978 = vmatpush1.bf16.msra.mxu1 %v3395_v39  ;;  %1938 = vmatprep.subr.bf16.mxu0 %v3400_v40  ;;  %v3515_v39 = vld [vmem:[#allocation8 + $0x160] ss:$8 sps:$4 sm:$0xff]   ;;  %v3478_v40 = vld [vmem:[#allocation8 + $0x34] ss:$8 sps:$4 sm:$0xff]  }
 0x114   :  { %1979 = vmatprep.subr.bf16.mxu1 %v3403_v36  ;;  %v3520_v36 = vld [vmem:[#allocation8 + $0x154] ss:$8 sps:$4 sm:$0xff]  }
 0x116   :  { %1939 = vmatpush1.bf16.msra.mxu0 %v3398_v37  ;;  %v3476_v37 = vld [vmem:[#allocation8 + $0x30] ss:$8 sps:$4 sm:$0xff]  }
 0x117   :  { %1980 = vmatpush1.bf16.msra.mxu1 %v3401_v41  ;;  %1940 = vmatprep.subr.bf16.mxu0 %v3406_v42  ;;  %v3518_v41 = vld [vmem:[#allocation8 + $0x150] ss:$8 sps:$4 sm:$0xff]   ;;  %v3481_v42 = vld [vmem:[#allocation8 + $0x24] ss:$8 sps:$4 sm:$0xff]  }
 0x118   :  { %1981 = vmatprep.subr.bf16.mxu1 %v3409_v43  ;;  %v3523_v43 = vld [vmem:[#allocation8 + $0x144] ss:$8 sps:$4 sm:$0xff]  }
 0x11a   :  { %1941 = vmatpush1.bf16.msra.mxu0 %v3404_v44  ;;  %v3479_v44 = vld [vmem:[#allocation8 + $0x20] ss:$8 sps:$4 sm:$0xff]  }
 0x11b   :  { %1982 = vmatpush1.bf16.msra.mxu1 %v3407_v45  ;;  %1942 = vmatprep.subr.bf16.mxu0 %v3412_v46  ;;  %v3521_v45 = vld [vmem:[#allocation8 + $0x140] ss:$8 sps:$4 sm:$0xff]   ;;  %v3484_v46 = vld [vmem:[#allocation8 + $0x14] ss:$8 sps:$4 sm:$0xff]  }
 0x11c   :  { %1983 = vmatprep.subr.bf16.mxu1 %v3415_v48  ;;  %v3526_v48 = vld [vmem:[#allocation8 + $0x134] ss:$8 sps:$4 sm:$0xff]  }
 0x11e   :  { %1943 = vmatpush1.bf16.msra.mxu0 %v3410_v49  ;;  %v3482_v49 = vld [vmem:[#allocation8 + $0x10] ss:$8 sps:$4 sm:$0xff]  }
 0x11f   :  { %1984 = vmatpush1.bf16.msra.mxu1 %v3413_v50  ;;  %1944 = vmatprep.subr.bf16.mxu0 %v3418_v52  ;;  %v3524_v50 = vld [vmem:[#allocation8 + $0x130] ss:$8 sps:$4 sm:$0xff]   ;;  %v3487_v52 = vld [vmem:[#allocation8 + $0x4] ss:$8 sps:$4 sm:$0xff]  }
 0x120   :  { %1985 = vmatprep.subr.bf16.mxu1 %v3421_v53  ;;  %v3529_v53 = vld [vmem:[#allocation8 + $0x124] ss:$8 sps:$4 sm:$0xff]  }
 0x122   :  { %1945 = vmatpush2.bf16.msra.mxu0 %v3416_v54  ;;  %v3485_v54 = vld [vmem:[#allocation8] ss:$8 sps:$4 sm:$0xff]  }
 0x123   :  { %1986 = vmatpush2.bf16.msra.mxu1 %v3419_v55  ;;  %1946 = vmatprep.subr.bf16.mxu0 %v3424_v56  ;;  %v3527_v55 = vld [vmem:[#allocation8 + $0x120] ss:$8 sps:$4 sm:$0xff]   ;;  %v3490_v56 = vld [vmem:[#allocation8 + $0xf4] ss:$8 sps:$4 sm:$0xff]  }
 0x124   :  { %1987 = vmatprep.subr.bf16.mxu1 %v3427_v57  ;;  %v3532_v57 = vld [vmem:[#allocation8 + $0x114] ss:$8 sps:$4 sm:$0xff]  }
 0x126   :  { %1947 = vmatpush2.bf16.msra.mxu0 %v3422_v58  ;;  %v3488_v58 = vld [vmem:[#allocation8 + $0xf0] ss:$8 sps:$4 sm:$0xff]  }
 0x127   :  { %1988 = vmatpush2.bf16.msra.mxu1 %v3425_v59  ;;  %1948 = vmatprep.subr.bf16.mxu0 %v3430_v60  ;;  %v3530_v59 = vld [vmem:[#allocation8 + $0x110] ss:$8 sps:$4 sm:$0xff]   ;;  %v3493_v60 = vld [vmem:[#allocation8 + $0xe4] ss:$8 sps:$4 sm:$0xff]  }
 0x128   :  { %1989 = vmatprep.subr.bf16.mxu1 %v3433_v61  ;;  %v3535_v61 = vld [vmem:[#allocation8 + $0x104] ss:$8 sps:$4 sm:$0xff]  }
 0x12a   :  { %1949 = vmatpush2.bf16.msra.mxu0 %v3428_v62  ;;  %v3491_v62 = vld [vmem:[#allocation8 + $0xe0] ss:$8 sps:$4 sm:$0xff]  }
 0x12b   :  { %1990 = vmatpush2.bf16.msra.mxu1 %v3431_v63  ;;  %1950 = vmatprep.subr.bf16.mxu0 %v3436_v0  ;;  %v3533_v63 = vld [vmem:[#allocation8 + $0x100] ss:$8 sps:$4 sm:$0xff]   ;;  %v3496_v0 = vld [vmem:[#allocation8 + $0xd4] ss:$8 sps:$4 sm:$0xff]  }
 0x12c   :  { %1991 = vmatprep.subr.bf16.mxu1 %v3439_v1  ;;  %v3538_v1 = vld [vmem:[#allocation8 + $0x1f4] ss:$8 sps:$4 sm:$0xff]  }
 0x12e   :  { %1951 = vmatpush2.bf16.msra.mxu0 %v3434_v2  ;;  %v3494_v2 = vld [vmem:[#allocation8 + $0xd0] ss:$8 sps:$4 sm:$0xff]  }
 0x12f   :  { %1992 = vmatpush2.bf16.msra.mxu1 %v3437_v3  ;;  %1952 = vmatprep.subr.bf16.mxu0 %v3442_v4  ;;  %v3536_v3 = vld [vmem:[#allocation8 + $0x1f0] ss:$8 sps:$4 sm:$0xff]   ;;  %v3499_v4 = vld [vmem:[#allocation8 + $0xc4] ss:$8 sps:$4 sm:$0xff]  }
 0x130   :  { %1993 = vmatprep.subr.bf16.mxu1 %v3445_v5  ;;  %v3541_v5 = vld [vmem:[#allocation8 + $0x1e4] ss:$8 sps:$4 sm:$0xff]  }
 0x132   :  { %1953 = vmatpush2.bf16.msra.mxu0 %v3440_v8  ;;  %v3497_v8 = vld [vmem:[#allocation8 + $0xc0] ss:$8 sps:$4 sm:$0xff]  }
 0x133   :  { %1994 = vmatpush2.bf16.msra.mxu1 %v3443_v9  ;;  %1954 = vmatprep.subr.bf16.mxu0 %v3448_v10  ;;  %v3539_v9 = vld [vmem:[#allocation8 + $0x1e0] ss:$8 sps:$4 sm:$0xff]   ;;  %v3502_v10 = vld [vmem:[#allocation8 + $0xb4] ss:$8 sps:$4 sm:$0xff]  }
 0x134   :  { %1995 = vmatprep.subr.bf16.mxu1 %v3451_v11  ;;  %v3544_v11 = vld [vmem:[#allocation8 + $0x1d4] ss:$8 sps:$4 sm:$0xff]  }
 0x136   :  { %1955 = vmatpush2.bf16.msra.mxu0 %v3446_v12  ;;  %v354_v12 = vlaneseq }
 0x137   :  { %1996 = vmatpush2.bf16.msra.mxu1 %v3449_v13  ;;  %1956 = vmatprep.subr.bf16.mxu0 %v3454_v14  ;;  %v3500_v13 = vld [vmem:[#allocation8 + $0xb0] ss:$8 sps:$4 sm:$0xff]  }
 0x138   :  { %1997 = vmatprep.subr.bf16.mxu1 %v3457_v15  ;;  %v3542_v14 = vld [vmem:[#allocation8 + $0x1d0] ss:$8 sps:$4 sm:$0xff]   ;;  %v3505_v15 = vld [vmem:[#allocation8 + $0xa4] ss:$8 sps:$4 sm:$0xff]  }
 0x13a   :  { %1957 = vmatpush2.bf16.msra.mxu0 %v3452_v18  ;;  %v3547_v18 = vld [vmem:[#allocation8 + $0x1c4] ss:$8 sps:$4 sm:$0xff]  }
 0x13b   :  { %1998 = vmatpush2.bf16.msra.mxu1 %v3455_v19  ;;  %1958 = vmatprep.subr.bf16.mxu0 %v3460_v20  ;;  %v3823_v19 = vshrl.u32 %v354_v12, 7  ;;  %v3503_v20 = vld [vmem:[#allocation8 + $0xa0] ss:$8 sps:$4 sm:$0xff]   ;;  %v3571_v12 = vld [vmem:[#allocation10 + $0x10] sm:$0xff]  }
 0x13c   :  { %1999 = vmatprep.subr.bf16.mxu1 %v3463_v21  ;;  %v3545_v21 = vld [vmem:[#allocation8 + $0x1c0] ss:$8 sps:$4 sm:$0xff]  }
 0x13e   :  { %1959 = vmatpush2.bf16.msra.mxu0 %v3458_v22  ;;  %v3508_v22 = vld [vmem:[#allocation8 + $0x94] ss:$8 sps:$4 sm:$0xff]  }
 0x13f   :  { %2000 = vmatpush2.bf16.msra.mxu1 %v3461_v23  ;;  %2414 = vmatprep.subr.bf16.mxu0 %v3466_v24  ;;  %v3550_v23 = vld [vmem:[#allocation8 + $0x1b4] ss:$8 sps:$4 sm:$0xff]   ;;  %v356_v24 = vsub.s32 0, %v3823_v19 }
 0x141   :  { %v3813_v27 = vpop.f32.mrf.mxu0  ;;  %1961 = vmatmul.mubr.bf16.vlgmr.msra.gmra.mxu0 %v3799_v16  ;;  %v3514_v16 = vld [vmem:[#allocation8 + $0x174] ss:$8 sps:$4 sm:$0xff]  }
 0x142   :  { %v3815_v28 = vpop.f32.mrf.mxu1  ;;  %2002 = vmatmul.mubr.bf16.vlgmr.msra.gmra.mxu1 %v3803_v17  ;;  %2415 = vmatpush1.bf16.msra.mxu0 %v3464_v25  ;;  %v3473_v17 = vld [vmem:[#allocation8 + $0x40] ss:$8 sps:$4 sm:$0xff]   ;;  %v3826_v25 = vld [vmem:[#allocation7] sm:$0xf] }
 0x143   :  { %v3819_v30 = vpop.f32.mrf.mxu0  ;;  %2416 = vmatprep.subr.bf16.mxu0 %v3469_v26  ;;  %2455 = vmatprep.subr.bf16.mxu1 %v3514_v16  ;;  %v360_v26 = vsub.s32 1, %v3823_v19 }
 0x144   :  { %v3821_v31 = vpop.f32.mrf.mxu1  ;;  %2456 = vmatpush1.bf16.msra.mxu1 %v3512_v35  ;;  %v3553_v35 = vld [vmem:[#allocation8 + $0x1a4] ss:$8 sps:$4 sm:$0xff]  }
 0x145   :  { %v1720_v33 = vpop.f32.mrf.mxu0  ;;  %2457 = vmatprep.subr.bf16.mxu1 %v3517_v38  ;;  %v3551_v38 = vld [vmem:[#allocation8 + $0x1a0] ss:$8 sps:$4 sm:$0xff]  }
 0x146   :  { %v1761_v34 = vpop.f32.mrf.mxu1  ;;  %2417 = vmatpush1.bf16.msra.mxu0 %v3467_v29  ;;  %v3506_v29 = vld [vmem:[#allocation8 + $0x90] ss:$8 sps:$4 sm:$0xff]   ;;  %v3511_v33 = vld [vmem:[#allocation8 + $0x84] ss:$8 sps:$4 sm:$0xff]  }
 0x147   :  { %v1721_v47 = vpop.f32.mrf.mxu0  ;;  %2418 = vmatprep.subr.bf16.mxu0 %v3472_v32  ;;  %v3548_v32 = vld [vmem:[#allocation8 + $0x1b0] ss:$8 sps:$4 sm:$0xff]   ;;  %v357_v34 = vrot.slane %v3826_v25, %v356_v24 }
 0x148   :  { %v1762_v7 = vpop.f32.mrf.mxu1  ;;  %2458 = vmatpush1.bf16.msra.mxu1 %v3515_v39  ;;  %v3509_v47 = vld [vmem:[#allocation8 + $0x80] ss:$8 sps:$4 sm:$0xff]  }
 0x149   :  { %2459 = vmatprep.subr.bf16.mxu1 %v3520_v36  ;;  %v1717_v7 = vadd.f32 %v3813_v27, %v357_v34  ;;  %v3554_v27 = vld [vmem:[#allocation8 + $0x190] ss:$8 sps:$4 sm:$0xff]  }
 0x14a   :  { %2419 = vmatpush1.bf16.msra.mxu0 %v3470_v6  ;;  %v361_v6 = vrot.slane %v3826_v25, %v360_v26 }
 0x14b   :  { %2420 = vmatprep.subr.bf16.mxu0 %v3475_v51  ;;  %v1758_v16 = vadd.f32 %v3815_v28, %v1717_v7 }
 0x14c   :  { %2460 = vmatpush1.bf16.msra.mxu1 %v3518_v41  ;;  %v1719_v51 = vadd.f32 %v3819_v30, %v361_v6 }
 0x14d   :  { %2461 = vmatprep.subr.bf16.mxu1 %v3523_v43 }
 0x14e   :  { %2421 = vmatpush1.bf16.msra.mxu0 %v3473_v17 }
 0x14f   :  { %2422 = vmatprep.subr.bf16.mxu0 %v3478_v40  ;;  %v1760_v40 = vadd.f32 %v3821_v31, %v1719_v51 }
 0x150   :  { %2462 = vmatpush1.bf16.msra.mxu1 %v3521_v45 }
 0x151   :  { %2463 = vmatprep.subr.bf16.mxu1 %v3526_v48 }
 0x152   :  { %2423 = vmatpush1.bf16.msra.mxu0 %v3476_v37 }
 0x153   :  { %2424 = vmatprep.subr.bf16.mxu0 %v3481_v42  ;;  %v3556_v42 = vld [vmem:[#allocation8 + $0x194] ss:$8 sps:$4 sm:$0xff]  }
 0x154   :  { %2464 = vmatpush1.bf16.msra.mxu1 %v3524_v50  ;;  %v3559_v50 = vld [vmem:[#allocation8 + $0x184] ss:$8 sps:$4 sm:$0xff]  }
 0x155   :  { %2465 = vmatprep.subr.bf16.mxu1 %v3529_v53  ;;  %v3557_v53 = vld [vmem:[#allocation8 + $0x180] ss:$8 sps:$4 sm:$0xff]  }
 0x156   :  { %2425 = vmatpush1.bf16.msra.mxu0 %v3479_v44 }
 0x157   :  { %2426 = vmatprep.subr.bf16.mxu0 %v3484_v46 }
 0x158   :  { %2466 = vmatpush1.bf16.msra.mxu1 %v3527_v55 }
 0x159   :  { %2467 = vmatprep.subr.bf16.mxu1 %v3532_v57 }
 0x15a   :  { %2427 = vmatpush1.bf16.msra.mxu0 %v3482_v49 }
 0x15b   :  { %2428 = vmatprep.subr.bf16.mxu0 %v3487_v52 }
 0x15c   :  { %2468 = vmatpush1.bf16.msra.mxu1 %v3530_v59 }
 0x15d   :  { %2469 = vmatprep.subr.bf16.mxu1 %v3535_v61 }
 0x15e   :  { %2429 = vmatpush1.bf16.msra.mxu0 %v3485_v54 }
 0x15f   :  { %2430 = vmatprep.subr.bf16.mxu0 %v3490_v56 }
 0x160   :  { %2470 = vmatpush1.bf16.msra.mxu1 %v3533_v63  ;;  %v3560_v63 = vld [vmem:[#allocation10 + $0x78] sm:$0xff]  }
 0x161   :  { %2471 = vmatprep.subr.bf16.mxu1 %v3538_v1  ;;  %v3562_v1 = vld [vmem:[#allocation10 + $0x70] sm:$0xff]  }
 0x162   :  { %2431 = vmatpush2.bf16.msra.mxu0 %v3488_v58 }
 0x163   :  { %2432 = vmatprep.subr.bf16.mxu0 %v3493_v60 }
 0x164   :  { %2472 = vmatpush2.bf16.msra.mxu1 %v3536_v3  ;;  %v3564_v3 = vld [vmem:[#allocation10 + $0x68] sm:$0xff]  }
 0x165   :  { %2473 = vmatprep.subr.bf16.mxu1 %v3541_v5  ;;  %v3566_v5 = vld [vmem:[#allocation10 + $0x60] sm:$0xff]  }
 0x166   :  { %2433 = vmatpush2.bf16.msra.mxu0 %v3491_v62 }
 0x167   :  { %2434 = vmatprep.subr.bf16.mxu0 %v3496_v0  ;;  %v3561_v0 = vld [vmem:[#allocation10 + $0x38] sm:$0xff]  }
 0x168   :  { %2474 = vmatpush2.bf16.msra.mxu1 %v3539_v9  ;;  %v3568_v9 = vld [vmem:[#allocation10 + $0x58] sm:$0xff]  }
 0x169   :  { %2475 = vmatprep.subr.bf16.mxu1 %v3544_v11  ;;  %v3570_v11 = vld [vmem:[#allocation10 + $0x50] sm:$0xff]  }
 0x16a   :  { %2435 = vmatpush2.bf16.msra.mxu0 %v3494_v2  ;;  %v3563_v2 = vld [vmem:[#allocation10 + $0x30] sm:$0xff]  }
 0x16b   :  { %2436 = vmatprep.subr.bf16.mxu0 %v3499_v4  ;;  %v3565_v4 = vld [vmem:[#allocation10 + $0x28] sm:$0xff]  }
 0x16c   :  { %2476 = vmatpush2.bf16.msra.mxu1 %v3542_v14  ;;  %v368_v14 = vsub.s32 3, %v3823_v19 }
 0x16d   :  { %2477 = vmatprep.subr.bf16.mxu1 %v3547_v18 }
 0x16e   :  { %2437 = vmatpush2.bf16.msra.mxu0 %v3497_v8  ;;  %v3567_v8 = vld [vmem:[#allocation10 + $0x20] sm:$0xff]   ;;  %v369_v18 = vrot.slane %v3826_v25, %v368_v14 }
 0x16f   :  { %2438 = vmatprep.subr.bf16.mxu0 %v3502_v10  ;;  %v3569_v10 = vld [vmem:[#allocation10 + $0x18] sm:$0xff]  }
 0x170   :  { %2478 = vmatpush2.bf16.msra.mxu1 %v3545_v21 }
 0x171   :  { %2479 = vmatprep.subr.bf16.mxu1 %v3550_v23 }
 0x172   :  { %2439 = vmatpush2.bf16.msra.mxu0 %v3500_v13  ;;  %v364_v13 = vsub.s32 2, %v3823_v19  ;;  %v3021_v19 = vld [vmem:[%s3862_s6] ss:$0 sm:$0xff] }
 0x173   :  { %2440 = vmatprep.subr.bf16.mxu0 %v3505_v15 }
 0x174   :  { %2480 = vmatpush2.bf16.msra.mxu1 %v3548_v32  ;;  %v365_v15 = vrot.slane %v3826_v25, %v364_v13 }
 0x175   :  { %2481 = vmatprep.subr.bf16.mxu1 %v3553_v35 }
 0x176   :  { %2441 = vmatpush2.bf16.msra.mxu0 %v3503_v20 }
 0x177   :  { %2442 = vmatprep.subr.bf16.mxu0 %v3508_v22 }
 0x178   :  { %2482 = vmatpush2.bf16.msra.mxu1 %v3551_v38 }
 0x179   :  { %2483 = vmatprep.subr.bf16.mxu1 %v3556_v42  ;;  %v3573_v42 = vld [vmem:[#allocation10 + $0x8] sm:$0xff]  }
 0x17a   :  { %2443 = vmatpush2.bf16.msra.mxu0 %v3506_v29 }
 0x17b   :  { %2444 = vmatprep.subr.bf16.mxu0 %v3511_v33 }
 0x17c   :  { %2484 = vmatpush2.bf16.msra.mxu1 %v3554_v27  ;;  %v3574_v27 = vld [vmem:[#allocation10 + $0x40] sm:$0xff]  }
 0x17d   :  { %2485 = vmatprep.subr.bf16.mxu1 %v3559_v50 }
 0x17e   :  { %2445 = vmatpush2.bf16.msra.mxu0 %v3509_v47 }
 0x17f   :  { %3038 = vmatprep.subr.bf16.mxu0 %v3560_v63 }
 0x180   :  { %2486 = vmatpush2.bf16.msra.mxu1 %v3557_v53 }
 0x181   :  { %v1798_v17 = vpop.f32.mrf.mxu0 }
 0x182   :  { %v1839_v39 = vpop.f32.mrf.mxu1  ;;  %v1799_v36 = vadd.f32 %v1798_v17, %v1758_v16 }
 0x183   :  { %v1800_v37 = vpop.f32.mrf.mxu0 }
 0x184   :  { %v1841_v41 = vpop.f32.mrf.mxu1  ;;  %v1840_v43 = vadd.f32 %v1839_v39, %v1799_v36  ;;  %v1801_v44 = vadd.f32 %v1800_v37, %v1760_v40 }
 0x185   :  { %v1802_v45 = vpop.f32.mrf.mxu0 }
 0x186   :  { %v1843_v30 = vpop.f32.mrf.mxu1  ;;  %v1842_v46 = vadd.f32 %v1841_v41, %v1801_v44  ;;  %v2010_v28 = vmax.f32 %v1840_v43, 0.0  ;;  %v3572_v41 = vld [vmem:[#allocation10 + $0x48] sm:$0xff]   ;;  %v3575_v45 = vld [vmem:[#allocation10] sm:$0xff]  }
 0x187   :  { %v1803_v48 = vpop.f32.mrf.mxu0 }
 0x188   :  { %v1844_v49 = vpop.f32.mrf.mxu1  ;;  %v2011_v52 = vmax.f32 %v1842_v46, 0.0  ;;  %v2014_v54 = vpack.c.bf16 %v2010_v28, %v2010_v28  ;;  %v2082_v46 = vld [vmem:[%s3860_s4] sm:$0x3] }
 0x189   :  { %v2087_v28 = vrot.slane %v2082_v46, %v356_v24  ;;  %v2091_v48 = vrot.slane %v2082_v46, %v360_v26 }
 0x18a   :  { %v2015_v31 = vpack.c.bf16 %v2011_v52, %v2011_v52 }
 0x18c   :  { %2446 = vmatprep.mubr.bf16.mxu0 %v2015_v31 }
 0x18d   :  { %2447 = vmatmul.mubr.bf16.vlgmr.msra.gmra.mxu0 %v2014_v54 }
 0x18e   :  { %3039 = vmatpush3.bf16.msra.mxu0 %v3561_v0 }
 0x18f   :  { %3040 = vmatprep.subr.bf16.mxu0 %v3562_v1 }
 0x192   :  { %3041 = vmatpush3.bf16.msra.mxu0 %v3563_v2 }
 0x193   :  { %3042 = vmatprep.subr.bf16.mxu0 %v3564_v3 }
 0x196   :  { %3043 = vmatpush3.bf16.msra.mxu0 %v3565_v4 }
 0x197   :  { %3044 = vmatprep.subr.bf16.mxu0 %v3566_v5 }
 0x19a   :  { %3045 = vmatpush3.bf16.msra.mxu0 %v3567_v8 }
 0x19b   :  { %3046 = vmatprep.subr.bf16.mxu0 %v3568_v9 }
 0x19e   :  { %3047 = vmatpush3.bf16.msra.mxu0 %v3569_v10 }
 0x19f   :  { %3048 = vmatprep.subr.bf16.mxu0 %v3570_v11 }
 0x1a2   :  { %3049 = vmatpush3.bf16.msra.mxu0 %v3571_v12 }
 0x1a3   :  { %3050 = vmatprep.subr.bf16.mxu0 %v3572_v41 }
 0x1a6   :  { %3051 = vmatpush3.bf16.msra.mxu0 %v3573_v42 }
 0x1a7   :  { %3052 = vmatprep.subr.bf16.mxu0 %v3574_v27 }
 0x1aa   :  { %3053 = vmatpush3.bf16.msra.mxu0 %v3575_v45 }
 0x1c1   :  { %v1880_v55 = vpop.f32.mrf.mxu0 }
 0x1c2   :  { %v1921_v56 = vpop.f32.mrf.mxu1  ;;  %v1881_v20 = vadd.f32 %v1880_v55, %v365_v15 }
 0x1c3   :  { %v1882_v57 = vpop.f32.mrf.mxu0 }
 0x1c4   :  { %v1923_v58 = vpop.f32.mrf.mxu1  ;;  %v1883_v21 = vadd.f32 %v1882_v57, %v369_v18  ;;  %v1922_v22 = vadd.f32 %v1921_v56, %v1881_v20 }
 0x1c5   :  { %v1884_v59 = vpop.f32.mrf.mxu0 }
 0x1c6   :  { %v1925_v60 = vpop.f32.mrf.mxu1  ;;  %v1924_v32 = vadd.f32 %v1923_v58, %v1883_v21 }
 0x1c7   :  { %v1885_v61 = vpop.f32.mrf.mxu0 }
 0x1c8   :  { %v1926_v62 = vpop.f32.mrf.mxu1 }
 0x201   :  { %v1962_v23 = vpop.f32.mrf.mxu0 }
 0x202   :  { %v2003_v29 = vpop.f32.mrf.mxu1  ;;  %v1963_v33 = vadd.f32 %v1962_v23, %v1922_v22 }
 0x203   :  { %v1964_v34 = vpop.f32.mrf.mxu0 }
 0x204   :  { %v2005_v6 = vpop.f32.mrf.mxu1  ;;  %v2004_v47 = vadd.f32 %v2003_v29, %v1963_v33  ;;  %v1965_v7 = vadd.f32 %v1964_v34, %v1924_v32 }
 0x205   :  { %v1966_v51 = vpop.f32.mrf.mxu0 }
 0x206   :  { %v2007_v35 = vpop.f32.mrf.mxu1  ;;  %v2006_v16 = vadd.f32 %v2005_v6, %v1965_v7  ;;  %v2012_v38 = vmax.f32 %v2004_v47, 0.0 }
 0x207   :  { %v1967_v17 = vpop.f32.mrf.mxu0 }
 0x208   :  { %v2008_v39 = vpop.f32.mrf.mxu1  ;;  %v2013_v40 = vmax.f32 %v2006_v16, 0.0  ;;  %v2016_v25 = vpack.c.bf16 %v2012_v38, %v2012_v38 }
 0x20a   :  { %v2017_v36 = vpack.c.bf16 %v2013_v40, %v2013_v40 }
 0x20c   :  { %2487 = vmatprep.mubr.bf16.mxu1 %v2017_v36 }
 0x20d   :  { %2488 = vmatmul.mubr.bf16.vlgmr.msra.gmra.mxu1 %v2016_v25 }
 0x24d   :  { %v2448_v37 = vpop.f32.mrf.mxu0 }
 0x24e   :  { %v2449_v49 = vadd.f32 %v2448_v37, %v2087_v28 }
 0x24f   :  { %v2450_v43 = vpop.f32.mrf.mxu0 }
 0x250   :  { %v2451_v52 = vadd.f32 %v2450_v43, %v2091_v48 }
 0x251   :  { %v2452_v44 = vpop.f32.mrf.mxu0 }
 0x253   :  { %v2453_v30 = vpop.f32.mrf.mxu0 }
 0x2cd   :  { %v2489_v50 = vpop.f32.mrf.mxu1 }
 0x2ce   :  { %v2490_v53 = vadd.f32 %v2489_v50, %v2449_v49 }
 0x2cf   :  { %v2491_v31 = vpop.f32.mrf.mxu1 }
 0x2d0   :  { %v2492_v54 = vadd.f32 %v2491_v31, %v2451_v52  ;;  %v2496_v55 = vmax.f32 %v2490_v53, 0.0 }
 0x2d1   :  { %v2493_v56 = vpop.f32.mrf.mxu1 }
 0x2d2   :  { %v2497_v57 = vmax.f32 %v2492_v54, 0.0  ;;  %v2498_v60 = vpack.c.bf16 %v2496_v55, %v2496_v55 }
 0x2d3   :  { %v2494_v58 = vpop.f32.mrf.mxu1 }
 0x2d4   :  { %v2499_v59 = vpack.c.bf16 %v2497_v57, %v2497_v57 }
 0x2d6   :  { %2667 = vmatprep.mubr.bf16.mxu0 %v2499_v59 }
 0x2d7   :  { %2668 = vmatmul.mubr.bf16.vlgmr.msra.gmra.mxu0 %v2498_v60 }
 0x397   :  { %v3054_v61 = vpop.f32.mrf.mxu0 }
 0x399   :  { %v3055_v24 = vpop.f32.mrf.mxu0 }
 0x39a   :  { %v3056_v26 = vadd.f32 %v3055_v24, %v3054_v61 }
 0x39b   :  { %v3057_v62 = vpop.f32.mrf.mxu0 }
 0x39c   :  { %v2670_v63 = vadd.f32 %v3056_v26, %v3021_v19 }
 0x39d   :  { %v3058_v0 = vpop.f32.mrf.mxu0 }
 0x39e   :  { %2675 = vst [vmem:[#allocation11] sm:$0xff] %v2670_v63 }
 0x39f   :  { %3687 = shalt.err (!%p3684_p1)
}
 0x3a0   :  { %2685 = dma.vmem_to_hbm [thread:$0]  %s2683_s8, 128, %s3863_s7, [#allocation4]  }
 0x3a1   :  { %3702 = dma.done.wait [#allocation4], 128  }
 0x3a2   :  { %3703 = vsyncadd [#allocation4], 4294967168 }
 0x3a3   :  { %2689 = vsyncpa [#allocation3], 1 }
 0x3a4   :  { %2690 = vsyncpa [#allocation6], 1 }
 0x3a5   :  { %2691 = vsyncpa [#allocation9], 1 }
 0x3a6   :  { %2692 = vsyncpa [#allocation4], 1 }

// kernel: tpu_custom_call.1
= control target key start
LH: loop header
LB: loop body
LE: loop exit
PB: predicated region body
PF: predicated region fallthrough
CT: control target
= control target key end

     0   :  { %12 = vsyncpa [#allocation3], 0  ;;  %s3856_s0 = inlined_call_operand.hbm [shape: bf16[8,1024], index: 0, kind: input, shape index: {}]   ;;  %s3857_s1 = inlined_call_operand.hbm [shape: bf16[1024,512], index: 1, kind: input, shape index: {}]   ;;  %s3858_s2 = inlined_call_operand.hbm [shape: f32[1,512], index: 2, kind: input, shape index: {}]   ;;  %s3859_s3 = inlined_call_operand.hbm [shape: bf16[512,256], index: 3, kind: input, shape index: {}]   ;;  %s3860_s4 = inlined_call_operand.vmem [shape: f32[1,256], index: 4, kind: input, shape index: {}]   ;;  %s3861_s5 = inlined_call_operand.hbm [shape: bf16[256,128], index: 5, kind: input, shape index: {}]   ;;  %s3862_s6 = inlined_call_operand.vmem [shape: f32[1,128], index: 6, kind: input, shape index: {}]   ;;  %s3863_s7 = inlined_call_operand.hbm [shape: f32[8,128], index: 7, kind: output, shape index: {}]  }
   0x1   :  { %13 = vsyncpa [#allocation6], 0 }
   0x2   :  { %14 = vsyncpa [#allocation9], 0 }
   0x3   :  { %15 = vsyncpa [#allocation4], 0  ;;  %s3704_s24 = smov [#allocation5]  }
   0x4   :  { %s31_s25 = sshll.u32 %s3704_s24, 4  ;;  %s32_s25 = int_to_ptr.vmem [resolvable:$true] %s31_s25 }
   0x5   :  { %s3584_s26 = scalar_lea.vmem %s32_s25, 32768  ;;  %p3589_p1 = scmp.lt.s32.totalorder %s32_s25, %s32_s25 }
   0x6   :  { %p3585_p0 = scmp.ne.s32.totalorder %s32_s25, %s3584_s26  ;;  %p3590_p2 = scmp.lt.s32.totalorder %s3584_s26, %s3584_s26 }
   0x8   :  { %p3591_p3 = por %p3590_p2, %p3589_p1 }
   0xa   :  { %p3592_p4 = pnand %p3591_p3, %p3585_p0 }
   0xc   :  { %3595 = shalt.err (!%p3592_p4)
}
   0xd   :  { %s3705_s27 = smov 256   ;;  %s3706_s28 = smov 16  }
   0xe   :  { %37 = dma.hbm_to_vmem [thread:$0]  %s3857_s1, 32768, %s32_s25, [#allocation6], %s3705_s27, %s3705_s27, %s3706_s28  }
   0xf   :  { %s3707_s8 = smov [#allocation8]  }
  0x10   :  { %s53_s9 = sshll.u32 %s3707_s8, 4  ;;  %s54_s9 = int_to_ptr.vmem [resolvable:$true] %s53_s9 }
  0x11   :  { %s3604_s10 = scalar_lea.vmem %s54_s9, 8192  ;;  %p3609_p6 = scmp.lt.s32.totalorder %s54_s9, %s54_s9 }
  0x12   :  { %p3605_p5 = scmp.ne.s32.totalorder %s54_s9, %s3604_s10  ;;  %p3610_p7 = scmp.lt.s32.totalorder %s3604_s10, %s3604_s10 }
  0x14   :  { %p3611_p8 = por %p3610_p7, %p3609_p6 }
  0x16   :  { %p3612_p9 = pnand %p3611_p8, %p3605_p5 }
  0x18   :  { %3615 = shalt.err (!%p3612_p9)
}
  0x19   :  { %s3708_s11 = smov 128   ;;  %s3709_s12 = smov 8  }
  0x1a   :  { %59 = dma.hbm_to_vmem [thread:$0]  %s3859_s3, 8192, %s54_s9, [#allocation9], %s3708_s11, %s3708_s11, %s3709_s12  }
  0x1b   :  { %s3710_s15 = smov [#allocation2]   ;;  %s3711_s17 = smov [#allocation7]  }
  0x1c   :  { %s22_s16 = sshll.u32 %s3710_s15, 4  ;;  %s44_s1 = sshll.u32 %s3711_s17, 4  ;;  %s23_s16 = int_to_ptr.vmem [resolvable:$true] %s22_s16  ;;  %s45_s1 = int_to_ptr.vmem [resolvable:$true] %s44_s1 }
  0x1d   :  { %s3624_s18 = scalar_lea.vmem %s23_s16, 512  ;;  %p3629_p11 = scmp.lt.s32.totalorder %s23_s16, %s23_s16 }
  0x1e   :  { %p3625_p10 = scmp.ne.s32.totalorder %s23_s16, %s3624_s18  ;;  %p3630_p12 = scmp.lt.s32.totalorder %s3624_s18, %s3624_s18 }
  0x20   :  { %p3631_p13 = por %p3630_p12, %p3629_p11 }
  0x22   :  { %p3632_p0 = pnand %p3631_p13, %p3625_p10 }
  0x24   :  { %3635 = shalt.err (!%p3632_p0)
}
  0x25   :  { %25 = dma.hbm_to_vmem [thread:$0]  %s3856_s0, 512, %s23_s16, [#allocation3]  }
  0x26   :  { %s3644_s21 = scalar_lea.vmem %s45_s1, 64  ;;  %p3649_p2 = scmp.lt.s32.totalorder %s45_s1, %s45_s1 }
  0x27   :  { %p3645_p1 = scmp.ne.s32.totalorder %s45_s1, %s3644_s21  ;;  %p3650_p3 = scmp.lt.s32.totalorder %s3644_s21, %s3644_s21 }
  0x29   :  { %p3651_p4 = por %p3650_p3, %p3649_p2 }
  0x2b   :  { %p3652_p5 = pnand %p3651_p4, %p3645_p1 }
  0x2d   :  { %3655 = shalt.err (!%p3652_p5)
}
  0x2e   :  { %47 = dma.hbm_to_vmem [thread:$0]  %s3858_s2, 64, %s45_s1, [#allocation6]  }
  0x2f   :  { %s3712_s23 = smov [#allocation10]  }
  0x30   :  { %s67_s24 = sshll.u32 %s3712_s23, 4  ;;  %s68_s24 = int_to_ptr.vmem [resolvable:$true] %s67_s24 }
  0x31   :  { %s3664_s25 = scalar_lea.vmem %s68_s24, 2048  ;;  %p3669_p7 = scmp.lt.s32.totalorder %s68_s24, %s68_s24 }
  0x32   :  { %p3665_p6 = scmp.ne.s32.totalorder %s68_s24, %s3664_s25  ;;  %p3670_p8 = scmp.lt.s32.totalorder %s3664_s25, %s3664_s25 }
  0x34   :  { %p3671_p9 = por %p3670_p8, %p3669_p7 }
  0x36   :  { %p3672_p10 = pnand %p3671_p9, %p3665_p6 }
  0x38   :  { %3675 = shalt.err (!%p3672_p10)
}
  0x39   :  { %s3713_s0 = smov 64   ;;  %s3714_s26 = smov 4  }
  0x3a   :  { %73 = dma.hbm_to_vmem [thread:$0]  %s3861_s5, 2048, %s68_s24, [#allocation9], %s3713_s0, %s3713_s0, %s3714_s26  }
  0x3b   :  { %3696 = dma.done.wait [#allocation3], 512  }
  0x3c   :  { %3697 = vsyncadd [#allocation3], 4294966784 }
  0x3d   :  { %3698 = dma.done.wait [#allocation6], 32832  }
  0x3e   :  { %3699 = vsyncadd [#allocation6], 4294934464 }
  0x3f   :  { %3700 = dma.done.wait [#allocation9], 10240  }
  0x40   :  { %3701 = vsyncadd [#allocation9], 4294957056  ;;  %v3072_v0 = vld [vmem:[#allocation5 + $0xe4] ss:$16 sps:$4 sm:$0xff]   ;;  %v3076_v2 = vld [vmem:[#allocation5 + $0xe0] ss:$16 sps:$4 sm:$0xff]  }
  0x41   :  { %v3074_v1 = vld [vmem:[#allocation5 + $0x2e4] ss:$16 sps:$4 sm:$0xff]   ;;  %1682 = vmatprep.subr.bf16.mxu0 %v3072_v0  ;;  %v3077_v3 = vld [vmem:[#allocation5 + $0x2e0] ss:$16 sps:$4 sm:$0xff]   ;;  %v93_v48 = vld [vmem:[#allocation2 + $0x8] sm:$0xff]  ;;  %s3715_s30 = smov [#allocation11]  }
  0x42   :  { %1723 = vmatprep.subr.bf16.mxu1 %v3074_v1  ;;  %v3078_v4 = vld [vmem:[#allocation5 + $0xc4] ss:$16 sps:$4 sm:$0xff]   ;;  %1683 = vmatpush1.bf16.msra.mxu0 %v3076_v2  ;;  %v3082_v6 = vld [vmem:[#allocation5 + $0xc0] ss:$16 sps:$4 sm:$0xff]   ;;  %v3773_v51 = vcombine.high %v93_v48, %v93_v48  ;;  %s2682_s8 = sshll.u32 %s3715_s30, 4  ;;  %s2683_s8 = int_to_ptr.vmem [resolvable:$true] %s2682_s8 }
  0x43   :  { %1724 = vmatpush1.bf16.msra.mxu1 %v3077_v3  ;;  %v3080_v5 = vld [vmem:[#allocation5 + $0x2c4] ss:$16 sps:$4 sm:$0xff]   ;;  %1684 = vmatprep.subr.bf16.mxu0 %v3078_v4  ;;  %v3083_v7 = vld [vmem:[#allocation5 + $0x2c0] ss:$16 sps:$4 sm:$0xff]   ;;  %s3676_s9 = scalar_lea.vmem %s2683_s8, 128  ;;  %p3681_p12 = scmp.lt.s32.totalorder %s2683_s8, %s2683_s8 }
  0x44   :  { %1725 = vmatprep.subr.bf16.mxu1 %v3080_v5  ;;  %v3084_v8 = vld [vmem:[#allocation5 + $0xa4] ss:$16 sps:$4 sm:$0xff]   ;;  %v3088_v10 = vld [vmem:[#allocation5 + $0xa0] ss:$16 sps:$4 sm:$0xff]   ;;  %1755 = vmatprep.mubr.bf16.mxu1 %v3773_v51  ;;  %p3677_p11 = scmp.ne.s32.totalorder %s2683_s8, %s3676_s9  ;;  %p3682_p13 = scmp.lt.s32.totalorder %s3676_s9, %s3676_s9 }
  0x45   :  { %v3086_v9 = vld [vmem:[#allocation5 + $0x2a4] ss:$16 sps:$4 sm:$0xff]   ;;  %v3089_v11 = vld [vmem:[#allocation5 + $0x2a0] ss:$16 sps:$4 sm:$0xff]  }
  0x46   :  { %1685 = vmatpush1.bf16.msra.mxu0 %v3082_v6  ;;  %v3090_v12 = vld [vmem:[#allocation5 + $0x84] ss:$16 sps:$4 sm:$0xff]   ;;  %v3094_v14 = vld [vmem:[#allocation5 + $0x80] ss:$16 sps:$4 sm:$0xff]   ;;  %p3683_p0 = por %p3682_p13, %p3681_p12 }
  0x47   :  { %1726 = vmatpush1.bf16.msra.mxu1 %v3083_v7  ;;  %1686 = vmatprep.subr.bf16.mxu0 %v3084_v8  ;;  %v3092_v13 = vld [vmem:[#allocation5 + $0x284] ss:$16 sps:$4 sm:$0xff]   ;;  %v3095_v15 = vld [vmem:[#allocation5 + $0x280] ss:$16 sps:$4 sm:$0xff]   ;;  %v3779_v7 = vcombine.low %v93_v48, %v93_v48 }
  0x48   :  { %1727 = vmatprep.subr.bf16.mxu1 %v3086_v9  ;;  %v3096_v16 = vld [vmem:[#allocation5 + $0x64] ss:$16 sps:$4 sm:$0xff]   ;;  %v3100_v18 = vld [vmem:[#allocation5 + $0x60] ss:$16 sps:$4 sm:$0xff]   ;;  %p3684_p1 = pnand %p3683_p0, %p3677_p11 }
  0x49   :  { %v3098_v17 = vld [vmem:[#allocation5 + $0x264] ss:$16 sps:$4 sm:$0xff]   ;;  %v3101_v19 = vld [vmem:[#allocation5 + $0x260] ss:$16 sps:$4 sm:$0xff]  }
  0x4a   :  { %1687 = vmatpush1.bf16.msra.mxu0 %v3088_v10  ;;  %v3102_v20 = vld [vmem:[#allocation5 + $0x44] ss:$16 sps:$4 sm:$0xff]   ;;  %v3106_v22 = vld [vmem:[#allocation5 + $0x40] ss:$16 sps:$4 sm:$0xff]  }
  0x4b   :  { %1728 = vmatpush1.bf16.msra.mxu1 %v3089_v11  ;;  %1688 = vmatprep.subr.bf16.mxu0 %v3090_v12  ;;  %v3104_v21 = vld [vmem:[#allocation5 + $0x244] ss:$16 sps:$4 sm:$0xff]   ;;  %v3107_v23 = vld [vmem:[#allocation5 + $0x240] ss:$16 sps:$4 sm:$0xff]  }
  0x4c   :  { %1729 = vmatprep.subr.bf16.mxu1 %v3092_v13  ;;  %v3108_v24 = vld [vmem:[#allocation5 + $0x24] ss:$16 sps:$4 sm:$0xff]   ;;  %v3112_v26 = vld [vmem:[#allocation5 + $0x20] ss:$16 sps:$4 sm:$0xff]  }
  0x4d   :  { %v3110_v25 = vld [vmem:[#allocation5 + $0x224] ss:$16 sps:$4 sm:$0xff]   ;;  %v3113_v27 = vld [vmem:[#allocation5 + $0x220] ss:$16 sps:$4 sm:$0xff]  }
  0x4e   :  { %1689 = vmatpush1.bf16.msra.mxu0 %v3094_v14  ;;  %v3114_v28 = vld [vmem:[#allocation5 + $0x4] ss:$16 sps:$4 sm:$0xff]   ;;  %v3118_v30 = vld [vmem:[#allocation5] ss:$16 sps:$4 sm:$0xff]  }
  0x4f   :  { %1730 = vmatpush1.bf16.msra.mxu1 %v3095_v15  ;;  %1690 = vmatprep.subr.bf16.mxu0 %v3096_v16  ;;  %v3116_v29 = vld [vmem:[#allocation5 + $0x204] ss:$16 sps:$4 sm:$0xff]   ;;  %v3119_v31 = vld [vmem:[#allocation5 + $0x200] ss:$16 sps:$4 sm:$0xff]  }
  0x50   :  { %1731 = vmatprep.subr.bf16.mxu1 %v3098_v17  ;;  %v3120_v32 = vld [vmem:[#allocation5 + $0x1e4] ss:$16 sps:$4 sm:$0xff]   ;;  %v3124_v34 = vld [vmem:[#allocation5 + $0x1e0] ss:$16 sps:$4 sm:$0xff]  }
  0x51   :  { %v3122_v33 = vld [vmem:[#allocation5 + $0x3e4] ss:$16 sps:$4 sm:$0xff]   ;;  %v3125_v35 = vld [vmem:[#allocation5 + $0x3e0] ss:$16 sps:$4 sm:$0xff]  }
  0x52   :  { %1691 = vmatpush1.bf16.msra.mxu0 %v3100_v18  ;;  %v3126_v36 = vld [vmem:[#allocation5 + $0x1c4] ss:$16 sps:$4 sm:$0xff]   ;;  %v3130_v38 = vld [vmem:[#allocation5 + $0x1c0] ss:$16 sps:$4 sm:$0xff]  }
  0x53   :  { %1732 = vmatpush1.bf16.msra.mxu1 %v3101_v19  ;;  %1692 = vmatprep.subr.bf16.mxu0 %v3102_v20  ;;  %v3128_v37 = vld [vmem:[#allocation5 + $0x3c4] ss:$16 sps:$4 sm:$0xff]   ;;  %v3131_v39 = vld [vmem:[#allocation5 + $0x3c0] ss:$16 sps:$4 sm:$0xff]  }
  0x54   :  { %1733 = vmatprep.subr.bf16.mxu1 %v3104_v21  ;;  %v3132_v40 = vld [vmem:[#allocation5 + $0x1a4] ss:$16 sps:$4 sm:$0xff]   ;;  %v3136_v42 = vld [vmem:[#allocation5 + $0x1a0] ss:$16 sps:$4 sm:$0xff]  }
  0x55   :  { %v3134_v41 = vld [vmem:[#allocation5 + $0x3a4] ss:$16 sps:$4 sm:$0xff]   ;;  %v3137_v43 = vld [vmem:[#allocation5 + $0x3a0] ss:$16 sps:$4 sm:$0xff]  }
  0x56   :  { %1693 = vmatpush1.bf16.msra.mxu0 %v3106_v22  ;;  %v3138_v44 = vld [vmem:[#allocation5 + $0x184] ss:$16 sps:$4 sm:$0xff]   ;;  %v3142_v49 = vld [vmem:[#allocation5 + $0x180] ss:$16 sps:$4 sm:$0xff]  }
  0x57   :  { %1734 = vmatpush1.bf16.msra.mxu1 %v3107_v23  ;;  %1694 = vmatprep.subr.bf16.mxu0 %v3108_v24  ;;  %v3140_v45 = vld [vmem:[#allocation5 + $0x384] ss:$16 sps:$4 sm:$0xff]   ;;  %v3143_v50 = vld [vmem:[#allocation5 + $0x380] ss:$16 sps:$4 sm:$0xff]  }
  0x58   :  { %1735 = vmatprep.subr.bf16.mxu1 %v3110_v25  ;;  %v92_v46 = vld [vmem:[#allocation2] sm:$0xff] }
  0x59   :  { %v3771_v47 = vcombine.high %v92_v46, %v92_v46  ;;  %v3144_v52 = vld [vmem:[#allocation5 + $0x164] ss:$16 sps:$4 sm:$0xff]   ;;  %v3148_v54 = vld [vmem:[#allocation5 + $0x160] ss:$16 sps:$4 sm:$0xff]   ;;  %v3777_v6 = vcombine.low %v92_v46, %v92_v46 }
  0x5a   :  { %1695 = vmatpush1.bf16.msra.mxu0 %v3112_v26  ;;  %v3146_v53 = vld [vmem:[#allocation5 + $0x364] ss:$16 sps:$4 sm:$0xff]   ;;  %v3149_v55 = vld [vmem:[#allocation5 + $0x360] ss:$16 sps:$4 sm:$0xff]  }
  0x5b   :  { %1736 = vmatpush1.bf16.msra.mxu1 %v3113_v27  ;;  %1696 = vmatprep.subr.bf16.mxu0 %v3114_v28  ;;  %v3150_v56 = vld [vmem:[#allocation5 + $0x144] ss:$16 sps:$4 sm:$0xff]   ;;  %v3154_v58 = vld [vmem:[#allocation5 + $0x140] ss:$16 sps:$4 sm:$0xff]  }
  0x5c   :  { %1737 = vmatprep.subr.bf16.mxu1 %v3116_v29  ;;  %1714 = vmatprep.mubr.bf16.mxu0 %v3771_v47  ;;  %v3152_v57 = vld [vmem:[#allocation5 + $0x344] ss:$16 sps:$4 sm:$0xff]   ;;  %v3155_v59 = vld [vmem:[#allocation5 + $0x340] ss:$16 sps:$4 sm:$0xff]  }
  0x5d   :  { %v3156_v60 = vld [vmem:[#allocation5 + $0x124] ss:$16 sps:$4 sm:$0xff]   ;;  %v3160_v62 = vld [vmem:[#allocation5 + $0x120] ss:$16 sps:$4 sm:$0xff]  }
  0x5e   :  { %1697 = vmatpush1.bf16.msra.mxu0 %v3118_v30  ;;  %v3158_v61 = vld [vmem:[#allocation5 + $0x324] ss:$16 sps:$4 sm:$0xff]   ;;  %v3161_v63 = vld [vmem:[#allocation5 + $0x320] ss:$16 sps:$4 sm:$0xff]  }
  0x5f   :  { %1738 = vmatpush1.bf16.msra.mxu1 %v3119_v31  ;;  %1698 = vmatprep.subr.bf16.mxu0 %v3120_v32  ;;  %v3162_v0 = vld [vmem:[#allocation5 + $0x104] ss:$16 sps:$4 sm:$0xff]   ;;  %v3166_v2 = vld [vmem:[#allocation5 + $0x100] ss:$16 sps:$4 sm:$0xff]  }
  0x60   :  { %1739 = vmatprep.subr.bf16.mxu1 %v3122_v33  ;;  %v3164_v1 = vld [vmem:[#allocation5 + $0x304] ss:$16 sps:$4 sm:$0xff]   ;;  %v3167_v3 = vld [vmem:[#allocation5 + $0x300] ss:$16 sps:$4 sm:$0xff]   ;;  %v3785_v33 = vld [vmem:[#allocation2 + $0x18] sm:$0xff] }
  0x61   :  { %v3174_v4 = vld [vmem:[#allocation5 + $0x4e4] ss:$16 sps:$4 sm:$0xff]   ;;  %v3172_v8 = vld [vmem:[#allocation5 + $0x4e0] ss:$16 sps:$4 sm:$0xff]  }
  0x62   :  { %1699 = vmatpush2.bf16.msra.mxu0 %v3124_v34  ;;  %v3177_v5 = vld [vmem:[#allocation5 + $0x6e4] ss:$16 sps:$4 sm:$0xff]   ;;  %v3175_v9 = vld [vmem:[#allocation5 + $0x6e0] ss:$16 sps:$4 sm:$0xff]  }
  0x63   :  { %1740 = vmatpush2.bf16.msra.mxu1 %v3125_v35  ;;  %1700 = vmatprep.subr.bf16.mxu0 %v3126_v36  ;;  %v3180_v10 = vld [vmem:[#allocation5 + $0x4c4] ss:$16 sps:$4 sm:$0xff]   ;;  %v3178_v12 = vld [vmem:[#allocation5 + $0x4c0] ss:$16 sps:$4 sm:$0xff]  }
  0x64   :  { %1741 = vmatprep.subr.bf16.mxu1 %v3128_v37  ;;  %v3183_v11 = vld [vmem:[#allocation5 + $0x6c4] ss:$16 sps:$4 sm:$0xff]   ;;  %v3181_v13 = vld [vmem:[#allocation5 + $0x6c0] ss:$16 sps:$4 sm:$0xff]   ;;  %v3793_v37 = vcombine.high %v3785_v33, %v3785_v33 }
  0x65   :  { %v3186_v14 = vld [vmem:[#allocation5 + $0x4a4] ss:$16 sps:$4 sm:$0xff]   ;;  %v3184_v16 = vld [vmem:[#allocation5 + $0x4a0] ss:$16 sps:$4 sm:$0xff]  }
  0x66   :  { %1701 = vmatpush2.bf16.msra.mxu0 %v3130_v38  ;;  %v3189_v15 = vld [vmem:[#allocation5 + $0x6a4] ss:$16 sps:$4 sm:$0xff]   ;;  %v3187_v17 = vld [vmem:[#allocation5 + $0x6a0] ss:$16 sps:$4 sm:$0xff]  }
  0x67   :  { %1742 = vmatpush2.bf16.msra.mxu1 %v3131_v39  ;;  %1702 = vmatprep.subr.bf16.mxu0 %v3132_v40  ;;  %v3192_v18 = vld [vmem:[#allocation5 + $0x484] ss:$16 sps:$4 sm:$0xff]   ;;  %v3190_v20 = vld [vmem:[#allocation5 + $0x480] ss:$16 sps:$4 sm:$0xff]  }
  0x68   :  { %1743 = vmatprep.subr.bf16.mxu1 %v3134_v41  ;;  %v3195_v19 = vld [vmem:[#allocation5 + $0x684] ss:$16 sps:$4 sm:$0xff]   ;;  %v3193_v21 = vld [vmem:[#allocation5 + $0x680] ss:$16 sps:$4 sm:$0xff]  }
  0x69   :  { %v3198_v22 = vld [vmem:[#allocation5 + $0x464] ss:$16 sps:$4 sm:$0xff]   ;;  %v3196_v24 = vld [vmem:[#allocation5 + $0x460] ss:$16 sps:$4 sm:$0xff]  }
  0x6a   :  { %1703 = vmatpush2.bf16.msra.mxu0 %v3136_v42  ;;  %v3201_v23 = vld [vmem:[#allocation5 + $0x664] ss:$16 sps:$4 sm:$0xff]   ;;  %v3199_v25 = vld [vmem:[#allocation5 + $0x660] ss:$16 sps:$4 sm:$0xff]  }
  0x6b   :  { %1744 = vmatpush2.bf16.msra.mxu1 %v3137_v43  ;;  %1704 = vmatprep.subr.bf16.mxu0 %v3138_v44  ;;  %v3204_v26 = vld [vmem:[#allocation5 + $0x444] ss:$16 sps:$4 sm:$0xff]   ;;  %v3202_v28 = vld [vmem:[#allocation5 + $0x440] ss:$16 sps:$4 sm:$0xff]  }
  0x6c   :  { %1745 = vmatprep.subr.bf16.mxu1 %v3140_v45  ;;  %v3207_v27 = vld [vmem:[#allocation5 + $0x644] ss:$16 sps:$4 sm:$0xff]   ;;  %v3205_v29 = vld [vmem:[#allocation5 + $0x640] ss:$16 sps:$4 sm:$0xff]  }
  0x6d   :  { %v3210_v30 = vld [vmem:[#allocation5 + $0x424] ss:$16 sps:$4 sm:$0xff]   ;;  %v3208_v34 = vld [vmem:[#allocation5 + $0x420] ss:$16 sps:$4 sm:$0xff]  }
  0x6e   :  { %1705 = vmatpush2.bf16.msra.mxu0 %v3142_v49  ;;  %v3213_v31 = vld [vmem:[#allocation5 + $0x624] ss:$16 sps:$4 sm:$0xff]   ;;  %v3211_v35 = vld [vmem:[#allocation5 + $0x620] ss:$16 sps:$4 sm:$0xff]  }
  0x6f   :  { %1746 = vmatpush2.bf16.msra.mxu1 %v3143_v50  ;;  %1706 = vmatprep.subr.bf16.mxu0 %v3144_v52  ;;  %v3783_v32 = vld [vmem:[#allocation2 + $0x10] sm:$0xff] }
  0x70   :  { %1747 = vmatprep.subr.bf16.mxu1 %v3146_v53  ;;  %v3789_v36 = vcombine.high %v3783_v32, %v3783_v32  ;;  %v3216_v38 = vld [vmem:[#allocation5 + $0x404] ss:$16 sps:$4 sm:$0xff]   ;;  %v3214_v40 = vld [vmem:[#allocation5 + $0x400] ss:$16 sps:$4 sm:$0xff]  }
  0x71   :  { %v3219_v39 = vld [vmem:[#allocation5 + $0x604] ss:$16 sps:$4 sm:$0xff]   ;;  %v3217_v41 = vld [vmem:[#allocation5 + $0x600] ss:$16 sps:$4 sm:$0xff]  }
  0x72   :  { %1707 = vmatpush2.bf16.msra.mxu0 %v3148_v54  ;;  %v3222_v42 = vld [vmem:[#allocation5 + $0x5e4] ss:$16 sps:$4 sm:$0xff]   ;;  %v3220_v44 = vld [vmem:[#allocation5 + $0x5e0] ss:$16 sps:$4 sm:$0xff]  }
  0x73   :  { %1748 = vmatpush2.bf16.msra.mxu1 %v3149_v55  ;;  %1708 = vmatprep.subr.bf16.mxu0 %v3150_v56  ;;  %v3225_v43 = vld [vmem:[#allocation5 + $0x7e4] ss:$16 sps:$4 sm:$0xff]   ;;  %v3223_v45 = vld [vmem:[#allocation5 + $0x7e0] ss:$16 sps:$4 sm:$0xff]  }
  0x74   :  { %1749 = vmatprep.subr.bf16.mxu1 %v3152_v57  ;;  %v3228_v46 = vld [vmem:[#allocation5 + $0x5c4] ss:$16 sps:$4 sm:$0xff]   ;;  %v3226_v49 = vld [vmem:[#allocation5 + $0x5c0] ss:$16 sps:$4 sm:$0xff]  }
  0x75   :  { %v3231_v48 = vld [vmem:[#allocation5 + $0x7c4] ss:$16 sps:$4 sm:$0xff]   ;;  %v3229_v50 = vld [vmem:[#allocation5 + $0x7c0] ss:$16 sps:$4 sm:$0xff]  }
  0x76   :  { %1709 = vmatpush2.bf16.msra.mxu0 %v3154_v58  ;;  %v3234_v52 = vld [vmem:[#allocation5 + $0x5a4] ss:$16 sps:$4 sm:$0xff]   ;;  %v3232_v54 = vld [vmem:[#allocation5 + $0x5a0] ss:$16 sps:$4 sm:$0xff]  }
  0x77   :  { %1750 = vmatpush2.bf16.msra.mxu1 %v3155_v59  ;;  %1710 = vmatprep.subr.bf16.mxu0 %v3156_v60  ;;  %v3237_v53 = vld [vmem:[#allocation5 + $0x7a4] ss:$16 sps:$4 sm:$0xff]   ;;  %v3235_v55 = vld [vmem:[#allocation5 + $0x7a0] ss:$16 sps:$4 sm:$0xff]  }
  0x78   :  { %1751 = vmatprep.subr.bf16.mxu1 %v3158_v61  ;;  %v3240_v56 = vld [vmem:[#allocation5 + $0x584] ss:$16 sps:$4 sm:$0xff]   ;;  %v3238_v58 = vld [vmem:[#allocation5 + $0x580] ss:$16 sps:$4 sm:$0xff]  }
  0x79   :  { %v3243_v57 = vld [vmem:[#allocation5 + $0x784] ss:$16 sps:$4 sm:$0xff]   ;;  %v3241_v59 = vld [vmem:[#allocation5 + $0x780] ss:$16 sps:$4 sm:$0xff]  }
  0x7a   :  { %1711 = vmatpush2.bf16.msra.mxu0 %v3160_v62  ;;  %v3246_v60 = vld [vmem:[#allocation5 + $0x564] ss:$16 sps:$4 sm:$0xff]   ;;  %v3244_v62 = vld [vmem:[#allocation5 + $0x560] ss:$16 sps:$4 sm:$0xff]  }
  0x7b   :  { %1752 = vmatpush2.bf16.msra.mxu1 %v3161_v63  ;;  %1712 = vmatprep.subr.bf16.mxu0 %v3162_v0  ;;  %v3249_v61 = vld [vmem:[#allocation5 + $0x764] ss:$16 sps:$4 sm:$0xff]   ;;  %v3247_v63 = vld [vmem:[#allocation5 + $0x760] ss:$16 sps:$4 sm:$0xff]  }
  0x7c   :  { %1753 = vmatprep.subr.bf16.mxu1 %v3164_v1  ;;  %v3252_v0 = vld [vmem:[#allocation5 + $0x544] ss:$16 sps:$4 sm:$0xff]  }
  0x7d   :  { %v3255_v1 = vld [vmem:[#allocation5 + $0x744] ss:$16 sps:$4 sm:$0xff]  }
  0x7e   :  { %1713 = vmatpush2.bf16.msra.mxu0 %v3166_v2  ;;  %v3250_v2 = vld [vmem:[#allocation5 + $0x540] ss:$16 sps:$4 sm:$0xff]  }
  0x7f   :  { %1754 = vmatpush2.bf16.msra.mxu1 %v3167_v3  ;;  %1764 = vmatprep.subr.bf16.mxu0 %v3174_v4  ;;  %v3253_v3 = vld [vmem:[#allocation5 + $0x740] ss:$16 sps:$4 sm:$0xff]   ;;  %v3258_v4 = vld [vmem:[#allocation5 + $0x524] ss:$16 sps:$4 sm:$0xff]  }
  0x80   :  { %1805 = vmatprep.subr.bf16.mxu1 %v3177_v5  ;;  %v3261_v5 = vld [vmem:[#allocation5 + $0x724] ss:$16 sps:$4 sm:$0xff]  }
  0x81   :  { %1715 = vmatmul.mubr.bf16.vlgmr.msra.gmra.mxu0 %v3777_v6 }
  0x82   :  { %1756 = vmatmul.mubr.bf16.vlgmr.msra.gmra.mxu1 %v3779_v7  ;;  %1765 = vmatpush1.bf16.msra.mxu0 %v3172_v8  ;;  %v3256_v8 = vld [vmem:[#allocation5 + $0x520] ss:$16 sps:$4 sm:$0xff]  }
  0x83   :  { %1806 = vmatpush1.bf16.msra.mxu1 %v3175_v9  ;;  %1766 = vmatprep.subr.bf16.mxu0 %v3180_v10  ;;  %v3259_v9 = vld [vmem:[#allocation5 + $0x720] ss:$16 sps:$4 sm:$0xff]   ;;  %v3264_v10 = vld [vmem:[#allocation5 + $0x504] ss:$16 sps:$4 sm:$0xff]  }
  0x84   :  { %1807 = vmatprep.subr.bf16.mxu1 %v3183_v11  ;;  %1796 = vmatprep.mubr.bf16.mxu0 %v3789_v36  ;;  %v3267_v11 = vld [vmem:[#allocation5 + $0x704] ss:$16 sps:$4 sm:$0xff]  }
  0x85   :  { %1837 = vmatprep.mubr.bf16.mxu1 %v3793_v37 }
  0x86   :  { %1767 = vmatpush1.bf16.msra.mxu0 %v3178_v12  ;;  %v3262_v12 = vld [vmem:[#allocation5 + $0x500] ss:$16 sps:$4 sm:$0xff]  }
  0x87   :  { %1808 = vmatpush1.bf16.msra.mxu1 %v3181_v13  ;;  %1768 = vmatprep.subr.bf16.mxu0 %v3186_v14  ;;  %v3265_v13 = vld [vmem:[#allocation5 + $0x700] ss:$16 sps:$4 sm:$0xff]   ;;  %v3274_v14 = vld [vmem:[#allocation5 + $0xec] ss:$16 sps:$4 sm:$0xff]  }
  0x88   :  { %1809 = vmatprep.subr.bf16.mxu1 %v3189_v15  ;;  %v3277_v15 = vld [vmem:[#allocation5 + $0x2ec] ss:$16 sps:$4 sm:$0xff]  }
  0x8a   :  { %1769 = vmatpush1.bf16.msra.mxu0 %v3184_v16  ;;  %v3799_v16 = vcombine.low %v3783_v32, %v3783_v32  ;;  %v3298_v32 = vld [vmem:[#allocation5 + $0x6c] ss:$16 sps:$4 sm:$0xff]  }
  0x8b   :  { %1810 = vmatpush1.bf16.msra.mxu1 %v3187_v17  ;;  %1770 = vmatprep.subr.bf16.mxu0 %v3192_v18  ;;  %v3803_v17 = vcombine.low %v3785_v33, %v3785_v33  ;;  %v3272_v18 = vld [vmem:[#allocation5 + $0xe8] ss:$16 sps:$4 sm:$0xff]   ;;  %v3301_v33 = vld [vmem:[#allocation5 + $0x26c] ss:$16 sps:$4 sm:$0xff]  }
  0x8c   :  { %1811 = vmatprep.subr.bf16.mxu1 %v3195_v19  ;;  %v3275_v19 = vld [vmem:[#allocation5 + $0x2e8] ss:$16 sps:$4 sm:$0xff]  }
  0x8e   :  { %1771 = vmatpush1.bf16.msra.mxu0 %v3190_v20  ;;  %v3280_v20 = vld [vmem:[#allocation5 + $0xcc] ss:$16 sps:$4 sm:$0xff]  }
  0x8f   :  { %1812 = vmatpush1.bf16.msra.mxu1 %v3193_v21  ;;  %1772 = vmatprep.subr.bf16.mxu0 %v3198_v22  ;;  %v3283_v21 = vld [vmem:[#allocation5 + $0x2cc] ss:$16 sps:$4 sm:$0xff]   ;;  %v3278_v22 = vld [vmem:[#allocation5 + $0xc8] ss:$16 sps:$4 sm:$0xff]  }
  0x90   :  { %1813 = vmatprep.subr.bf16.mxu1 %v3201_v23  ;;  %v3281_v23 = vld [vmem:[#allocation5 + $0x2c8] ss:$16 sps:$4 sm:$0xff]  }
  0x92   :  { %1773 = vmatpush1.bf16.msra.mxu0 %v3196_v24  ;;  %v3286_v24 = vld [vmem:[#allocation5 + $0xac] ss:$16 sps:$4 sm:$0xff]  }
  0x93   :  { %1814 = vmatpush1.bf16.msra.mxu1 %v3199_v25  ;;  %1774 = vmatprep.subr.bf16.mxu0 %v3204_v26  ;;  %v3289_v25 = vld [vmem:[#allocation5 + $0x2ac] ss:$16 sps:$4 sm:$0xff]   ;;  %v3284_v26 = vld [vmem:[#allocation5 + $0xa8] ss:$16 sps:$4 sm:$0xff]  }
  0x94   :  { %1815 = vmatprep.subr.bf16.mxu1 %v3207_v27  ;;  %v3287_v27 = vld [vmem:[#allocation5 + $0x2a8] ss:$16 sps:$4 sm:$0xff]  }
  0x96   :  { %1775 = vmatpush1.bf16.msra.mxu0 %v3202_v28  ;;  %v3292_v28 = vld [vmem:[#allocation5 + $0x8c] ss:$16 sps:$4 sm:$0xff]  }
  0x97   :  { %1816 = vmatpush1.bf16.msra.mxu1 %v3205_v29  ;;  %1776 = vmatprep.subr.bf16.mxu0 %v3210_v30  ;;  %v3295_v29 = vld [vmem:[#allocation5 + $0x28c] ss:$16 sps:$4 sm:$0xff]   ;;  %v3290_v30 = vld [vmem:[#allocation5 + $0x88] ss:$16 sps:$4 sm:$0xff]  }
  0x98   :  { %1817 = vmatprep.subr.bf16.mxu1 %v3213_v31  ;;  %v3293_v31 = vld [vmem:[#allocation5 + $0x288] ss:$16 sps:$4 sm:$0xff]  }
  0x9a   :  { %1777 = vmatpush1.bf16.msra.mxu0 %v3208_v34  ;;  %v3296_v34 = vld [vmem:[#allocation5 + $0x68] ss:$16 sps:$4 sm:$0xff]  }
  0x9b   :  { %1818 = vmatpush1.bf16.msra.mxu1 %v3211_v35  ;;  %1778 = vmatprep.subr.bf16.mxu0 %v3216_v38  ;;  %v3307_v35 = vld [vmem:[#allocation5 + $0x24c] ss:$16 sps:$4 sm:$0xff]   ;;  %v3302_v38 = vld [vmem:[#allocation5 + $0x48] ss:$16 sps:$4 sm:$0xff]  }
  0x9c   :  { %1819 = vmatprep.subr.bf16.mxu1 %v3219_v39  ;;  %v3305_v39 = vld [vmem:[#allocation5 + $0x248] ss:$16 sps:$4 sm:$0xff]  }
  0x9e   :  { %1779 = vmatpush1.bf16.msra.mxu0 %v3214_v40  ;;  %v3310_v40 = vld [vmem:[#allocation5 + $0x2c] ss:$16 sps:$4 sm:$0xff]  }
  0x9f   :  { %1820 = vmatpush1.bf16.msra.mxu1 %v3217_v41  ;;  %1780 = vmatprep.subr.bf16.mxu0 %v3222_v42  ;;  %v3313_v41 = vld [vmem:[#allocation5 + $0x22c] ss:$16 sps:$4 sm:$0xff]   ;;  %v3308_v42 = vld [vmem:[#allocation5 + $0x28] ss:$16 sps:$4 sm:$0xff]  }
  0xa0   :  { %1821 = vmatprep.subr.bf16.mxu1 %v3225_v43  ;;  %v3311_v43 = vld [vmem:[#allocation5 + $0x228] ss:$16 sps:$4 sm:$0xff]  }
  0xa2   :  { %1781 = vmatpush2.bf16.msra.mxu0 %v3220_v44  ;;  %v3316_v44 = vld [vmem:[#allocation5 + $0xc] ss:$16 sps:$4 sm:$0xff]  }
  0xa3   :  { %1822 = vmatpush2.bf16.msra.mxu1 %v3223_v45  ;;  %1782 = vmatprep.subr.bf16.mxu0 %v3228_v46  ;;  %v3319_v45 = vld [vmem:[#allocation5 + $0x20c] ss:$16 sps:$4 sm:$0xff]   ;;  %v3314_v46 = vld [vmem:[#allocation5 + $0x8] ss:$16 sps:$4 sm:$0xff]  }
  0xa4   :  { %1823 = vmatprep.subr.bf16.mxu1 %v3231_v48  ;;  %v3317_v48 = vld [vmem:[#allocation5 + $0x208] ss:$16 sps:$4 sm:$0xff]  }
  0xa6   :  { %1783 = vmatpush2.bf16.msra.mxu0 %v3226_v49  ;;  %v3322_v49 = vld [vmem:[#allocation5 + $0x1ec] ss:$16 sps:$4 sm:$0xff]  }
  0xa7   :  { %1824 = vmatpush2.bf16.msra.mxu1 %v3229_v50  ;;  %1784 = vmatprep.subr.bf16.mxu0 %v3234_v52  ;;  %v3325_v50 = vld [vmem:[#allocation5 + $0x3ec] ss:$16 sps:$4 sm:$0xff]   ;;  %v3320_v52 = vld [vmem:[#allocation5 + $0x1e8] ss:$16 sps:$4 sm:$0xff]  }
  0xa8   :  { %1825 = vmatprep.subr.bf16.mxu1 %v3237_v53  ;;  %v3323_v53 = vld [vmem:[#allocation5 + $0x3e8] ss:$16 sps:$4 sm:$0xff]  }
  0xaa   :  { %1785 = vmatpush2.bf16.msra.mxu0 %v3232_v54  ;;  %v3328_v54 = vld [vmem:[#allocation5 + $0x1cc] ss:$16 sps:$4 sm:$0xff]  }
  0xab   :  { %1826 = vmatpush2.bf16.msra.mxu1 %v3235_v55  ;;  %1786 = vmatprep.subr.bf16.mxu0 %v3240_v56  ;;  %v3331_v55 = vld [vmem:[#allocation5 + $0x3cc] ss:$16 sps:$4 sm:$0xff]   ;;  %v3326_v56 = vld [vmem:[#allocation5 + $0x1c8] ss:$16 sps:$4 sm:$0xff]  }
  0xac   :  { %1827 = vmatprep.subr.bf16.mxu1 %v3243_v57  ;;  %v3329_v57 = vld [vmem:[#allocation5 + $0x3c8] ss:$16 sps:$4 sm:$0xff]  }
  0xae   :  { %1787 = vmatpush2.bf16.msra.mxu0 %v3238_v58  ;;  %v3334_v58 = vld [vmem:[#allocation5 + $0x1ac] ss:$16 sps:$4 sm:$0xff]  }
  0xaf   :  { %1828 = vmatpush2.bf16.msra.mxu1 %v3241_v59  ;;  %1788 = vmatprep.subr.bf16.mxu0 %v3246_v60  ;;  %v3337_v59 = vld [vmem:[#allocation5 + $0x3ac] ss:$16 sps:$4 sm:$0xff]   ;;  %v3332_v60 = vld [vmem:[#allocation5 + $0x1a8] ss:$16 sps:$4 sm:$0xff]  }
  0xb0   :  { %1829 = vmatprep.subr.bf16.mxu1 %v3249_v61  ;;  %v3335_v61 = vld [vmem:[#allocation5 + $0x3a8] ss:$16 sps:$4 sm:$0xff]  }
  0xb2   :  { %1789 = vmatpush2.bf16.msra.mxu0 %v3244_v62  ;;  %v3340_v62 = vld [vmem:[#allocation5 + $0x18c] ss:$16 sps:$4 sm:$0xff]  }
  0xb3   :  { %1830 = vmatpush2.bf16.msra.mxu1 %v3247_v63  ;;  %1790 = vmatprep.subr.bf16.mxu0 %v3252_v0  ;;  %v3343_v63 = vld [vmem:[#allocation5 + $0x38c] ss:$16 sps:$4 sm:$0xff]   ;;  %v3338_v0 = vld [vmem:[#allocation5 + $0x188] ss:$16 sps:$4 sm:$0xff]  }
  0xb4   :  { %1831 = vmatprep.subr.bf16.mxu1 %v3255_v1  ;;  %v3341_v1 = vld [vmem:[#allocation5 + $0x388] ss:$16 sps:$4 sm:$0xff]  }
  0xb6   :  { %1791 = vmatpush2.bf16.msra.mxu0 %v3250_v2  ;;  %v3346_v2 = vld [vmem:[#allocation5 + $0x16c] ss:$16 sps:$4 sm:$0xff]  }
  0xb7   :  { %1832 = vmatpush2.bf16.msra.mxu1 %v3253_v3  ;;  %1792 = vmatprep.subr.bf16.mxu0 %v3258_v4  ;;  %v3349_v3 = vld [vmem:[#allocation5 + $0x36c] ss:$16 sps:$4 sm:$0xff]   ;;  %v3344_v4 = vld [vmem:[#allocation5 + $0x168] ss:$16 sps:$4 sm:$0xff]  }
  0xb8   :  { %1833 = vmatprep.subr.bf16.mxu1 %v3261_v5  ;;  %v3347_v5 = vld [vmem:[#allocation5 + $0x368] ss:$16 sps:$4 sm:$0xff]  }
  0xba   :  { %1793 = vmatpush2.bf16.msra.mxu0 %v3256_v8  ;;  %v3352_v8 = vld [vmem:[#allocation5 + $0x14c] ss:$16 sps:$4 sm:$0xff]  }
  0xbb   :  { %1834 = vmatpush2.bf16.msra.mxu1 %v3259_v9  ;;  %1794 = vmatprep.subr.bf16.mxu0 %v3264_v10  ;;  %v3355_v9 = vld [vmem:[#allocation5 + $0x34c] ss:$16 sps:$4 sm:$0xff]   ;;  %v3350_v10 = vld [vmem:[#allocation5 + $0x148] ss:$16 sps:$4 sm:$0xff]  }
  0xbc   :  { %1835 = vmatprep.subr.bf16.mxu1 %v3267_v11  ;;  %v3353_v11 = vld [vmem:[#allocation5 + $0x348] ss:$16 sps:$4 sm:$0xff]  }
  0xbe   :  { %1795 = vmatpush2.bf16.msra.mxu0 %v3262_v12  ;;  %v3358_v12 = vld [vmem:[#allocation5 + $0x12c] ss:$16 sps:$4 sm:$0xff]  }
  0xbf   :  { %1836 = vmatpush2.bf16.msra.mxu1 %v3265_v13  ;;  %1846 = vmatprep.subr.bf16.mxu0 %v3274_v14  ;;  %v3361_v13 = vld [vmem:[#allocation5 + $0x32c] ss:$16 sps:$4 sm:$0xff]   ;;  %v3356_v14 = vld [vmem:[#allocation5 + $0x128] ss:$16 sps:$4 sm:$0xff]  }
  0xc0   :  { %1887 = vmatprep.subr.bf16.mxu1 %v3277_v15  ;;  %v3359_v15 = vld [vmem:[#allocation5 + $0x328] ss:$16 sps:$4 sm:$0xff]  }
  0xc1   :  { %1797 = vmatmul.mubr.bf16.vlgmr.msra.gmra.mxu0 %v3799_v16 }
  0xc2   :  { %1838 = vmatmul.mubr.bf16.vlgmr.msra.gmra.mxu1 %v3803_v17  ;;  %1847 = vmatpush1.bf16.msra.mxu0 %v3272_v18  ;;  %v3364_v18 = vld [vmem:[#allocation5 + $0x10c] ss:$16 sps:$4 sm:$0xff]  }
  0xc3   :  { %1888 = vmatpush1.bf16.msra.mxu1 %v3275_v19  ;;  %1848 = vmatprep.subr.bf16.mxu0 %v3280_v20  ;;  %v3367_v19 = vld [vmem:[#allocation5 + $0x30c] ss:$16 sps:$4 sm:$0xff]   ;;  %v3362_v20 = vld [vmem:[#allocation5 + $0x108] ss:$16 sps:$4 sm:$0xff]  }
  0xc4   :  { %1889 = vmatprep.subr.bf16.mxu1 %v3283_v21  ;;  %1878 = vmatprep.mubr.bf16.mxu0 %v3771_v47  ;;  %v3299_v47 = vld [vmem:[#allocation5 + $0x268] ss:$16 sps:$4 sm:$0xff]  }
  0xc5   :  { %1919 = vmatprep.mubr.bf16.mxu1 %v3773_v51  ;;  %v3304_v51 = vld [vmem:[#allocation5 + $0x4c] ss:$16 sps:$4 sm:$0xff]   ;;  %v3365_v21 = vld [vmem:[#allocation5 + $0x308] ss:$16 sps:$4 sm:$0xff]  }
  0xc6   :  { %1849 = vmatpush1.bf16.msra.mxu0 %v3278_v22  ;;  %v3370_v22 = vld [vmem:[#allocation5 + $0x4ec] ss:$16 sps:$4 sm:$0xff]  }
  0xc7   :  { %1890 = vmatpush1.bf16.msra.mxu1 %v3281_v23  ;;  %1850 = vmatprep.subr.bf16.mxu0 %v3286_v24  ;;  %v3373_v23 = vld [vmem:[#allocation5 + $0x6ec] ss:$16 sps:$4 sm:$0xff]   ;;  %v3368_v24 = vld [vmem:[#allocation5 + $0x4e8] ss:$16 sps:$4 sm:$0xff]  }
  0xc8   :  { %1891 = vmatprep.subr.bf16.mxu1 %v3289_v25  ;;  %v3371_v25 = vld [vmem:[#allocation5 + $0x6e8] ss:$16 sps:$4 sm:$0xff]  }
  0xca   :  { %1851 = vmatpush1.bf16.msra.mxu0 %v3284_v26  ;;  %v3376_v26 = vld [vmem:[#allocation5 + $0x4cc] ss:$16 sps:$4 sm:$0xff]  }
  0xcb   :  { %1892 = vmatpush1.bf16.msra.mxu1 %v3287_v27  ;;  %1852 = vmatprep.subr.bf16.mxu0 %v3292_v28  ;;  %v3379_v27 = vld [vmem:[#allocation5 + $0x6cc] ss:$16 sps:$4 sm:$0xff]   ;;  %v3374_v28 = vld [vmem:[#allocation5 + $0x4c8] ss:$16 sps:$4 sm:$0xff]  }
  0xcc   :  { %1893 = vmatprep.subr.bf16.mxu1 %v3295_v29  ;;  %v3377_v29 = vld [vmem:[#allocation5 + $0x6c8] ss:$16 sps:$4 sm:$0xff]  }
  0xce   :  { %1853 = vmatpush1.bf16.msra.mxu0 %v3290_v30  ;;  %v3382_v30 = vld [vmem:[#allocation5 + $0x4ac] ss:$16 sps:$4 sm:$0xff]  }
  0xcf   :  { %1894 = vmatpush1.bf16.msra.mxu1 %v3293_v31  ;;  %1854 = vmatprep.subr.bf16.mxu0 %v3298_v32  ;;  %v3385_v31 = vld [vmem:[#allocation5 + $0x6ac] ss:$16 sps:$4 sm:$0xff]   ;;  %v3380_v32 = vld [vmem:[#allocation5 + $0x4a8] ss:$16 sps:$4 sm:$0xff]  }
  0xd0   :  { %1895 = vmatprep.subr.bf16.mxu1 %v3301_v33  ;;  %v3383_v33 = vld [vmem:[#allocation5 + $0x6a8] ss:$16 sps:$4 sm:$0xff]  }
  0xd2   :  { %1855 = vmatpush1.bf16.msra.mxu0 %v3296_v34  ;;  %v3388_v34 = vld [vmem:[#allocation5 + $0x48c] ss:$16 sps:$4 sm:$0xff]  }
  0xd3   :  { %1896 = vmatpush1.bf16.msra.mxu1 %v3299_v47  ;;  %1856 = vmatprep.subr.bf16.mxu0 %v3304_v51  ;;  %v3386_v47 = vld [vmem:[#allocation5 + $0x488] ss:$16 sps:$4 sm:$0xff]   ;;  %v3394_v51 = vld [vmem:[#allocation5 + $0x46c] ss:$16 sps:$4 sm:$0xff]  }
  0xd4   :  { %1897 = vmatprep.subr.bf16.mxu1 %v3307_v35  ;;  %v3397_v35 = vld [vmem:[#allocation5 + $0x66c] ss:$16 sps:$4 sm:$0xff]  }
  0xd6   :  { %1857 = vmatpush1.bf16.msra.mxu0 %v3302_v38  ;;  %v3392_v38 = vld [vmem:[#allocation5 + $0x468] ss:$16 sps:$4 sm:$0xff]  }
  0xd7   :  { %1898 = vmatpush1.bf16.msra.mxu1 %v3305_v39  ;;  %1858 = vmatprep.subr.bf16.mxu0 %v3310_v40  ;;  %v3395_v39 = vld [vmem:[#allocation5 + $0x668] ss:$16 sps:$4 sm:$0xff]   ;;  %v3400_v40 = vld [vmem:[#allocation5 + $0x44c] ss:$16 sps:$4 sm:$0xff]  }
  0xd8   :  { %1899 = vmatprep.subr.bf16.mxu1 %v3313_v41  ;;  %v3401_v41 = vld [vmem:[#allocation5 + $0x648] ss:$16 sps:$4 sm:$0xff]  }
  0xda   :  { %1859 = vmatpush1.bf16.msra.mxu0 %v3308_v42  ;;  %v3406_v42 = vld [vmem:[#allocation5 + $0x42c] ss:$16 sps:$4 sm:$0xff]  }
  0xdb   :  { %1900 = vmatpush1.bf16.msra.mxu1 %v3311_v43  ;;  %1860 = vmatprep.subr.bf16.mxu0 %v3316_v44  ;;  %v3409_v43 = vld [vmem:[#allocation5 + $0x62c] ss:$16 sps:$4 sm:$0xff]   ;;  %v3404_v44 = vld [vmem:[#allocation5 + $0x428] ss:$16 sps:$4 sm:$0xff]  }
  0xdc   :  { %1901 = vmatprep.subr.bf16.mxu1 %v3319_v45  ;;  %v3407_v45 = vld [vmem:[#allocation5 + $0x628] ss:$16 sps:$4 sm:$0xff]  }
  0xde   :  { %1861 = vmatpush1.bf16.msra.mxu0 %v3314_v46  ;;  %v3412_v46 = vld [vmem:[#allocation5 + $0x40c] ss:$16 sps:$4 sm:$0xff]  }
  0xdf   :  { %1902 = vmatpush1.bf16.msra.mxu1 %v3317_v48  ;;  %1862 = vmatprep.subr.bf16.mxu0 %v3322_v49  ;;  %v3415_v48 = vld [vmem:[#allocation5 + $0x60c] ss:$16 sps:$4 sm:$0xff]   ;;  %v3410_v49 = vld [vmem:[#allocation5 + $0x408] ss:$16 sps:$4 sm:$0xff]  }
  0xe0   :  { %1903 = vmatprep.subr.bf16.mxu1 %v3325_v50  ;;  %v3413_v50 = vld [vmem:[#allocation5 + $0x608] ss:$16 sps:$4 sm:$0xff]  }
  0xe2   :  { %1863 = vmatpush2.bf16.msra.mxu0 %v3320_v52  ;;  %v3418_v52 = vld [vmem:[#allocation5 + $0x5ec] ss:$16 sps:$4 sm:$0xff]  }
  0xe3   :  { %1904 = vmatpush2.bf16.msra.mxu1 %v3323_v53  ;;  %1864 = vmatprep.subr.bf16.mxu0 %v3328_v54  ;;  %v3421_v53 = vld [vmem:[#allocation5 + $0x7ec] ss:$16 sps:$4 sm:$0xff]   ;;  %v3416_v54 = vld [vmem:[#allocation5 + $0x5e8] ss:$16 sps:$4 sm:$0xff]  }
  0xe4   :  { %1905 = vmatprep.subr.bf16.mxu1 %v3331_v55  ;;  %v3419_v55 = vld [vmem:[#allocation5 + $0x7e8] ss:$16 sps:$4 sm:$0xff]  }
  0xe6   :  { %1865 = vmatpush2.bf16.msra.mxu0 %v3326_v56  ;;  %v3424_v56 = vld [vmem:[#allocation5 + $0x5cc] ss:$16 sps:$4 sm:$0xff]  }
  0xe7   :  { %1906 = vmatpush2.bf16.msra.mxu1 %v3329_v57  ;;  %1866 = vmatprep.subr.bf16.mxu0 %v3334_v58  ;;  %v3427_v57 = vld [vmem:[#allocation5 + $0x7cc] ss:$16 sps:$4 sm:$0xff]   ;;  %v3422_v58 = vld [vmem:[#allocation5 + $0x5c8] ss:$16 sps:$4 sm:$0xff]  }
  0xe8   :  { %1907 = vmatprep.subr.bf16.mxu1 %v3337_v59  ;;  %v3425_v59 = vld [vmem:[#allocation5 + $0x7c8] ss:$16 sps:$4 sm:$0xff]  }
  0xea   :  { %1867 = vmatpush2.bf16.msra.mxu0 %v3332_v60  ;;  %v3430_v60 = vld [vmem:[#allocation5 + $0x5ac] ss:$16 sps:$4 sm:$0xff]  }
  0xeb   :  { %1908 = vmatpush2.bf16.msra.mxu1 %v3335_v61  ;;  %1868 = vmatprep.subr.bf16.mxu0 %v3340_v62  ;;  %v3433_v61 = vld [vmem:[#allocation5 + $0x7ac] ss:$16 sps:$4 sm:$0xff]   ;;  %v3428_v62 = vld [vmem:[#allocation5 + $0x5a8] ss:$16 sps:$4 sm:$0xff]  }
  0xec   :  { %1909 = vmatprep.subr.bf16.mxu1 %v3343_v63  ;;  %v3431_v63 = vld [vmem:[#allocation5 + $0x7a8] ss:$16 sps:$4 sm:$0xff]  }
  0xee   :  { %1869 = vmatpush2.bf16.msra.mxu0 %v3338_v0  ;;  %v3436_v0 = vld [vmem:[#allocation5 + $0x58c] ss:$16 sps:$4 sm:$0xff]  }
  0xef   :  { %1910 = vmatpush2.bf16.msra.mxu1 %v3341_v1  ;;  %1870 = vmatprep.subr.bf16.mxu0 %v3346_v2  ;;  %v3439_v1 = vld [vmem:[#allocation5 + $0x78c] ss:$16 sps:$4 sm:$0xff]   ;;  %v3434_v2 = vld [vmem:[#allocation5 + $0x588] ss:$16 sps:$4 sm:$0xff]  }
  0xf0   :  { %1911 = vmatprep.subr.bf16.mxu1 %v3349_v3  ;;  %v3437_v3 = vld [vmem:[#allocation5 + $0x788] ss:$16 sps:$4 sm:$0xff]  }
  0xf2   :  { %1871 = vmatpush2.bf16.msra.mxu0 %v3344_v4  ;;  %v3442_v4 = vld [vmem:[#allocation5 + $0x56c] ss:$16 sps:$4 sm:$0xff]  }
  0xf3   :  { %1912 = vmatpush2.bf16.msra.mxu1 %v3347_v5  ;;  %1872 = vmatprep.subr.bf16.mxu0 %v3352_v8  ;;  %v3445_v5 = vld [vmem:[#allocation5 + $0x76c] ss:$16 sps:$4 sm:$0xff]   ;;  %v3440_v8 = vld [vmem:[#allocation5 + $0x568] ss:$16 sps:$4 sm:$0xff]  }
  0xf4   :  { %1913 = vmatprep.subr.bf16.mxu1 %v3355_v9  ;;  %v3443_v9 = vld [vmem:[#allocation5 + $0x768] ss:$16 sps:$4 sm:$0xff]  }
  0xf6   :  { %1873 = vmatpush2.bf16.msra.mxu0 %v3350_v10  ;;  %v3448_v10 = vld [vmem:[#allocation5 + $0x54c] ss:$16 sps:$4 sm:$0xff]  }
  0xf7   :  { %1914 = vmatpush2.bf16.msra.mxu1 %v3353_v11  ;;  %1874 = vmatprep.subr.bf16.mxu0 %v3358_v12  ;;  %v3451_v11 = vld [vmem:[#allocation5 + $0x74c] ss:$16 sps:$4 sm:$0xff]   ;;  %v3446_v12 = vld [vmem:[#allocation5 + $0x548] ss:$16 sps:$4 sm:$0xff]  }
  0xf8   :  { %1915 = vmatprep.subr.bf16.mxu1 %v3361_v13  ;;  %v3449_v13 = vld [vmem:[#allocation5 + $0x748] ss:$16 sps:$4 sm:$0xff]  }
  0xfa   :  { %1875 = vmatpush2.bf16.msra.mxu0 %v3356_v14  ;;  %v3454_v14 = vld [vmem:[#allocation5 + $0x52c] ss:$16 sps:$4 sm:$0xff]  }
  0xfb   :  { %1916 = vmatpush2.bf16.msra.mxu1 %v3359_v15  ;;  %1876 = vmatprep.subr.bf16.mxu0 %v3364_v18  ;;  %v3457_v15 = vld [vmem:[#allocation5 + $0x72c] ss:$16 sps:$4 sm:$0xff]   ;;  %v3452_v18 = vld [vmem:[#allocation5 + $0x528] ss:$16 sps:$4 sm:$0xff]  }
  0xfc   :  { %1917 = vmatprep.subr.bf16.mxu1 %v3367_v19  ;;  %v3455_v19 = vld [vmem:[#allocation5 + $0x728] ss:$16 sps:$4 sm:$0xff]  }
  0xfe   :  { %1877 = vmatpush2.bf16.msra.mxu0 %v3362_v20  ;;  %v3460_v20 = vld [vmem:[#allocation5 + $0x50c] ss:$16 sps:$4 sm:$0xff]  }
  0xff   :  { %1918 = vmatpush2.bf16.msra.mxu1 %v3365_v21  ;;  %1928 = vmatprep.subr.bf16.mxu0 %v3370_v22  ;;  %v3463_v21 = vld [vmem:[#allocation5 + $0x70c] ss:$16 sps:$4 sm:$0xff]   ;;  %v3458_v22 = vld [vmem:[#allocation5 + $0x508] ss:$16 sps:$4 sm:$0xff]  }
 0x100   :  { %1969 = vmatprep.subr.bf16.mxu1 %v3373_v23  ;;  %v3461_v23 = vld [vmem:[#allocation5 + $0x708] ss:$16 sps:$4 sm:$0xff]  }
 0x101   :  { %1879 = vmatmul.mubr.bf16.vlgmr.msra.gmra.mxu0 %v3777_v6  ;;  %v3391_v6 = vld [vmem:[#allocation5 + $0x68c] ss:$16 sps:$4 sm:$0xff]  }
 0x102   :  { %1920 = vmatmul.mubr.bf16.vlgmr.msra.gmra.mxu1 %v3779_v7  ;;  %1929 = vmatpush1.bf16.msra.mxu0 %v3368_v24  ;;  %v3389_v7 = vld [vmem:[#allocation5 + $0x688] ss:$16 sps:$4 sm:$0xff]  }
 0x103   :  { %1970 = vmatpush1.bf16.msra.mxu1 %v3371_v25  ;;  %1930 = vmatprep.subr.bf16.mxu0 %v3376_v26  ;;  %v3466_v24 = vld [vmem:[#allocation8 + $0x74] ss:$8 sps:$4 sm:$0xff]   ;;  %v3464_v25 = vld [vmem:[#allocation8 + $0x70] ss:$8 sps:$4 sm:$0xff]   ;;  %v3469_v26 = vld [vmem:[#allocation8 + $0x64] ss:$8 sps:$4 sm:$0xff]  }
 0x104   :  { %1971 = vmatprep.subr.bf16.mxu1 %v3379_v27  ;;  %1960 = vmatprep.mubr.bf16.mxu0 %v3789_v36  ;;  %v3403_v36 = vld [vmem:[#allocation5 + $0x64c] ss:$16 sps:$4 sm:$0xff]  }
 0x105   :  { %2001 = vmatprep.mubr.bf16.mxu1 %v3793_v37  ;;  %v3398_v37 = vld [vmem:[#allocation5 + $0x448] ss:$16 sps:$4 sm:$0xff]  }
 0x106   :  { %1931 = vmatpush1.bf16.msra.mxu0 %v3374_v28 }
 0x107   :  { %1972 = vmatpush1.bf16.msra.mxu1 %v3377_v29  ;;  %1932 = vmatprep.subr.bf16.mxu0 %v3382_v30  ;;  %v3467_v29 = vld [vmem:[#allocation8 + $0x60] ss:$8 sps:$4 sm:$0xff]  }
 0x108   :  { %1973 = vmatprep.subr.bf16.mxu1 %v3385_v31 }
 0x10a   :  { %1933 = vmatpush1.bf16.msra.mxu0 %v3380_v32  ;;  %v3472_v32 = vld [vmem:[#allocation8 + $0x54] ss:$8 sps:$4 sm:$0xff]  }
 0x10b   :  { %1974 = vmatpush1.bf16.msra.mxu1 %v3383_v33  ;;  %1934 = vmatprep.subr.bf16.mxu0 %v3388_v34 }
 0x10c   :  { %1975 = vmatprep.subr.bf16.mxu1 %v3391_v6  ;;  %v3470_v6 = vld [vmem:[#allocation8 + $0x50] ss:$8 sps:$4 sm:$0xff]  }
 0x10e   :  { %1935 = vmatpush1.bf16.msra.mxu0 %v3386_v47 }
 0x10f   :  { %1976 = vmatpush1.bf16.msra.mxu1 %v3389_v7  ;;  %1936 = vmatprep.subr.bf16.mxu0 %v3394_v51  ;;  %v3475_v51 = vld [vmem:[#allocation8 + $0x44] ss:$8 sps:$4 sm:$0xff]  }
 0x110   :  { %1977 = vmatprep.subr.bf16.mxu1 %v3397_v35  ;;  %v3512_v35 = vld [vmem:[#allocation8 + $0x170] ss:$8 sps:$4 sm:$0xff]  }
 0x112   :  { %1937 = vmatpush1.bf16.msra.mxu0 %v3392_v38  ;;  %v3517_v38 = vld [vmem:[#allocation8 + $0x164] ss:$8 sps:$4 sm:$0xff]  }
 0x113   :  { %1978 = vmatpush1.bf16.msra.mxu1 %v3395_v39  ;;  %1938 = vmatprep.subr.bf16.mxu0 %v3400_v40  ;;  %v3515_v39 = vld [vmem:[#allocation8 + $0x160] ss:$8 sps:$4 sm:$0xff]   ;;  %v3478_v40 = vld [vmem:[#allocation8 + $0x34] ss:$8 sps:$4 sm:$0xff]  }
 0x114   :  { %1979 = vmatprep.subr.bf16.mxu1 %v3403_v36  ;;  %v3520_v36 = vld [vmem:[#allocation8 + $0x154] ss:$8 sps:$4 sm:$0xff]  }
 0x116   :  { %1939 = vmatpush1.bf16.msra.mxu0 %v3398_v37  ;;  %v3476_v37 = vld [vmem:[#allocation8 + $0x30] ss:$8 sps:$4 sm:$0xff]  }
 0x117   :  { %1980 = vmatpush1.bf16.msra.mxu1 %v3401_v41  ;;  %1940 = vmatprep.subr.bf16.mxu0 %v3406_v42  ;;  %v3518_v41 = vld [vmem:[#allocation8 + $0x150] ss:$8 sps:$4 sm:$0xff]   ;;  %v3481_v42 = vld [vmem:[#allocation8 + $0x24] ss:$8 sps:$4 sm:$0xff]  }
 0x118   :  { %1981 = vmatprep.subr.bf16.mxu1 %v3409_v43  ;;  %v3523_v43 = vld [vmem:[#allocation8 + $0x144] ss:$8 sps:$4 sm:$0xff]  }
 0x11a   :  { %1941 = vmatpush1.bf16.msra.mxu0 %v3404_v44  ;;  %v3479_v44 = vld [vmem:[#allocation8 + $0x20] ss:$8 sps:$4 sm:$0xff]  }
 0x11b   :  { %1982 = vmatpush1.bf16.msra.mxu1 %v3407_v45  ;;  %1942 = vmatprep.subr.bf16.mxu0 %v3412_v46  ;;  %v3521_v45 = vld [vmem:[#allocation8 + $0x140] ss:$8 sps:$4 sm:$0xff]   ;;  %v3484_v46 = vld [vmem:[#allocation8 + $0x14] ss:$8 sps:$4 sm:$0xff]  }
 0x11c   :  { %1983 = vmatprep.subr.bf16.mxu1 %v3415_v48  ;;  %v3526_v48 = vld [vmem:[#allocation8 + $0x134] ss:$8 sps:$4 sm:$0xff]  }
 0x11e   :  { %1943 = vmatpush1.bf16.msra.mxu0 %v3410_v49  ;;  %v3482_v49 = vld [vmem:[#allocation8 + $0x10] ss:$8 sps:$4 sm:$0xff]  }
 0x11f   :  { %1984 = vmatpush1.bf16.msra.mxu1 %v3413_v50  ;;  %1944 = vmatprep.subr.bf16.mxu0 %v3418_v52  ;;  %v3524_v50 = vld [vmem:[#allocation8 + $0x130] ss:$8 sps:$4 sm:$0xff]   ;;  %v3487_v52 = vld [vmem:[#allocation8 + $0x4] ss:$8 sps:$4 sm:$0xff]  }
 0x120   :  { %1985 = vmatprep.subr.bf16.mxu1 %v3421_v53  ;;  %v3529_v53 = vld [vmem:[#allocation8 + $0x124] ss:$8 sps:$4 sm:$0xff]  }
 0x122   :  { %1945 = vmatpush2.bf16.msra.mxu0 %v3416_v54  ;;  %v3485_v54 = vld [vmem:[#allocation8] ss:$8 sps:$4 sm:$0xff]  }
 0x123   :  { %1986 = vmatpush2.bf16.msra.mxu1 %v3419_v55  ;;  %1946 = vmatprep.subr.bf16.mxu0 %v3424_v56  ;;  %v3527_v55 = vld [vmem:[#allocation8 + $0x120] ss:$8 sps:$4 sm:$0xff]   ;;  %v3490_v56 = vld [vmem:[#allocation8 + $0xf4] ss:$8 sps:$4 sm:$0xff]  }
 0x124   :  { %1987 = vmatprep.subr.bf16.mxu1 %v3427_v57  ;;  %v3532_v57 = vld [vmem:[#allocation8 + $0x114] ss:$8 sps:$4 sm:$0xff]  }
 0x126   :  { %1947 = vmatpush2.bf16.msra.mxu0 %v3422_v58  ;;  %v3488_v58 = vld [vmem:[#allocation8 + $0xf0] ss:$8 sps:$4 sm:$0xff]  }
 0x127   :  { %1988 = vmatpush2.bf16.msra.mxu1 %v3425_v59  ;;  %1948 = vmatprep.subr.bf16.mxu0 %v3430_v60  ;;  %v3530_v59 = vld [vmem:[#allocation8 + $0x110] ss:$8 sps:$4 sm:$0xff]   ;;  %v3493_v60 = vld [vmem:[#allocation8 + $0xe4] ss:$8 sps:$4 sm:$0xff]  }
 0x128   :  { %1989 = vmatprep.subr.bf16.mxu1 %v3433_v61  ;;  %v3535_v61 = vld [vmem:[#allocation8 + $0x104] ss:$8 sps:$4 sm:$0xff]  }
 0x12a   :  { %1949 = vmatpush2.bf16.msra.mxu0 %v3428_v62  ;;  %v3491_v62 = vld [vmem:[#allocation8 + $0xe0] ss:$8 sps:$4 sm:$0xff]  }
 0x12b   :  { %1990 = vmatpush2.bf16.msra.mxu1 %v3431_v63  ;;  %1950 = vmatprep.subr.bf16.mxu0 %v3436_v0  ;;  %v3533_v63 = vld [vmem:[#allocation8 + $0x100] ss:$8 sps:$4 sm:$0xff]   ;;  %v3496_v0 = vld [vmem:[#allocation8 + $0xd4] ss:$8 sps:$4 sm:$0xff]  }
 0x12c   :  { %1991 = vmatprep.subr.bf16.mxu1 %v3439_v1  ;;  %v3538_v1 = vld [vmem:[#allocation8 + $0x1f4] ss:$8 sps:$4 sm:$0xff]  }
 0x12e   :  { %1951 = vmatpush2.bf16.msra.mxu0 %v3434_v2  ;;  %v3494_v2 = vld [vmem:[#allocation8 + $0xd0] ss:$8 sps:$4 sm:$0xff]  }
 0x12f   :  { %1992 = vmatpush2.bf16.msra.mxu1 %v3437_v3  ;;  %1952 = vmatprep.subr.bf16.mxu0 %v3442_v4  ;;  %v3536_v3 = vld [vmem:[#allocation8 + $0x1f0] ss:$8 sps:$4 sm:$0xff]   ;;  %v3499_v4 = vld [vmem:[#allocation8 + $0xc4] ss:$8 sps:$4 sm:$0xff]  }
 0x130   :  { %1993 = vmatprep.subr.bf16.mxu1 %v3445_v5  ;;  %v3541_v5 = vld [vmem:[#allocation8 + $0x1e4] ss:$8 sps:$4 sm:$0xff]  }
 0x132   :  { %1953 = vmatpush2.bf16.msra.mxu0 %v3440_v8  ;;  %v3497_v8 = vld [vmem:[#allocation8 + $0xc0] ss:$8 sps:$4 sm:$0xff]  }
 0x133   :  { %1994 = vmatpush2.bf16.msra.mxu1 %v3443_v9  ;;  %1954 = vmatprep.subr.bf16.mxu0 %v3448_v10  ;;  %v3539_v9 = vld [vmem:[#allocation8 + $0x1e0] ss:$8 sps:$4 sm:$0xff]   ;;  %v3502_v10 = vld [vmem:[#allocation8 + $0xb4] ss:$8 sps:$4 sm:$0xff]  }
 0x134   :  { %1995 = vmatprep.subr.bf16.mxu1 %v3451_v11  ;;  %v3544_v11 = vld [vmem:[#allocation8 + $0x1d4] ss:$8 sps:$4 sm:$0xff]  }
 0x136   :  { %1955 = vmatpush2.bf16.msra.mxu0 %v3446_v12  ;;  %v354_v12 = vlaneseq }
 0x137   :  { %1996 = vmatpush2.bf16.msra.mxu1 %v3449_v13  ;;  %1956 = vmatprep.subr.bf16.mxu0 %v3454_v14  ;;  %v3500_v13 = vld [vmem:[#allocation8 + $0xb0] ss:$8 sps:$4 sm:$0xff]  }
 0x138   :  { %1997 = vmatprep.subr.bf16.mxu1 %v3457_v15  ;;  %v3542_v14 = vld [vmem:[#allocation8 + $0x1d0] ss:$8 sps:$4 sm:$0xff]   ;;  %v3505_v15 = vld [vmem:[#allocation8 + $0xa4] ss:$8 sps:$4 sm:$0xff]  }
 0x13a   :  { %1957 = vmatpush2.bf16.msra.mxu0 %v3452_v18  ;;  %v3547_v18 = vld [vmem:[#allocation8 + $0x1c4] ss:$8 sps:$4 sm:$0xff]  }
 0x13b   :  { %1998 = vmatpush2.bf16.msra.mxu1 %v3455_v19  ;;  %1958 = vmatprep.subr.bf16.mxu0 %v3460_v20  ;;  %v3823_v19 = vshrl.u32 %v354_v12, 7  ;;  %v3503_v20 = vld [vmem:[#allocation8 + $0xa0] ss:$8 sps:$4 sm:$0xff]   ;;  %v3571_v12 = vld [vmem:[#allocation10 + $0x10] sm:$0xff]  }
 0x13c   :  { %1999 = vmatprep.subr.bf16.mxu1 %v3463_v21  ;;  %v3545_v21 = vld [vmem:[#allocation8 + $0x1c0] ss:$8 sps:$4 sm:$0xff]  }
 0x13e   :  { %1959 = vmatpush2.bf16.msra.mxu0 %v3458_v22  ;;  %v3508_v22 = vld [vmem:[#allocation8 + $0x94] ss:$8 sps:$4 sm:$0xff]  }
 0x13f   :  { %2000 = vmatpush2.bf16.msra.mxu1 %v3461_v23  ;;  %2414 = vmatprep.subr.bf16.mxu0 %v3466_v24  ;;  %v3550_v23 = vld [vmem:[#allocation8 + $0x1b4] ss:$8 sps:$4 sm:$0xff]   ;;  %v356_v24 = vsub.s32 0, %v3823_v19 }
 0x141   :  { %v3813_v27 = vpop.f32.mrf.mxu0  ;;  %1961 = vmatmul.mubr.bf16.vlgmr.msra.gmra.mxu0 %v3799_v16  ;;  %v3514_v16 = vld [vmem:[#allocation8 + $0x174] ss:$8 sps:$4 sm:$0xff]  }
 0x142   :  { %v3815_v28 = vpop.f32.mrf.mxu1  ;;  %2002 = vmatmul.mubr.bf16.vlgmr.msra.gmra.mxu1 %v3803_v17  ;;  %2415 = vmatpush1.bf16.msra.mxu0 %v3464_v25  ;;  %v3473_v17 = vld [vmem:[#allocation8 + $0x40] ss:$8 sps:$4 sm:$0xff]   ;;  %v3826_v25 = vld [vmem:[#allocation7] sm:$0xf] }
 0x143   :  { %v3819_v30 = vpop.f32.mrf.mxu0  ;;  %2416 = vmatprep.subr.bf16.mxu0 %v3469_v26  ;;  %2455 = vmatprep.subr.bf16.mxu1 %v3514_v16  ;;  %v360_v26 = vsub.s32 1, %v3823_v19 }
 0x144   :  { %v3821_v31 = vpop.f32.mrf.mxu1  ;;  %2456 = vmatpush1.bf16.msra.mxu1 %v3512_v35  ;;  %v3553_v35 = vld [vmem:[#allocation8 + $0x1a4] ss:$8 sps:$4 sm:$0xff]  }
 0x145   :  { %v1720_v33 = vpop.f32.mrf.mxu0  ;;  %2457 = vmatprep.subr.bf16.mxu1 %v3517_v38  ;;  %v3551_v38 = vld [vmem:[#allocation8 + $0x1a0] ss:$8 sps:$4 sm:$0xff]  }
 0x146   :  { %v1761_v34 = vpop.f32.mrf.mxu1  ;;  %2417 = vmatpush1.bf16.msra.mxu0 %v3467_v29  ;;  %v3506_v29 = vld [vmem:[#allocation8 + $0x90] ss:$8 sps:$4 sm:$0xff]   ;;  %v3511_v33 = vld [vmem:[#allocation8 + $0x84] ss:$8 sps:$4 sm:$0xff]  }
 0x147   :  { %v1721_v47 = vpop.f32.mrf.mxu0  ;;  %2418 = vmatprep.subr.bf16.mxu0 %v3472_v32  ;;  %v3548_v32 = vld [vmem:[#allocation8 + $0x1b0] ss:$8 sps:$4 sm:$0xff]   ;;  %v357_v34 = vrot.slane %v3826_v25, %v356_v24 }
 0x148   :  { %v1762_v7 = vpop.f32.mrf.mxu1  ;;  %2458 = vmatpush1.bf16.msra.mxu1 %v3515_v39  ;;  %v3509_v47 = vld [vmem:[#allocation8 + $0x80] ss:$8 sps:$4 sm:$0xff]  }
 0x149   :  { %2459 = vmatprep.subr.bf16.mxu1 %v3520_v36  ;;  %v1717_v7 = vadd.f32 %v3813_v27, %v357_v34  ;;  %v3554_v27 = vld [vmem:[#allocation8 + $0x190] ss:$8 sps:$4 sm:$0xff]  }
 0x14a   :  { %2419 = vmatpush1.bf16.msra.mxu0 %v3470_v6  ;;  %v361_v6 = vrot.slane %v3826_v25, %v360_v26 }
 0x14b   :  { %2420 = vmatprep.subr.bf16.mxu0 %v3475_v51  ;;  %v1758_v16 = vadd.f32 %v3815_v28, %v1717_v7 }
 0x14c   :  { %2460 = vmatpush1.bf16.msra.mxu1 %v3518_v41  ;;  %v1719_v51 = vadd.f32 %v3819_v30, %v361_v6 }
 0x14d   :  { %2461 = vmatprep.subr.bf16.mxu1 %v3523_v43 }
 0x14e   :  { %2421 = vmatpush1.bf16.msra.mxu0 %v3473_v17 }
 0x14f   :  { %2422 = vmatprep.subr.bf16.mxu0 %v3478_v40  ;;  %v1760_v40 = vadd.f32 %v3821_v31, %v1719_v51 }
 0x150   :  { %2462 = vmatpush1.bf16.msra.mxu1 %v3521_v45 }
 0x151   :  { %2463 = vmatprep.subr.bf16.mxu1 %v3526_v48 }
 0x152   :  { %2423 = vmatpush1.bf16.msra.mxu0 %v3476_v37 }
 0x153   :  { %2424 = vmatprep.subr.bf16.mxu0 %v3481_v42  ;;  %v3556_v42 = vld [vmem:[#allocation8 + $0x194] ss:$8 sps:$4 sm:$0xff]  }
 0x154   :  { %2464 = vmatpush1.bf16.msra.mxu1 %v3524_v50  ;;  %v3559_v50 = vld [vmem:[#allocation8 + $0x184] ss:$8 sps:$4 sm:$0xff]  }
 0x155   :  { %2465 = vmatprep.subr.bf16.mxu1 %v3529_v53  ;;  %v3557_v53 = vld [vmem:[#allocation8 + $0x180] ss:$8 sps:$4 sm:$0xff]  }
 0x156   :  { %2425 = vmatpush1.bf16.msra.mxu0 %v3479_v44 }
 0x157   :  { %2426 = vmatprep.subr.bf16.mxu0 %v3484_v46 }
 0x158   :  { %2466 = vmatpush1.bf16.msra.mxu1 %v3527_v55 }
 0x159   :  { %2467 = vmatprep.subr.bf16.mxu1 %v3532_v57 }
 0x15a   :  { %2427 = vmatpush1.bf16.msra.mxu0 %v3482_v49 }
 0x15b   :  { %2428 = vmatprep.subr.bf16.mxu0 %v3487_v52 }
 0x15c   :  { %2468 = vmatpush1.bf16.msra.mxu1 %v3530_v59 }
 0x15d   :  { %2469 = vmatprep.subr.bf16.mxu1 %v3535_v61 }
 0x15e   :  { %2429 = vmatpush1.bf16.msra.mxu0 %v3485_v54 }
 0x15f   :  { %2430 = vmatprep.subr.bf16.mxu0 %v3490_v56 }
 0x160   :  { %2470 = vmatpush1.bf16.msra.mxu1 %v3533_v63  ;;  %v3560_v63 = vld [vmem:[#allocation10 + $0x78] sm:$0xff]  }
 0x161   :  { %2471 = vmatprep.subr.bf16.mxu1 %v3538_v1  ;;  %v3562_v1 = vld [vmem:[#allocation10 + $0x70] sm:$0xff]  }
 0x162   :  { %2431 = vmatpush2.bf16.msra.mxu0 %v3488_v58 }
 0x163   :  { %2432 = vmatprep.subr.bf16.mxu0 %v3493_v60 }
 0x164   :  { %2472 = vmatpush2.bf16.msra.mxu1 %v3536_v3  ;;  %v3564_v3 = vld [vmem:[#allocation10 + $0x68] sm:$0xff]  }
 0x165   :  { %2473 = vmatprep.subr.bf16.mxu1 %v3541_v5  ;;  %v3566_v5 = vld [vmem:[#allocation10 + $0x60] sm:$0xff]  }
 0x166   :  { %2433 = vmatpush2.bf16.msra.mxu0 %v3491_v62 }
 0x167   :  { %2434 = vmatprep.subr.bf16.mxu0 %v3496_v0  ;;  %v3561_v0 = vld [vmem:[#allocation10 + $0x38] sm:$0xff]  }
 0x168   :  { %2474 = vmatpush2.bf16.msra.mxu1 %v3539_v9  ;;  %v3568_v9 = vld [vmem:[#allocation10 + $0x58] sm:$0xff]  }
 0x169   :  { %2475 = vmatprep.subr.bf16.mxu1 %v3544_v11  ;;  %v3570_v11 = vld [vmem:[#allocation10 + $0x50] sm:$0xff]  }
 0x16a   :  { %2435 = vmatpush2.bf16.msra.mxu0 %v3494_v2  ;;  %v3563_v2 = vld [vmem:[#allocation10 + $0x30] sm:$0xff]  }
 0x16b   :  { %2436 = vmatprep.subr.bf16.mxu0 %v3499_v4  ;;  %v3565_v4 = vld [vmem:[#allocation10 + $0x28] sm:$0xff]  }
 0x16c   :  { %2476 = vmatpush2.bf16.msra.mxu1 %v3542_v14  ;;  %v368_v14 = vsub.s32 3, %v3823_v19 }
 0x16d   :  { %2477 = vmatprep.subr.bf16.mxu1 %v3547_v18 }
 0x16e   :  { %2437 = vmatpush2.bf16.msra.mxu0 %v3497_v8  ;;  %v3567_v8 = vld [vmem:[#allocation10 + $0x20] sm:$0xff]   ;;  %v369_v18 = vrot.slane %v3826_v25, %v368_v14 }
 0x16f   :  { %2438 = vmatprep.subr.bf16.mxu0 %v3502_v10  ;;  %v3569_v10 = vld [vmem:[#allocation10 + $0x18] sm:$0xff]  }
 0x170   :  { %2478 = vmatpush2.bf16.msra.mxu1 %v3545_v21 }
 0x171   :  { %2479 = vmatprep.subr.bf16.mxu1 %v3550_v23 }
 0x172   :  { %2439 = vmatpush2.bf16.msra.mxu0 %v3500_v13  ;;  %v364_v13 = vsub.s32 2, %v3823_v19  ;;  %v3021_v19 = vld [vmem:[%s3862_s6] ss:$0 sm:$0xff] }
 0x173   :  { %2440 = vmatprep.subr.bf16.mxu0 %v3505_v15 }
 0x174   :  { %2480 = vmatpush2.bf16.msra.mxu1 %v3548_v32  ;;  %v365_v15 = vrot.slane %v3826_v25, %v364_v13 }
 0x175   :  { %2481 = vmatprep.subr.bf16.mxu1 %v3553_v35 }
 0x176   :  { %2441 = vmatpush2.bf16.msra.mxu0 %v3503_v20 }
 0x177   :  { %2442 = vmatprep.subr.bf16.mxu0 %v3508_v22 }
 0x178   :  { %2482 = vmatpush2.bf16.msra.mxu1 %v3551_v38 }
 0x179   :  { %2483 = vmatprep.subr.bf16.mxu1 %v3556_v42  ;;  %v3573_v42 = vld [vmem:[#allocation10 + $0x8] sm:$0xff]  }
 0x17a   :  { %2443 = vmatpush2.bf16.msra.mxu0 %v3506_v29 }
 0x17b   :  { %2444 = vmatprep.subr.bf16.mxu0 %v3511_v33 }
 0x17c   :  { %2484 = vmatpush2.bf16.msra.mxu1 %v3554_v27  ;;  %v3574_v27 = vld [vmem:[#allocation10 + $0x40] sm:$0xff]  }
 0x17d   :  { %2485 = vmatprep.subr.bf16.mxu1 %v3559_v50 }
 0x17e   :  { %2445 = vmatpush2.bf16.msra.mxu0 %v3509_v47 }
 0x17f   :  { %3038 = vmatprep.subr.bf16.mxu0 %v3560_v63 }
 0x180   :  { %2486 = vmatpush2.bf16.msra.mxu1 %v3557_v53 }
 0x181   :  { %v1798_v17 = vpop.f32.mrf.mxu0 }
 0x182   :  { %v1839_v39 = vpop.f32.mrf.mxu1  ;;  %v1799_v36 = vadd.f32 %v1798_v17, %v1758_v16 }
 0x183   :  { %v1800_v37 = vpop.f32.mrf.mxu0 }
 0x184   :  { %v1841_v41 = vpop.f32.mrf.mxu1  ;;  %v1840_v43 = vadd.f32 %v1839_v39, %v1799_v36  ;;  %v1801_v44 = vadd.f32 %v1800_v37, %v1760_v40 }
 0x185   :  { %v1802_v45 = vpop.f32.mrf.mxu0 }
 0x186   :  { %v1843_v30 = vpop.f32.mrf.mxu1  ;;  %v1842_v46 = vadd.f32 %v1841_v41, %v1801_v44  ;;  %v2010_v28 = vmax.f32 %v1840_v43, 0.0  ;;  %v3572_v41 = vld [vmem:[#allocation10 + $0x48] sm:$0xff]   ;;  %v3575_v45 = vld [vmem:[#allocation10] sm:$0xff]  }
 0x187   :  { %v1803_v48 = vpop.f32.mrf.mxu0 }
 0x188   :  { %v1844_v49 = vpop.f32.mrf.mxu1  ;;  %v2011_v52 = vmax.f32 %v1842_v46, 0.0  ;;  %v2014_v54 = vpack.c.bf16 %v2010_v28, %v2010_v28  ;;  %v2082_v46 = vld [vmem:[%s3860_s4] sm:$0x3] }
 0x189   :  { %v2087_v28 = vrot.slane %v2082_v46, %v356_v24  ;;  %v2091_v48 = vrot.slane %v2082_v46, %v360_v26 }
 0x18a   :  { %v2015_v31 = vpack.c.bf16 %v2011_v52, %v2011_v52 }
 0x18c   :  { %2446 = vmatprep.mubr.bf16.mxu0 %v2015_v31 }
 0x18d   :  { %2447 = vmatmul.mubr.bf16.vlgmr.msra.gmra.mxu0 %v2014_v54 }
 0x18e   :  { %3039 = vmatpush3.bf16.msra.mxu0 %v3561_v0 }
 0x18f   :  { %3040 = vmatprep.subr.bf16.mxu0 %v3562_v1 }
 0x192   :  { %3041 = vmatpush3.bf16.msra.mxu0 %v3563_v2 }
 0x193   :  { %3042 = vmatprep.subr.bf16.mxu0 %v3564_v3 }
 0x196   :  { %3043 = vmatpush3.bf16.msra.mxu0 %v3565_v4 }
 0x197   :  { %3044 = vmatprep.subr.bf16.mxu0 %v3566_v5 }
 0x19a   :  { %3045 = vmatpush3.bf16.msra.mxu0 %v3567_v8 }
 0x19b   :  { %3046 = vmatprep.subr.bf16.mxu0 %v3568_v9 }
 0x19e   :  { %3047 = vmatpush3.bf16.msra.mxu0 %v3569_v10 }
 0x19f   :  { %3048 = vmatprep.subr.bf16.mxu0 %v3570_v11 }
 0x1a2   :  { %3049 = vmatpush3.bf16.msra.mxu0 %v3571_v12 }
 0x1a3   :  { %3050 = vmatprep.subr.bf16.mxu0 %v3572_v41 }
 0x1a6   :  { %3051 = vmatpush3.bf16.msra.mxu0 %v3573_v42 }
 0x1a7   :  { %3052 = vmatprep.subr.bf16.mxu0 %v3574_v27 }
 0x1aa   :  { %3053 = vmatpush3.bf16.msra.mxu0 %v3575_v45 }
 0x1c1   :  { %v1880_v55 = vpop.f32.mrf.mxu0 }
 0x1c2   :  { %v1921_v56 = vpop.f32.mrf.mxu1  ;;  %v1881_v20 = vadd.f32 %v1880_v55, %v365_v15 }
 0x1c3   :  { %v1882_v57 = vpop.f32.mrf.mxu0 }
 0x1c4   :  { %v1923_v58 = vpop.f32.mrf.mxu1  ;;  %v1883_v21 = vadd.f32 %v1882_v57, %v369_v18  ;;  %v1922_v22 = vadd.f32 %v1921_v56, %v1881_v20 }
 0x1c5   :  { %v1884_v59 = vpop.f32.mrf.mxu0 }
 0x1c6   :  { %v1925_v60 = vpop.f32.mrf.mxu1  ;;  %v1924_v32 = vadd.f32 %v1923_v58, %v1883_v21 }
 0x1c7   :  { %v1885_v61 = vpop.f32.mrf.mxu0 }
 0x1c8   :  { %v1926_v62 = vpop.f32.mrf.mxu1 }
 0x201   :  { %v1962_v23 = vpop.f32.mrf.mxu0 }
 0x202   :  { %v2003_v29 = vpop.f32.mrf.mxu1  ;;  %v1963_v33 = vadd.f32 %v1962_v23, %v1922_v22 }
 0x203   :  { %v1964_v34 = vpop.f32.mrf.mxu0 }
 0x204   :  { %v2005_v6 = vpop.f32.mrf.mxu1  ;;  %v2004_v47 = vadd.f32 %v2003_v29, %v1963_v33  ;;  %v1965_v7 = vadd.f32 %v1964_v34, %v1924_v32 }
 0x205   :  { %v1966_v51 = vpop.f32.mrf.mxu0 }
 0x206   :  { %v2007_v35 = vpop.f32.mrf.mxu1  ;;  %v2006_v16 = vadd.f32 %v2005_v6, %v1965_v7  ;;  %v2012_v38 = vmax.f32 %v2004_v47, 0.0 }
 0x207   :  { %v1967_v17 = vpop.f32.mrf.mxu0 }
 0x208   :  { %v2008_v39 = vpop.f32.mrf.mxu1  ;;  %v2013_v40 = vmax.f32 %v2006_v16, 0.0  ;;  %v2016_v25 = vpack.c.bf16 %v2012_v38, %v2012_v38 }
 0x20a   :  { %v2017_v36 = vpack.c.bf16 %v2013_v40, %v2013_v40 }
 0x20c   :  { %2487 = vmatprep.mubr.bf16.mxu1 %v2017_v36 }
 0x20d   :  { %2488 = vmatmul.mubr.bf16.vlgmr.msra.gmra.mxu1 %v2016_v25 }
 0x24d   :  { %v2448_v37 = vpop.f32.mrf.mxu0 }
 0x24e   :  { %v2449_v49 = vadd.f32 %v2448_v37, %v2087_v28 }
 0x24f   :  { %v2450_v43 = vpop.f32.mrf.mxu0 }
 0x250   :  { %v2451_v52 = vadd.f32 %v2450_v43, %v2091_v48 }
 0x251   :  { %v2452_v44 = vpop.f32.mrf.mxu0 }
 0x253   :  { %v2453_v30 = vpop.f32.mrf.mxu0 }
 0x2cd   :  { %v2489_v50 = vpop.f32.mrf.mxu1 }
 0x2ce   :  { %v2490_v53 = vadd.f32 %v2489_v50, %v2449_v49 }
 0x2cf   :  { %v2491_v31 = vpop.f32.mrf.mxu1 }
 0x2d0   :  { %v2492_v54 = vadd.f32 %v2491_v31, %v2451_v52  ;;  %v2496_v55 = vmax.f32 %v2490_v53, 0.0 }
 0x2d1   :  { %v2493_v56 = vpop.f32.mrf.mxu1 }
 0x2d2   :  { %v2497_v57 = vmax.f32 %v2492_v54, 0.0  ;;  %v2498_v60 = vpack.c.bf16 %v2496_v55, %v2496_v55 }
 0x2d3   :  { %v2494_v58 = vpop.f32.mrf.mxu1 }
 0x2d4   :  { %v2499_v59 = vpack.c.bf16 %v2497_v57, %v2497_v57 }
 0x2d6   :  { %2667 = vmatprep.mubr.bf16.mxu0 %v2499_v59 }
 0x2d7   :  { %2668 = vmatmul.mubr.bf16.vlgmr.msra.gmra.mxu0 %v2498_v60 }
 0x397   :  { %v3054_v61 = vpop.f32.mrf.mxu0 }
 0x399   :  { %v3055_v24 = vpop.f32.mrf.mxu0 }
 0x39a   :  { %v3056_v26 = vadd.f32 %v3055_v24, %v3054_v61 }
 0x39b   :  { %v3057_v62 = vpop.f32.mrf.mxu0 }
 0x39c   :  { %v2670_v63 = vadd.f32 %v3056_v26, %v3021_v19 }
 0x39d   :  { %v3058_v0 = vpop.f32.mrf.mxu0 }
 0x39e   :  { %2675 = vst [vmem:[#allocation11] sm:$0xff] %v2670_v63 }
 0x39f   :  { %3687 = shalt.err (!%p3684_p1)
}
 0x3a0   :  { %2685 = dma.vmem_to_hbm [thread:$0]  %s2683_s8, 128, %s3863_s7, [#allocation4]  }
 0x3a1   :  { %3702 = dma.done.wait [#allocation4], 128  }
 0x3a2   :  { %3703 = vsyncadd [#allocation4], 4294967168 }
 0x3a3   :  { %2689 = vsyncpa [#allocation3], 1 }
 0x3a4   :  { %2690 = vsyncpa [#allocation6], 1 }
 0x3a5   :  { %2691 = vsyncpa [#allocation9], 1 }
 0x3a6   :  { %2692 = vsyncpa [#allocation4], 1 }

</bundles_post_ra>
